<compile_context>
chip_gen: v5e
topology: v5e:2x2
jax: 0.10.0
libtpu: 0.0.40
codegen_flags: <defaults>
</compile_context>

<pallas_src>
import jax
import jax.numpy as jnp
from jax import lax
from jax.experimental import pallas as pl
from jax.experimental.pallas import tpu as pltpu

# ---- model hyper-parameters (match the PyTorch module) ----------------------
SEQ_LEN = 8          # seq_length
LABEL_LEN = 5        # label_len
EMB_DIM = 300        # Conv1d in_channels
CONV_OUT = 100       # Conv1d out_channels
KSIZE = 3            # kernel_size
HID2 = 20            # linear2 out_features
VOCAB = 50           # rows of emb_matrix (synthetic)
L_OUT = SEQ_LEN - KSIZE + 1   # conv output length == avg-pool window

# ---- TPU tiling / padding constants -----------------------------------------
VOCAB_PAD = 64                # per-position one-hot lanes (50 -> 64)
C_PAD = 128                   # conv-out / hidden / logit lanes padded to 128
LABEL_PAD = 8                 # narrow output lanes (5 -> 8)
B_TILE_MAX = 2048             # max batch rows per grid step
B_ALIGN = 256                 # tile granularity (multiple of 128 for v5e too)


def cnn_classifier_kernel(tok_ref, w1_ref, b1_ref, w2_ref, b2_ref,
                          w3_ref, b3_ref, out_ref):
    """One batch tile per grid step.

    tok_ref: (Bt, SEQ_LEN)            int32  raw token ids
    w1_ref : (SEQ_LEN, 64, 128)       bf16   fused embedding+Conv1d+AvgPool
    b1_ref : (1, 128)                 f32    conv bias (exact: pool is linear)
    w2_ref : (128, 128)               bf16   Linear(100,20), zero padded
    b2_ref : (1, 128)                 f32
    w3_ref : (128, 128)               bf16   Linear(20,label_len), zero padded
    b3_ref : (1, 128)                 f32    pad lanes hold -1e30 (softmax mask)
    out_ref: (Bt, 8)                  f32    softmax probs (lanes >= 5 are 0)
    """
    tok = tok_ref[...]                                          # (Bt, S) int32
    vid = lax.broadcasted_iota(jnp.int32, (1, VOCAB_PAD), 1)    # vocab lane ids

    # GEMM 1: embedding lookup + Conv1d + AvgPool, fused.  The one-hot for each
    # position is built in VMEM (iota compare, VPU filler under the MXU) and
    # contracted against the per-position slice of the fused weight.
    h = jnp.zeros((tok.shape[0], C_PAD), jnp.float32)
    for s in range(SEQ_LEN):
        oh = (tok[:, s:s + 1] == vid).astype(jnp.bfloat16)      # (Bt, 64)
        h += jnp.dot(oh, w1_ref[s], preferred_element_type=jnp.float32)
    h = jnp.maximum(h + b1_ref[...], 0.0)                       # ReLU

    # GEMM 2: Linear(100 -> 20)  (dropout = identity in eval)  + ReLU
    h = jnp.dot(h.astype(jnp.bfloat16), w2_ref[...],
                preferred_element_type=jnp.float32)
    h = jnp.maximum(h + b2_ref[...], 0.0)

    # GEMM 3: Linear(20 -> label_len) + softmax.  Pad-lane mask lives in b3.
    logits = jnp.dot(h.astype(jnp.bfloat16), w3_ref[...],
                     preferred_element_type=jnp.float32) + b3_ref[...]
    m = jnp.max(logits, axis=-1, keepdims=True)
    e = jnp.exp(logits - m)
    probs = e * pl.reciprocal(jnp.sum(e, axis=-1, keepdims=True), approx=True)
    out_ref[...] = probs[:, :LABEL_PAD]                         # narrow store


def cnn_classifier_forward(token_ids, params):
    """token_ids: (B, SEQ_LEN) int32. Returns softmax probs (B, LABEL_LEN) f32."""
    B = token_ids.shape[0]
    b_pad = pl.cdiv(B, B_ALIGN) * B_ALIGN
    # Big tiles amortize the ~0.35us/step overhead; keep >=2 grid steps when
    # possible so dimension_semantics=("parallel",) can use both v7x cores.
    b_tile = max(B_ALIGN, min(B_TILE_MAX, B_ALIGN * (b_pad // (2 * B_ALIGN))))
    b_pad = pl.cdiv(b_pad, b_tile) * b_tile
    tok = jnp.pad(token_ids.astype(jnp.int32), ((0, b_pad - B), (0, 0)))

    out = pl.pallas_call(
        cnn_classifier_kernel,
        out_shape=jax.ShapeDtypeStruct((b_pad, LABEL_PAD), jnp.float32),
        grid_spec=pltpu.PrefetchScalarGridSpec(
            num_scalar_prefetch=0,
            grid=(b_pad // b_tile,),
            in_specs=[
                pl.BlockSpec((b_tile, SEQ_LEN), lambda b: (b, 0)),
                pl.BlockSpec((SEQ_LEN, VOCAB_PAD, C_PAD), lambda b: (0, 0, 0)),
                pl.BlockSpec((1, C_PAD), lambda b: (0, 0)),
                pl.BlockSpec((C_PAD, C_PAD), lambda b: (0, 0)),
                pl.BlockSpec((1, C_PAD), lambda b: (0, 0)),
                pl.BlockSpec((C_PAD, C_PAD), lambda b: (0, 0)),
                pl.BlockSpec((1, C_PAD), lambda b: (0, 0)),
            ],
            out_specs=pl.BlockSpec((b_tile, LABEL_PAD), lambda b: (b, 0)),
        ),
        compiler_params=pltpu.CompilerParams(
            dimension_semantics=("parallel",)),
    )(tok, params["w1"], params["b1"], params["w2"], params["b2"],
      params["w3"], params["b3"])
    return out[:B, :LABEL_LEN]


# ---- parameter construction --------------------------------------------------
def init_raw_params(key):
    """Deterministic synthetic parameters in the PyTorch layouts."""
    ks = jax.random.split(key, 7)
    emb = jax.random.normal(ks[0], (VOCAB, EMB_DIM), jnp.float32) * 0.1
    conv_w = jax.random.normal(ks[1], (CONV_OUT, EMB_DIM, KSIZE),
                               jnp.float32) * 0.05            # (out, in, k)
    conv_b = jax.random.normal(ks[2], (CONV_OUT,), jnp.float32) * 0.05
    w2 = jax.random.normal(ks[3], (HID2, CONV_OUT), jnp.float32) * 0.1  # (out,in)
    b2 = jax.random.normal(ks[4], (HID2,), jnp.float32) * 0.1
    w3 = jax.random.normal(ks[5], (LABEL_LEN, HID2), jnp.float32) * 0.1
    b3 = jax.random.normal(ks[6], (LABEL_LEN,), jnp.float32) * 0.1
    return dict(emb=emb, conv_w=conv_w, conv_b=conv_b,
                w2=w2, b2=b2, w3=w3, b3=b3)


def prepare_params(raw):
    """One-time (f32) fusion + padding + bf16 cast of the kernel weights."""
    # Fuse Conv1d + AvgPool: pooled[c] = sum_{s,e} x[s,e] * M[s,e,c] + conv_b[c]
    # (exact: the mean-pool is linear and precedes the ReLU).
    wk = jnp.transpose(raw["conv_w"], (2, 1, 0))               # (K, E, C_OUT)
    M = jnp.zeros((SEQ_LEN, EMB_DIM, CONV_OUT), jnp.float32)
    for k in range(KSIZE):
        M = M.at[k:k + L_OUT].add(wk[k] / L_OUT)
    # Fold the frozen embedding: G[s, v, c] = sum_e emb[v, e] * M[s, e, c]
    G = jnp.einsum("ve,sec->svc", raw["emb"], M)               # (S, VOCAB, C_OUT)
    w1 = jnp.pad(G, ((0, 0), (0, VOCAB_PAD - VOCAB),
                     (0, C_PAD - CONV_OUT))).astype(jnp.bfloat16)
    b1 = jnp.pad(raw["conv_b"], (0, C_PAD - CONV_OUT))[None, :]  # f32

    w2 = jnp.pad(raw["w2"].T, ((0, C_PAD - CONV_OUT),
                               (0, C_PAD - HID2))).astype(jnp.bfloat16)
    b2 = jnp.pad(raw["b2"], (0, C_PAD - HID2))[None, :]          # f32
    w3 = jnp.pad(raw["w3"].T, ((0, C_PAD - HID2),
                               (0, C_PAD - LABEL_LEN))).astype(jnp.bfloat16)
    # Fold the softmax lane mask into the bias: pad lanes get -1e30 (kept f32).
    b3 = jnp.concatenate(
        [raw["b3"], jnp.full((C_PAD - LABEL_LEN,), -1e30, jnp.float32)])[None, :]
    return dict(w1=w1, b1=b1, w2=w2, b2=b2, w3=w3, b3=b3)


# ---- pure-JAX reference (mirrors the PyTorch forward, f32) -------------------
def reference_forward(token_ids, raw):
    x = jnp.take(raw["emb"], token_ids, axis=0)                # (B, S, E)
    x = jnp.transpose(x, (0, 2, 1))                            # (B, E, S)
    conv = sum(jnp.einsum("bes,ce->bcs", x[:, :, k:k + L_OUT],
                          raw["conv_w"][:, :, k]) for k in range(KSIZE))
    conv = conv + raw["conv_b"][None, :, None]                 # (B, C_OUT, L_OUT)
    pooled = jnp.mean(conv, axis=-1)                           # (B, C_OUT)
    h = jax.nn.relu(pooled)
    h = jax.nn.relu(h @ raw["w2"].T + raw["b2"])
    logits = h @ raw["w3"].T + raw["b3"]
    return jax.nn.softmax(logits, axis=-1)


if __name__ == "__main__":
    key = jax.random.PRNGKey(0)
    pkey, xkey, xkey2 = jax.random.split(key, 3)
    raw = init_raw_params(pkey)
    params = prepare_params(raw)

    # Small primary check (B=2), matching the module's expected input shape.
    B = 2
    token_ids = jax.random.randint(xkey, (B, SEQ_LEN), 0, VOCAB, dtype=jnp.int32)
    probs = jax.block_until_ready(cnn_classifier_forward(token_ids, params))
    assert probs.shape == (B, LABEL_LEN)
    assert bool(jnp.all(jnp.isfinite(probs)))
    assert bool(jnp.allclose(jnp.sum(probs, axis=-1), 1.0, atol=1e-2))
    ref = reference_forward(token_ids, raw)
    assert bool(jnp.allclose(probs, ref, atol=5e-2)), (probs, ref)

    # Secondary check that exercises the multi-tile (grid > 1) + padding path.
    B2 = 600
    token_ids2 = jax.random.randint(xkey2, (B2, SEQ_LEN), 0, VOCAB,
                                    dtype=jnp.int32)
    probs2 = jax.block_until_ready(cnn_classifier_forward(token_ids2, params))
    ref2 = reference_forward(token_ids2, raw)
    assert probs2.shape == (B2, LABEL_LEN)
    assert bool(jnp.allclose(probs2, ref2, atol=5e-2))

    print("KERNEL_OK")
</pallas_src>

<mosaic_0001>
module attributes {stable_mosaic.version = 11 : i64} {
  func.func @cnn_classifier_kernel(%arg0: i32, %arg1: memref<256x8xi32, #tpu.memory_space<vmem>>, %arg2: memref<8x64x128xbf16, #tpu.memory_space<vmem>>, %arg3: memref<1x128xf32, #tpu.memory_space<vmem>>, %arg4: memref<128x128xbf16, #tpu.memory_space<vmem>>, %arg5: memref<1x128xf32, #tpu.memory_space<vmem>>, %arg6: memref<128x128xbf16, #tpu.memory_space<vmem>>, %arg7: memref<1x128xf32, #tpu.memory_space<vmem>>, %arg8: memref<256x8xf32, #tpu.memory_space<vmem>>) attributes {dimension_semantics = [#tpu.dimension_semantics<parallel>], iteration_bounds = array<i64: 1>, scalar_prefetch = 0 : i64, scratch_operands = 0 : i64, tpu.core_type = #tpu.core_type<tc>, window_params = [{transform_indices = @transform_0, window_bounds = array<i64: 256, 8>}, {pipeline_mode = #tpu.pipeline_mode<synchronous>, transform_indices = @transform_1, window_bounds = array<i64: 8, 64, 128>}, {pipeline_mode = #tpu.pipeline_mode<synchronous>, transform_indices = @transform_2, window_bounds = array<i64: 1, 128>}, {pipeline_mode = #tpu.pipeline_mode<synchronous>, transform_indices = @transform_3, window_bounds = array<i64: 128, 128>}, {pipeline_mode = #tpu.pipeline_mode<synchronous>, transform_indices = @transform_4, window_bounds = array<i64: 1, 128>}, {pipeline_mode = #tpu.pipeline_mode<synchronous>, transform_indices = @transform_5, window_bounds = array<i64: 128, 128>}, {pipeline_mode = #tpu.pipeline_mode<synchronous>, transform_indices = @transform_6, window_bounds = array<i64: 1, 128>}, {transform_indices = @transform_7, window_bounds = array<i64: 256, 8>}]} {
    %c0 = arith.constant 0 : index
    %c0_0 = arith.constant 0 : index
    %0 = vector.load %arg1[%c0, %c0_0] : memref<256x8xi32, #tpu.memory_space<vmem>>, vector<256x8xi32>
    %1 = tpu.iota {dimensions = array<i32: 1>} : vector<1x64xi32>
    %cst = arith.constant 0.000000e+00 : f32
    %2 = vector.broadcast %cst : f32 to vector<256x128xf32>
    %3 = vector.extract_strided_slice %0 {offsets = [0, 0], sizes = [256, 1], strides = [1, 1]} : vector<256x8xi32> to vector<256x1xi32>
    %4 = vector.broadcast %3 : vector<256x1xi32> to vector<256x64xi32>
    %5 = vector.broadcast %1 : vector<1x64xi32> to vector<256x64xi32>
    %6 = arith.cmpi eq, %4, %5 : vector<256x64xi32>
    %7 = arith.extui %6 : vector<256x64xi1> to vector<256x64xi32>
    %8 = arith.sitofp %7 : vector<256x64xi32> to vector<256x64xf32>
    %9 = arith.truncf %8 : vector<256x64xf32> to vector<256x64xbf16>
    %c0_1 = arith.constant 0 : index
    %c0_2 = arith.constant 0 : index
    %c0_3 = arith.constant 0 : index
    %10 = vector.load %arg2[%c0_1, %c0_2, %c0_3] : memref<8x64x128xbf16, #tpu.memory_space<vmem>>, vector<1x64x128xbf16>
    %11 = vector.shape_cast %10 : vector<1x64x128xbf16> to vector<64x128xbf16>
    %cst_4 = arith.constant dense<0.000000e+00> : vector<256x128xf32>
    %12 = tpu.matmul %9, %11, %cst_4 {dimension_numbers = #tpu.dot_dimension_numbers<[1], [0], [0], [1], [0, 0, 1, 1], [], []>} : vector<256x64xbf16>, vector<64x128xbf16>, vector<256x128xf32> -> vector<256x128xf32>
    %13 = arith.addf %2, %12 : vector<256x128xf32>
    %14 = vector.extract_strided_slice %0 {offsets = [0, 1], sizes = [256, 1], strides = [1, 1]} : vector<256x8xi32> to vector<256x1xi32>
    %15 = vector.broadcast %14 : vector<256x1xi32> to vector<256x64xi32>
    %16 = vector.broadcast %1 : vector<1x64xi32> to vector<256x64xi32>
    %17 = arith.cmpi eq, %15, %16 : vector<256x64xi32>
    %18 = arith.extui %17 : vector<256x64xi1> to vector<256x64xi32>
    %19 = arith.sitofp %18 : vector<256x64xi32> to vector<256x64xf32>
    %20 = arith.truncf %19 : vector<256x64xf32> to vector<256x64xbf16>
    %c1 = arith.constant 1 : index
    %c0_5 = arith.constant 0 : index
    %c0_6 = arith.constant 0 : index
    %21 = vector.load %arg2[%c1, %c0_5, %c0_6] : memref<8x64x128xbf16, #tpu.memory_space<vmem>>, vector<1x64x128xbf16>
    %22 = vector.shape_cast %21 : vector<1x64x128xbf16> to vector<64x128xbf16>
    %cst_7 = arith.constant dense<0.000000e+00> : vector<256x128xf32>
    %23 = tpu.matmul %20, %22, %cst_7 {dimension_numbers = #tpu.dot_dimension_numbers<[1], [0], [0], [1], [0, 0, 1, 1], [], []>} : vector<256x64xbf16>, vector<64x128xbf16>, vector<256x128xf32> -> vector<256x128xf32>
    %24 = arith.addf %13, %23 : vector<256x128xf32>
    %25 = vector.extract_strided_slice %0 {offsets = [0, 2], sizes = [256, 1], strides = [1, 1]} : vector<256x8xi32> to vector<256x1xi32>
    %26 = vector.broadcast %25 : vector<256x1xi32> to vector<256x64xi32>
    %27 = vector.broadcast %1 : vector<1x64xi32> to vector<256x64xi32>
    %28 = arith.cmpi eq, %26, %27 : vector<256x64xi32>
    %29 = arith.extui %28 : vector<256x64xi1> to vector<256x64xi32>
    %30 = arith.sitofp %29 : vector<256x64xi32> to vector<256x64xf32>
    %31 = arith.truncf %30 : vector<256x64xf32> to vector<256x64xbf16>
    %c2 = arith.constant 2 : index
    %c0_8 = arith.constant 0 : index
    %c0_9 = arith.constant 0 : index
    %32 = vector.load %arg2[%c2, %c0_8, %c0_9] : memref<8x64x128xbf16, #tpu.memory_space<vmem>>, vector<1x64x128xbf16>
    %33 = vector.shape_cast %32 : vector<1x64x128xbf16> to vector<64x128xbf16>
    %cst_10 = arith.constant dense<0.000000e+00> : vector<256x128xf32>
    %34 = tpu.matmul %31, %33, %cst_10 {dimension_numbers = #tpu.dot_dimension_numbers<[1], [0], [0], [1], [0, 0, 1, 1], [], []>} : vector<256x64xbf16>, vector<64x128xbf16>, vector<256x128xf32> -> vector<256x128xf32>
    %35 = arith.addf %24, %34 : vector<256x128xf32>
    %36 = vector.extract_strided_slice %0 {offsets = [0, 3], sizes = [256, 1], strides = [1, 1]} : vector<256x8xi32> to vector<256x1xi32>
    %37 = vector.broadcast %36 : vector<256x1xi32> to vector<256x64xi32>
    %38 = vector.broadcast %1 : vector<1x64xi32> to vector<256x64xi32>
    %39 = arith.cmpi eq, %37, %38 : vector<256x64xi32>
    %40 = arith.extui %39 : vector<256x64xi1> to vector<256x64xi32>
    %41 = arith.sitofp %40 : vector<256x64xi32> to vector<256x64xf32>
    %42 = arith.truncf %41 : vector<256x64xf32> to vector<256x64xbf16>
    %c3 = arith.constant 3 : index
    %c0_11 = arith.constant 0 : index
    %c0_12 = arith.constant 0 : index
    %43 = vector.load %arg2[%c3, %c0_11, %c0_12] : memref<8x64x128xbf16, #tpu.memory_space<vmem>>, vector<1x64x128xbf16>
    %44 = vector.shape_cast %43 : vector<1x64x128xbf16> to vector<64x128xbf16>
    %cst_13 = arith.constant dense<0.000000e+00> : vector<256x128xf32>
    %45 = tpu.matmul %42, %44, %cst_13 {dimension_numbers = #tpu.dot_dimension_numbers<[1], [0], [0], [1], [0, 0, 1, 1], [], []>} : vector<256x64xbf16>, vector<64x128xbf16>, vector<256x128xf32> -> vector<256x128xf32>
    %46 = arith.addf %35, %45 : vector<256x128xf32>
    %47 = vector.extract_strided_slice %0 {offsets = [0, 4], sizes = [256, 1], strides = [1, 1]} : vector<256x8xi32> to vector<256x1xi32>
    %48 = vector.broadcast %47 : vector<256x1xi32> to vector<256x64xi32>
    %49 = vector.broadcast %1 : vector<1x64xi32> to vector<256x64xi32>
    %50 = arith.cmpi eq, %48, %49 : vector<256x64xi32>
    %51 = arith.extui %50 : vector<256x64xi1> to vector<256x64xi32>
    %52 = arith.sitofp %51 : vector<256x64xi32> to vector<256x64xf32>
    %53 = arith.truncf %52 : vector<256x64xf32> to vector<256x64xbf16>
    %c4 = arith.constant 4 : index
    %c0_14 = arith.constant 0 : index
    %c0_15 = arith.constant 0 : index
    %54 = vector.load %arg2[%c4, %c0_14, %c0_15] : memref<8x64x128xbf16, #tpu.memory_space<vmem>>, vector<1x64x128xbf16>
    %55 = vector.shape_cast %54 : vector<1x64x128xbf16> to vector<64x128xbf16>
    %cst_16 = arith.constant dense<0.000000e+00> : vector<256x128xf32>
    %56 = tpu.matmul %53, %55, %cst_16 {dimension_numbers = #tpu.dot_dimension_numbers<[1], [0], [0], [1], [0, 0, 1, 1], [], []>} : vector<256x64xbf16>, vector<64x128xbf16>, vector<256x128xf32> -> vector<256x128xf32>
    %57 = arith.addf %46, %56 : vector<256x128xf32>
    %58 = vector.extract_strided_slice %0 {offsets = [0, 5], sizes = [256, 1], strides = [1, 1]} : vector<256x8xi32> to vector<256x1xi32>
    %59 = vector.broadcast %58 : vector<256x1xi32> to vector<256x64xi32>
    %60 = vector.broadcast %1 : vector<1x64xi32> to vector<256x64xi32>
    %61 = arith.cmpi eq, %59, %60 : vector<256x64xi32>
    %62 = arith.extui %61 : vector<256x64xi1> to vector<256x64xi32>
    %63 = arith.sitofp %62 : vector<256x64xi32> to vector<256x64xf32>
    %64 = arith.truncf %63 : vector<256x64xf32> to vector<256x64xbf16>
    %c5 = arith.constant 5 : index
    %c0_17 = arith.constant 0 : index
    %c0_18 = arith.constant 0 : index
    %65 = vector.load %arg2[%c5, %c0_17, %c0_18] : memref<8x64x128xbf16, #tpu.memory_space<vmem>>, vector<1x64x128xbf16>
    %66 = vector.shape_cast %65 : vector<1x64x128xbf16> to vector<64x128xbf16>
    %cst_19 = arith.constant dense<0.000000e+00> : vector<256x128xf32>
    %67 = tpu.matmul %64, %66, %cst_19 {dimension_numbers = #tpu.dot_dimension_numbers<[1], [0], [0], [1], [0, 0, 1, 1], [], []>} : vector<256x64xbf16>, vector<64x128xbf16>, vector<256x128xf32> -> vector<256x128xf32>
    %68 = arith.addf %57, %67 : vector<256x128xf32>
    %69 = vector.extract_strided_slice %0 {offsets = [0, 6], sizes = [256, 1], strides = [1, 1]} : vector<256x8xi32> to vector<256x1xi32>
    %70 = vector.broadcast %69 : vector<256x1xi32> to vector<256x64xi32>
    %71 = vector.broadcast %1 : vector<1x64xi32> to vector<256x64xi32>
    %72 = arith.cmpi eq, %70, %71 : vector<256x64xi32>
    %73 = arith.extui %72 : vector<256x64xi1> to vector<256x64xi32>
    %74 = arith.sitofp %73 : vector<256x64xi32> to vector<256x64xf32>
    %75 = arith.truncf %74 : vector<256x64xf32> to vector<256x64xbf16>
    %c6 = arith.constant 6 : index
    %c0_20 = arith.constant 0 : index
    %c0_21 = arith.constant 0 : index
    %76 = vector.load %arg2[%c6, %c0_20, %c0_21] : memref<8x64x128xbf16, #tpu.memory_space<vmem>>, vector<1x64x128xbf16>
    %77 = vector.shape_cast %76 : vector<1x64x128xbf16> to vector<64x128xbf16>
    %cst_22 = arith.constant dense<0.000000e+00> : vector<256x128xf32>
    %78 = tpu.matmul %75, %77, %cst_22 {dimension_numbers = #tpu.dot_dimension_numbers<[1], [0], [0], [1], [0, 0, 1, 1], [], []>} : vector<256x64xbf16>, vector<64x128xbf16>, vector<256x128xf32> -> vector<256x128xf32>
    %79 = arith.addf %68, %78 : vector<256x128xf32>
    %80 = vector.extract_strided_slice %0 {offsets = [0, 7], sizes = [256, 1], strides = [1, 1]} : vector<256x8xi32> to vector<256x1xi32>
    %81 = vector.broadcast %80 : vector<256x1xi32> to vector<256x64xi32>
    %82 = vector.broadcast %1 : vector<1x64xi32> to vector<256x64xi32>
    %83 = arith.cmpi eq, %81, %82 : vector<256x64xi32>
    %84 = arith.extui %83 : vector<256x64xi1> to vector<256x64xi32>
    %85 = arith.sitofp %84 : vector<256x64xi32> to vector<256x64xf32>
    %86 = arith.truncf %85 : vector<256x64xf32> to vector<256x64xbf16>
    %c7 = arith.constant 7 : index
    %c0_23 = arith.constant 0 : index
    %c0_24 = arith.constant 0 : index
    %87 = vector.load %arg2[%c7, %c0_23, %c0_24] : memref<8x64x128xbf16, #tpu.memory_space<vmem>>, vector<1x64x128xbf16>
    %88 = vector.shape_cast %87 : vector<1x64x128xbf16> to vector<64x128xbf16>
    %cst_25 = arith.constant dense<0.000000e+00> : vector<256x128xf32>
    %89 = tpu.matmul %86, %88, %cst_25 {dimension_numbers = #tpu.dot_dimension_numbers<[1], [0], [0], [1], [0, 0, 1, 1], [], []>} : vector<256x64xbf16>, vector<64x128xbf16>, vector<256x128xf32> -> vector<256x128xf32>
    %90 = arith.addf %79, %89 : vector<256x128xf32>
    %c0_26 = arith.constant 0 : index
    %c0_27 = arith.constant 0 : index
    %91 = vector.load %arg3[%c0_26, %c0_27] : memref<1x128xf32, #tpu.memory_space<vmem>>, vector<1x128xf32>
    %92 = vector.broadcast %91 : vector<1x128xf32> to vector<256x128xf32>
    %93 = arith.addf %90, %92 : vector<256x128xf32>
    %cst_28 = arith.constant 0.000000e+00 : f32
    %94 = vector.broadcast %cst_28 : f32 to vector<256x128xf32>
    %95 = arith.maximumf %93, %94 : vector<256x128xf32>
    %96 = arith.truncf %95 : vector<256x128xf32> to vector<256x128xbf16>
    %c0_29 = arith.constant 0 : index
    %c0_30 = arith.constant 0 : index
    %97 = vector.load %arg4[%c0_29, %c0_30] : memref<128x128xbf16, #tpu.memory_space<vmem>>, vector<128x128xbf16>
    %cst_31 = arith.constant dense<0.000000e+00> : vector<256x128xf32>
    %98 = tpu.matmul %96, %97, %cst_31 {dimension_numbers = #tpu.dot_dimension_numbers<[1], [0], [0], [1], [0, 0, 1, 1], [], []>} : vector<256x128xbf16>, vector<128x128xbf16>, vector<256x128xf32> -> vector<256x128xf32>
    %c0_32 = arith.constant 0 : index
    %c0_33 = arith.constant 0 : index
    %99 = vector.load %arg5[%c0_32, %c0_33] : memref<1x128xf32, #tpu.memory_space<vmem>>, vector<1x128xf32>
    %100 = vector.broadcast %99 : vector<1x128xf32> to vector<256x128xf32>
    %101 = arith.addf %98, %100 : vector<256x128xf32>
    %cst_34 = arith.constant 0.000000e+00 : f32
    %102 = vector.broadcast %cst_34 : f32 to vector<256x128xf32>
    %103 = arith.maximumf %101, %102 : vector<256x128xf32>
    %104 = arith.truncf %103 : vector<256x128xf32> to vector<256x128xbf16>
    %c0_35 = arith.constant 0 : index
    %c0_36 = arith.constant 0 : index
    %105 = vector.load %arg6[%c0_35, %c0_36] : memref<128x128xbf16, #tpu.memory_space<vmem>>, vector<128x128xbf16>
    %cst_37 = arith.constant dense<0.000000e+00> : vector<256x128xf32>
    %106 = tpu.matmul %104, %105, %cst_37 {dimension_numbers = #tpu.dot_dimension_numbers<[1], [0], [0], [1], [0, 0, 1, 1], [], []>} : vector<256x128xbf16>, vector<128x128xbf16>, vector<256x128xf32> -> vector<256x128xf32>
    %c0_38 = arith.constant 0 : index
    %c0_39 = arith.constant 0 : index
    %107 = vector.load %arg7[%c0_38, %c0_39] : memref<1x128xf32, #tpu.memory_space<vmem>>, vector<1x128xf32>
    %108 = vector.broadcast %107 : vector<1x128xf32> to vector<256x128xf32>
    %109 = arith.addf %106, %108 : vector<256x128xf32>
    %cst_40 = arith.constant dense<0xFF800000> : vector<256xf32>
    %110 = vector.multi_reduction <maximumf>, %109, %cst_40 [1] : vector<256x128xf32> to vector<256xf32>
    %111 = vector.shape_cast %110 : vector<256xf32> to vector<256x1xf32>
    %112 = vector.broadcast %111 : vector<256x1xf32> to vector<256x128xf32>
    %113 = arith.subf %109, %112 : vector<256x128xf32>
    %114 = math.exp %113 : vector<256x128xf32>
    %cst_41 = arith.constant dense<0.000000e+00> : vector<256xf32>
    %115 = vector.multi_reduction <add>, %114, %cst_41 [1] : vector<256x128xf32> to vector<256xf32>
    %116 = vector.shape_cast %115 : vector<256xf32> to vector<256x1xf32>
    %117 = tpu.reciprocal %116 {approx = true} : vector<256x1xf32> -> vector<256x1xf32>
    %118 = vector.broadcast %117 : vector<256x1xf32> to vector<256x128xf32>
    %119 = arith.mulf %114, %118 : vector<256x128xf32>
    %120 = vector.extract_strided_slice %119 {offsets = [0, 0], sizes = [256, 8], strides = [1, 1]} : vector<256x128xf32> to vector<256x8xf32>
    %c0_42 = arith.constant 0 : index
    %c0_43 = arith.constant 0 : index
    %121 = vector.load %arg8[%c0_42, %c0_43] : memref<256x8xf32, #tpu.memory_space<vmem>>, vector<256x8xf32>
    tpu.vector_store %arg8[%c0_42, %c0_43], %120 {strides = array<i32>} : memref<256x8xf32, #tpu.memory_space<vmem>>, vector<256x8xf32>,
    return
  }
  func.func @transform_0(%arg0: i32) -> (i32, i32) {
    %c0_i32 = arith.constant 0 : i32
    %c0_i32_0 = arith.constant 0 : i32
    return %arg0, %c0_i32 : i32, i32
  }
  func.func @transform_1(%arg0: i32) -> (i32, i32, i32) {
    %c0_i32 = arith.constant 0 : i32
    %c0_i32_0 = arith.constant 0 : i32
    %c0_i32_1 = arith.constant 0 : i32
    %c0_i32_2 = arith.constant 0 : i32
    return %c0_i32, %c0_i32_0, %c0_i32_1 : i32, i32, i32
  }
  func.func @transform_2(%arg0: i32) -> (i32, i32) {
    %c0_i32 = arith.constant 0 : i32
    %c0_i32_0 = arith.constant 0 : i32
    %c0_i32_1 = arith.constant 0 : i32
    return %c0_i32, %c0_i32_0 : i32, i32
  }
  func.func @transform_3(%arg0: i32) -> (i32, i32) {
    %c0_i32 = arith.constant 0 : i32
    %c0_i32_0 = arith.constant 0 : i32
    %c0_i32_1 = arith.constant 0 : i32
    return %c0_i32, %c0_i32_0 : i32, i32
  }
  func.func @transform_4(%arg0: i32) -> (i32, i32) {
    %c0_i32 = arith.constant 0 : i32
    %c0_i32_0 = arith.constant 0 : i32
    %c0_i32_1 = arith.constant 0 : i32
    return %c0_i32, %c0_i32_0 : i32, i32
  }
  func.func @transform_5(%arg0: i32) -> (i32, i32) {
    %c0_i32 = arith.constant 0 : i32
    %c0_i32_0 = arith.constant 0 : i32
    %c0_i32_1 = arith.constant 0 : i32
    return %c0_i32, %c0_i32_0 : i32, i32
  }
  func.func @transform_6(%arg0: i32) -> (i32, i32) {
    %c0_i32 = arith.constant 0 : i32
    %c0_i32_0 = arith.constant 0 : i32
    %c0_i32_1 = arith.constant 0 : i32
    return %c0_i32, %c0_i32_0 : i32, i32
  }
  func.func @transform_7(%arg0: i32) -> (i32, i32) {
    %c0_i32 = arith.constant 0 : i32
    %c0_i32_0 = arith.constant 0 : i32
    return %arg0, %c0_i32 : i32, i32
  }
}

</mosaic_0001>

<bundles_post_ra>
// kernel: tpu_custom_call.1
= control target key start
LH: loop header
LB: loop body
LE: loop exit
PB: predicated region body
PF: predicated region fallthrough
CT: control target
= control target key end

     0   :  { %12 = vsyncpa [#allocation3], 0  ;;  %s7946_s0 = inlined_call_operand.vmem [shape: s32[256,8], index: 0, kind: input, shape index: {}]   ;;  %s7947_s1 = inlined_call_operand.vmem [shape: bf16[8,64,128], index: 1, kind: input, shape index: {}]   ;;  %s7948_s2 = inlined_call_operand.vmem [shape: f32[1,128], index: 2, kind: input, shape index: {}]   ;;  %s7949_s3 = inlined_call_operand.hbm [shape: bf16[128,128], index: 3, kind: input, shape index: {}]   ;;  %s7950_s4 = inlined_call_operand.vmem [shape: f32[1,128], index: 4, kind: input, shape index: {}]   ;;  %s7951_s5 = inlined_call_operand.hbm [shape: bf16[128,128], index: 5, kind: input, shape index: {}]   ;;  %s7952_s6 = inlined_call_operand.vmem [shape: f32[1,128], index: 6, kind: input, shape index: {}]   ;;  %s7953_s7 = inlined_call_operand.vmem [shape: f32[256,8], index: 7, kind: output, shape index: {}]  }
   0x1   :  { %s24_s26 = sshll.u32 %s7949_s3, 4  ;;  %s25_s26 = int_to_ptr.hbm [resolvable:$true] %s24_s26 }
   0x2   :  { %13 = vsyncpa [#allocation5], 0  ;;  %s5118_s27 = smov [#allocation2]   ;;  %s39_s8 = sshll.u32 %s7951_s5, 4  ;;  %s40_s8 = int_to_ptr.hbm [resolvable:$true] %s39_s8 }
   0x3   :  { %s26_s28 = sshll.u32 %s5118_s27, 4  ;;  %s5119_s9 = smov 64   ;;  %s27_s28 = int_to_ptr.vmem [resolvable:$true] %s26_s28 }
   0x4   :  { %s5120_s10 = smov 4   ;;  %s5121_s11 = smov [#allocation4]  }
   0x5   :  { %32 = dma.hbm_to_vmem [thread:$0]  %s25_s26, 1024, %s27_s28, [#allocation3], %s5119_s9, %s5119_s9, %s5120_s10  }
   0x6   :  { %s41_s12 = sshll.u32 %s5121_s11, 4  ;;  %s42_s12 = int_to_ptr.vmem [resolvable:$true] %s41_s12 }
   0x7   :  { %47 = dma.hbm_to_vmem [thread:$0]  %s40_s8, 1024, %s42_s12, [#allocation5], %s5119_s9, %s5119_s9, %s5120_s10  }
   0x8   :  { %5114 = dma.done.wait [#allocation3], 1024  }
   0x9   :  { %5115 = vsyncadd [#allocation3], 4294966272 }
   0xa   :  { %5116 = dma.done.wait [#allocation5], 1024  }
   0xb   :  { %5117 = vsyncadd [#allocation5], 4294966272  ;;  %v5122_v0 = vmov 0   ;;  %v5180_v1 = vld [vmem:[%s7946_s0 + $0x20] sm:$0xff]  ;;  %v5185_v2 = vld [vmem:[%s7946_s0 + $0x10] sm:$0xff]  ;;  %v5123_v34 = vmov 1   ;;  %v91_v41 = vlaneseq }
   0xc   :  { %4785 = vset.pattern.permute.xlu2 %v5122_v0  ;;  %4784 = vset.pattern.permute.xlu1 %v5122_v0  ;;  %v5190_v3 = vld [vmem:[%s7946_s0] sm:$0xff]  ;;  %v5198_v4 = vld [vmem:[%s7946_s0 + $0x28] sm:$0xff]  ;;  %v5203_v5 = vld [vmem:[%s7946_s0 + $0x18] sm:$0xff]  ;;  %v7960_v48 = vmov 0.0   ;;  %vm550_vm2 = vcmask 523264  }
   0xd   :  { %4783 = vset.pattern.permute.xlu0 %v5122_v0  ;;  %106 = vperm.xlu2 %4785, %v5180_v1   ;;  %v5208_v6 = vld [vmem:[%s7946_s0 + $0x8] sm:$0xff]  ;;  %v5216_v7 = vld [vmem:[%s7946_s0 + $0x40] sm:$0xff]  ;;  %v5221_v8 = vld [vmem:[%s7946_s0 + $0x38] sm:$0xff]  ;;  %v5400_v45 = vand.u32 127, %v91_v41 }
   0xe   :  { %100 = vperm.xlu1 %4784, %v5185_v2   ;;  %94 = vperm.xlu0 %4783, %v5190_v3   ;;  %v5226_v9 = vld [vmem:[%s7946_s0 + $0x30] sm:$0xff]  ;;  %v5234_v10 = vld [vmem:[%s7946_s0 + $0x58] sm:$0xff]  ;;  %v5244_v12 = vld [vmem:[%s7946_s0 + $0x48] sm:$0xff] }
   0xf   :  { %v5239_v11 = vld [vmem:[%s7946_s0 + $0x50] sm:$0xff]  ;;  %v5257_v14 = vld [vmem:[%s7946_s0 + $0x68] sm:$0xff]  ;;  %v5262_v15 = vld [vmem:[%s7946_s0 + $0x60] sm:$0xff] }
  0x10   :  { %v5252_v13 = vld [vmem:[%s7946_s0 + $0x70] sm:$0xff]  ;;  %v5270_v16 = vld [vmem:[%s7946_s0 + $0x88] sm:$0xff]  ;;  %v5275_v17 = vld [vmem:[%s7946_s0 + $0x80] sm:$0xff] }
  0x11   :  { %v5280_v18 = vld [vmem:[%s7946_s0 + $0x78] sm:$0xff]  ;;  %v5288_v19 = vld [vmem:[%s7946_s0 + $0xa0] sm:$0xff]  ;;  %v5298_v21 = vld [vmem:[%s7946_s0 + $0x90] sm:$0xff] }
  0x12   :  { %v5293_v20 = vld [vmem:[%s7946_s0 + $0x98] sm:$0xff]  ;;  %v5311_v23 = vld [vmem:[%s7946_s0 + $0xb0] sm:$0xff]  ;;  %v5316_v24 = vld [vmem:[%s7946_s0 + $0xa8] sm:$0xff] }
  0x13   :  { %v5306_v22 = vld [vmem:[%s7946_s0 + $0xb8] sm:$0xff]  ;;  %v5324_v25 = vld [vmem:[%s7946_s0 + $0xd0] sm:$0xff]  ;;  %v5329_v26 = vld [vmem:[%s7946_s0 + $0xc8] sm:$0xff] }
  0x14   :  { %v5334_v27 = vld [vmem:[%s7946_s0 + $0xc0] sm:$0xff]  ;;  %v5342_v28 = vld [vmem:[%s7946_s0 + $0xe8] sm:$0xff]  ;;  %v5352_v30 = vld [vmem:[%s7946_s0 + $0xd8] sm:$0xff] }
  0x15   :  { %109 = vperm.xlu2 %4785, %v5198_v4   ;;  %v5347_v29 = vld [vmem:[%s7946_s0 + $0xe0] sm:$0xff]  ;;  %v4717_v31 = vld [vmem:[%s7947_s1 + $0x18] sm:$0xff]  ;;  %v5368_v33 = vld [vmem:[%s7946_s0 + $0xf0] sm:$0xff] }
  0x16   :  { %103 = vperm.xlu1 %4784, %v5203_v5   ;;  %97 = vperm.xlu0 %4783, %v5208_v6   ;;  %v5363_v32 = vld [vmem:[%s7946_s0 + $0xf8] sm:$0xff]  ;;  %v4716_v35 = vld [vmem:[%s7947_s1 + $0x10] sm:$0xff]  ;;  %v4715_v36 = vld [vmem:[%s7947_s1 + $0x8] sm:$0xff] }
  0x17   :  { %764 = vmatpush.bf16.msra.mxu1 %v4717_v31  ;;  %4766 = vmatpush.bf16.msra.mxu3 %v4717_v31  ;;  %v4714_v38 = vld [vmem:[%s7947_s1] sm:$0xff] }
  0x1b   :  { %765 = vmatpush.bf16.msra.mxu1 %v4716_v35  ;;  %4767 = vmatpush.bf16.msra.mxu3 %v4716_v35 }
  0x1d   :  { %118 = vperm.xlu2 %4785, %v5216_v7  }
  0x1e   :  { %115 = vperm.xlu1 %4784, %v5221_v8   ;;  %112 = vperm.xlu0 %4783, %v5226_v9  }
  0x1f   :  { %766 = vmatpush.bf16.msra.mxu1 %v4715_v36  ;;  %4768 = vmatpush.bf16.msra.mxu3 %v4715_v36 }
  0x23   :  { %767 = vmatpush.bf16.msra.mxu1 %v4714_v38  ;;  %4769 = vmatpush.bf16.msra.mxu3 %v4714_v38 }
  0x25   :  { %127 = vperm.xlu2 %4785, %v5234_v10  }
  0x26   :  { %124 = vperm.xlu1 %4784, %v5239_v11   ;;  %121 = vperm.xlu0 %4783, %v5244_v12  }
  0x2d   :  { %136 = vperm.xlu2 %4785, %v5252_v13  }
  0x2e   :  { %133 = vperm.xlu1 %4784, %v5257_v14   ;;  %130 = vperm.xlu0 %4783, %v5262_v15  }
  0x35   :  { %145 = vperm.xlu2 %4785, %v5270_v16  }
  0x36   :  { %142 = vperm.xlu1 %4784, %v5275_v17   ;;  %139 = vperm.xlu0 %4783, %v5280_v18  }
  0x3d   :  { %154 = vperm.xlu2 %4785, %v5288_v19  }
  0x3e   :  { %151 = vperm.xlu1 %4784, %v5293_v20   ;;  %148 = vperm.xlu0 %4783, %v5298_v21  }
  0x45   :  { %163 = vperm.xlu2 %4785, %v5306_v22  }
  0x46   :  { %160 = vperm.xlu1 %4784, %v5311_v23   ;;  %157 = vperm.xlu0 %4783, %v5316_v24  }
  0x4d   :  { %172 = vperm.xlu2 %4785, %v5324_v25  }
  0x4e   :  { %169 = vperm.xlu1 %4784, %v5329_v26   ;;  %166 = vperm.xlu0 %4783, %v5334_v27  }
  0x55   :  { %181 = vperm.xlu2 %4785, %v5342_v28  }
  0x56   :  { %178 = vperm.xlu1 %4784, %v5347_v29   ;;  %175 = vperm.xlu0 %4783, %v5352_v30  }
  0x5d   :  { %4786 = vset.pattern.permute.xlu2 %v5123_v34 }
  0x5e   :  { %187 = vperm.xlu1 %4784, %v5363_v32   ;;  %184 = vperm.xlu0 %4783, %v5368_v33  }
  0x5f   :  { %310 = vperm.xlu2 %4786, %v5190_v3  }
  0x66   :  { %4788 = vset.pattern.permute.xlu1 %v5123_v34  ;;  %4787 = vset.pattern.permute.xlu0 %v5123_v34 }
  0x67   :  { %316 = vperm.xlu1 %4788, %v5185_v2   ;;  %319 = vperm.xlu2 %4786, %v5203_v5   ;;  %v5382_v37 = vpop.permute.xlu2 %106 }
  0x68   :  { %313 = vperm.xlu0 %4787, %v5208_v6   ;;  %vm193_vm5 = vcmp.eq.s32.totalorder %v5382_v37, %v5400_v45 }
  0x69   :  { %v4086_v35 = vsel %vm193_vm5, 1.0, %v7960_v48 }
  0x6f   :  { %322 = vperm.xlu1 %4788, %v5180_v1   ;;  %325 = vperm.xlu2 %4786, %v5198_v4   ;;  %v110_v39 = vpop.permute.xlu2 %109 }
  0x70   :  { %328 = vperm.xlu0 %4787, %v5226_v9   ;;  %vm194_vm6 = vcmp.eq.s32.totalorder %v110_v39, %v5400_v45 }
  0x71   :  { %v4087_v36 = vsel %vm194_vm6, 1.0, %v7960_v48 }
  0x77   :  { %331 = vperm.xlu1 %4788, %v5221_v8   ;;  %334 = vperm.xlu2 %4786, %v5216_v7   ;;  %v5393_v40 = vpop.permute.xlu2 %118 }
  0x78   :  { %337 = vperm.xlu0 %4787, %v5244_v12  }
  0x7f   :  { %340 = vperm.xlu1 %4788, %v5239_v11   ;;  %343 = vperm.xlu2 %4786, %v5234_v10   ;;  %v5398_v42 = vpop.permute.xlu2 %127 }
  0x80   :  { %346 = vperm.xlu0 %4787, %v5262_v15   ;;  %v101_v43 = vpop.permute.xlu1 %100  ;;  %v95_v44 = vpop.permute.xlu0 %94  ;;  %vm200_vm6 = vcmp.eq.s32.totalorder %v5398_v42, %v5400_v45 }
  0x81   :  { %vm189_vm0 = vcmp.eq.s32.totalorder %v95_v44, %v5400_v45  ;;  %vm191_vm4 = vcmp.eq.s32.totalorder %v101_v43, %v5400_v45  ;;  %v287_v43 = vpack.c.bf16 %v4087_v36, %v4086_v35  ;;  %v4721_v44 = vld [vmem:[%s7947_s1 + $0x38] sm:$0xff]  ;;  %v4718_v36 = vld [vmem:[%s7947_s1 + $0x20] sm:$0xff]  ;;  %v4093_v42 = vsel %vm200_vm6, 1.0, %v7960_v48 }
  0x82   :  { %v4082_v49 = vsel %vm189_vm0, 1.0, %v7960_v48  ;;  %v4084_v60 = vsel %vm191_vm4, 1.0, %v7960_v48  ;;  %603 = vmatpush.bf16.msra.mxu0 %v4721_v44  ;;  %4762 = vmatpush.bf16.msra.mxu2 %v4721_v44  ;;  %vm197_vm0 = vcmp.eq.s32.totalorder %v5393_v40, %v5400_v45 }
  0x83   :  { %v4090_v40 = vsel %vm197_vm0, 1.0, %v7960_v48 }
  0x87   :  { %349 = vperm.xlu1 %4788, %v5257_v14   ;;  %352 = vperm.xlu2 %4786, %v5252_v13   ;;  %v5406_v46 = vpop.permute.xlu2 %136 }
  0x88   :  { %355 = vperm.xlu0 %4787, %v5280_v18   ;;  %v104_v47 = vpop.permute.xlu1 %103  ;;  %v98_v50 = vpop.permute.xlu0 %97 }
  0x89   :  { %vm190_vm1 = vcmp.eq.s32.totalorder %v98_v50, %v5400_v45  ;;  %vm192_vm3 = vcmp.eq.s32.totalorder %v104_v47, %v5400_v45 }
  0x8a   :  { %v4083_v51 = vsel %vm190_vm1, 1.0, %v7960_v48  ;;  %v4085_v58 = vsel %vm192_vm3, 1.0, %v7960_v48 }
  0x8b   :  { %v285_v52 = vpack.c.bf16 %v4083_v51, %v4082_v49  ;;  %v286_v61 = vpack.c.bf16 %v4085_v58, %v4084_v60  ;;  %v4720_v51 = vld [vmem:[%s7947_s1 + $0x30] sm:$0xff]  ;;  %v5125_v60 = vmov 2  }
  0x8c   :  { %604 = vmatpush.bf16.msra.mxu0 %v4720_v51  ;;  %4763 = vmatpush.bf16.msra.mxu2 %v4720_v51 }
  0x8d   :  { %4202 = vmatmul.msk.bf16.vlgmr.msra.gmra.mxu1 %vm550_vm2, %v285_v52  ;;  %v4719_v52 = vld [vmem:[%s7947_s1 + $0x28] sm:$0xff] }
  0x8f   :  { %358 = vperm.xlu1 %4788, %v5275_v17   ;;  %361 = vperm.xlu2 %4786, %v5270_v16   ;;  %v146_v53 = vpop.permute.xlu2 %145 }
  0x90   :  { %364 = vperm.xlu0 %4787, %v5298_v21   ;;  %v5415_v54 = vpop.permute.xlu1 %115  ;;  %v5417_v55 = vpop.permute.xlu0 %112  ;;  %vm206_vm7 = vcmp.eq.s32.totalorder %v146_v53, %v5400_v45  ;;  %605 = vmatpush.bf16.msra.mxu0 %v4719_v52 }
  0x91   :  { %v4099_v38 = vsel %vm206_vm7, 1.0, %v7960_v48  ;;  %vm196_vm11 = vcmp.eq.s32.totalorder %v5415_v54, %v5400_v45  ;;  %vm195_vm12 = vcmp.eq.s32.totalorder %v5417_v55, %v5400_v45  ;;  %4764 = vmatpush.bf16.msra.mxu2 %v4719_v52 }
  0x92   :  { %v4088_v54 = vsel %vm195_vm12, 1.0, %v7960_v48 }
  0x94   :  { %606 = vmatpush.bf16.msra.mxu0 %v4718_v36 }
  0x95   :  { %4765 = vmatpush.bf16.msra.mxu2 %v4718_v36 }
  0x97   :  { %367 = vperm.xlu1 %4788, %v5293_v20   ;;  %370 = vperm.xlu2 %4786, %v5288_v19   ;;  %v5424_v56 = vpop.permute.xlu2 %154 }
  0x98   :  { %373 = vperm.xlu0 %4787, %v5316_v24   ;;  %v5426_v57 = vpop.permute.xlu1 %124  ;;  %v5429_v59 = vpop.permute.xlu0 %121  ;;  %vm209_vm15 = vcmp.eq.s32.totalorder %v5424_v56, %v5400_v45 }
  0x99   :  { %vm198_vm14 = vcmp.eq.s32.totalorder %v5429_v59, %v5400_v45  ;;  %v4102_v59 = vsel %vm209_vm15, 1.0, %v7960_v48  ;;  %vm199_vm3 = vcmp.eq.s32.totalorder %v5426_v57, %v5400_v45 }
  0x9a   :  { %v4091_v51 = vsel %vm198_vm14, 1.0, %v7960_v48  ;;  %v4092_v36 = vsel %vm199_vm3, 1.0, %v7960_v48  ;;  %vm203_vm3 = vcmp.eq.s32.totalorder %v5406_v46, %v5400_v45 }
  0x9d   :  { %4203 = vmatmul.msk.bf16.gmra.mxu1 %vm550_vm2, %v286_v61 }
  0x9f   :  { %376 = vperm.xlu1 %4788, %v5311_v23   ;;  %379 = vperm.xlu2 %4786, %v5306_v22   ;;  %v5436_v62 = vpop.permute.xlu2 %163 }
  0xa0   :  { %382 = vperm.xlu0 %4787, %v5334_v27   ;;  %v5438_v63 = vpop.permute.xlu1 %133  ;;  %v5440_v0 = vpop.permute.xlu0 %130  ;;  %vm212_vm4 = vcmp.eq.s32.totalorder %v5436_v62, %v5400_v45 }
  0xa1   :  { %v4105_v57 = vsel %vm212_vm4, 1.0, %v7960_v48 }
  0xa7   :  { %385 = vperm.xlu1 %4788, %v5329_v26   ;;  %388 = vperm.xlu2 %4786, %v5324_v25   ;;  %v5449_v31 = vpop.permute.xlu2 %172 }
  0xa8   :  { %391 = vperm.xlu0 %4787, %v5352_v30   ;;  %v143_v34 = vpop.permute.xlu1 %142  ;;  %v5454_v37 = vpop.permute.xlu0 %139  ;;  %vm215_vm0 = vcmp.eq.s32.totalorder %v5449_v31, %v5400_v45 }
  0xa9   :  { %vm205_vm8 = vcmp.eq.s32.totalorder %v143_v34, %v5400_v45  ;;  %v4089_v34 = vsel %vm196_vm11, 1.0, %v7960_v48  ;;  %vm201_vm11 = vcmp.eq.s32.totalorder %v5440_v0, %v5400_v45  ;;  %vm204_vm15 = vcmp.eq.s32.totalorder %v5454_v37, %v5400_v45 }
  0xaa   :  { %v4098_v39 = vsel %vm205_vm8, 1.0, %v7960_v48  ;;  %v4097_v37 = vsel %vm204_vm15, 1.0, %v7960_v48 }
  0xab   :  { %v293_v41 = vpack.c.bf16 %v4099_v38, %v4098_v39  ;;  %v288_v39 = vpack.c.bf16 %v4089_v34, %v4088_v54 }
  0xad   :  { %4210 = vmatmul.msk.bf16.vlgmr.msra.gmra.mxu3 %vm550_vm2, %v293_v41  ;;  %4204 = vmatmul.msk.bf16.gmra.mxu1 %vm550_vm2, %v287_v43 }
  0xaf   :  { %394 = vperm.xlu1 %4788, %v5347_v29   ;;  %397 = vperm.xlu2 %4786, %v5342_v28   ;;  %v5466_v47 = vpop.permute.xlu2 %181 }
  0xb0   :  { %400 = vperm.xlu0 %4787, %v5368_v33   ;;  %v152_v49 = vpop.permute.xlu1 %151  ;;  %v149_v50 = vpop.permute.xlu0 %148 }
  0xb1   :  { %vm208_vm9 = vcmp.eq.s32.totalorder %v152_v49, %v5400_v45  ;;  %vm207_vm10 = vcmp.eq.s32.totalorder %v149_v50, %v5400_v45 }
  0xb2   :  { %v4101_v53 = vsel %vm208_vm9, 1.0, %v7960_v48  ;;  %v4100_v58 = vsel %vm207_vm10, 1.0, %v7960_v48  ;;  %vm202_vm10 = vcmp.eq.s32.totalorder %v5438_v63, %v5400_v45 }
  0xb3   :  { %v294_v38 = vpack.c.bf16 %v4101_v53, %v4100_v58  ;;  %v289_v58 = vpack.c.bf16 %v4091_v51, %v4090_v40 }
  0xb7   :  { %403 = vperm.xlu1 %4788, %v5363_v32   ;;  %4789 = vset.pattern.permute.xlu2 %v5125_v60 }
  0xb8   :  { %4790 = vset.pattern.permute.xlu0 %v5125_v60  ;;  %v161_v61 = vpop.permute.xlu1 %160  ;;  %850 = vperm.xlu2 %4789, %v5190_v3   ;;  %v158_v55 = vpop.permute.xlu0 %157 }
  0xb9   :  { %853 = vperm.xlu0 %4790, %v5208_v6   ;;  %v311_v35 = vpop.permute.xlu2 %310  ;;  %vm210_vm13 = vcmp.eq.s32.totalorder %v158_v55, %v5400_v45  ;;  %vm211_vm1 = vcmp.eq.s32.totalorder %v161_v61, %v5400_v45 }
  0xba   :  { %v4103_v49 = vsel %vm210_vm13, 1.0, %v7960_v48  ;;  %vm405_vm5 = vcmp.eq.s32.totalorder %v311_v35, %v5400_v45  ;;  %v4104_v55 = vsel %vm211_vm1, 1.0, %v7960_v48 }
  0xbb   :  { %v295_v53 = vpack.c.bf16 %v4103_v49, %v4102_v59  ;;  %v4114_v62 = vsel %vm405_vm5, 1.0, %v7960_v48  ;;  %v290_v49 = vpack.c.bf16 %v4093_v42, %v4092_v36 }
  0xbd   :  { %4211 = vmatmul.msk.bf16.gmra.mxu3 %vm550_vm2, %v294_v38  ;;  %4205 = vmatmul.msk.bf16.gmra.mxu1 %vm550_vm2, %v288_v39  ;;  %v296_v39 = vpack.c.bf16 %v4105_v57, %v4104_v55 }
  0xbf   :  { %4791 = vset.pattern.permute.xlu1 %v5125_v60 }
  0xc0   :  { %856 = vperm.xlu1 %4791, %v5185_v2   ;;  %v5493_v41 = vpop.permute.xlu1 %169  ;;  %859 = vperm.xlu2 %4789, %v5203_v5   ;;  %v5497_v43 = vpop.permute.xlu0 %166 }
  0xc1   :  { %868 = vperm.xlu0 %4790, %v5226_v9   ;;  %v5499_v44 = vpop.permute.xlu2 %319  ;;  %vm214_vm8 = vcmp.eq.s32.totalorder %v5493_v41, %v5400_v45  ;;  %vm213_vm9 = vcmp.eq.s32.totalorder %v5497_v43, %v5400_v45  ;;  %v4095_v41 = vsel %vm202_vm10, 1.0, %v7960_v48  ;;  %v4094_v43 = vsel %vm201_vm11, 1.0, %v7960_v48 }
  0xc2   :  { %vm408_vm12 = vcmp.eq.s32.totalorder %v5499_v44, %v5400_v45  ;;  %v4107_v55 = vsel %vm214_vm8, 1.0, %v7960_v48  ;;  %v4106_v36 = vsel %vm213_vm9, 1.0, %v7960_v48  ;;  %vm218_vm8 = vcmp.eq.s32.totalorder %v5466_v47, %v5400_v45 }
  0xc3   :  { %v4117_v0 = vsel %vm408_vm12, 1.0, %v7960_v48 }
  0xc8   :  { %862 = vperm.xlu1 %4791, %v5180_v1   ;;  %v5510_v50 = vpop.permute.xlu1 %178  ;;  %865 = vperm.xlu2 %4789, %v5198_v4   ;;  %v5515_v52 = vpop.permute.xlu0 %175 }
  0xc9   :  { %877 = vperm.xlu0 %4790, %v5244_v12   ;;  %v5518_v56 = vpop.permute.xlu2 %325  ;;  %vm216_vm14 = vcmp.eq.s32.totalorder %v5515_v52, %v5400_v45 }
  0xca   :  { %v4109_v52 = vsel %vm216_vm14, 1.0, %v7960_v48  ;;  %vm410_vm4 = vcmp.eq.s32.totalorder %v5518_v56, %v5400_v45 }
  0xcb   :  { %v4119_v56 = vsel %vm410_vm4, 1.0, %v7960_v48 }
  0xcd   :  { %4212 = vmatmul.msk.bf16.gmra.mxu3 %vm550_vm2, %v295_v53  ;;  %4206 = vmatmul.msk.bf16.gmra.mxu1 %vm550_vm2, %v289_v58 }
  0xd0   :  { %871 = vperm.xlu1 %4791, %v5221_v8   ;;  %v5524_v60 = vpop.permute.xlu1 %187  ;;  %874 = vperm.xlu2 %4789, %v5216_v7   ;;  %v5528_v34 = vpop.permute.xlu0 %184 }
  0xd1   :  { %886 = vperm.xlu0 %4790, %v5262_v15   ;;  %v5530_v54 = vpop.permute.xlu2 %334  ;;  %vm219_vm14 = vcmp.eq.s32.totalorder %v5528_v34, %v5400_v45 }
  0xd8   :  { %880 = vperm.xlu1 %4791, %v5239_v11   ;;  %883 = vperm.xlu2 %4789, %v5234_v10  }
  0xd9   :  { %895 = vperm.xlu0 %4790, %v5280_v18   ;;  %v317_v61 = vpop.permute.xlu1 %316  ;;  %v5547_v38 = vpop.permute.xlu2 %343 }
  0xda   :  { %v314_v35 = vpop.permute.xlu0 %313  ;;  %vm407_vm13 = vcmp.eq.s32.totalorder %v317_v61, %v5400_v45 }
  0xdb   :  { %vm406_vm7 = vcmp.eq.s32.totalorder %v314_v35, %v5400_v45  ;;  %v4116_v44 = vsel %vm407_vm13, 1.0, %v7960_v48  ;;  %v291_v35 = vpack.c.bf16 %v4095_v41, %v4094_v43  ;;  %v4096_v43 = vsel %vm203_vm3, 1.0, %v7960_v48 }
  0xdc   :  { %v4115_v51 = vsel %vm406_vm7, 1.0, %v7960_v48  ;;  %v502_v42 = vpack.c.bf16 %v4117_v0, %v4116_v44  ;;  %v292_v44 = vpack.c.bf16 %v4097_v37, %v4096_v43  ;;  %vm217_vm7 = vcmp.eq.s32.totalorder %v5510_v50, %v5400_v45 }
  0xdd   :  { %v501_v59 = vpack.c.bf16 %v4115_v51, %v4114_v62  ;;  %4213 = vmatmul.msk.bf16.gmra.mxu3 %vm550_vm2, %v296_v39  ;;  %4207 = vmatmul.msk.bf16.gmra.mxu1 %vm550_vm2, %v290_v49  ;;  %v297_v62 = vpack.c.bf16 %v4107_v55, %v4106_v36  ;;  %v4729_v55 = vld [vmem:[%s7947_s1 + $0x78] sm:$0xff]  ;;  %vm220_vm13 = vcmp.eq.s32.totalorder %v5524_v60, %v5400_v45  ;;  %v4112_v60 = vsel %vm219_vm14, 1.0, %v7960_v48 }
  0xde   :  { %1552 = vmatpush.bf16.msrb.mxu3 %v4729_v55 }
  0xdf   :  { %4170 = vmatmul.msk.bf16.vlgmr.msra.gmra.mxu0 %vm550_vm2, %v501_v59  ;;  %v4725_v59 = vld [vmem:[%s7947_s1 + $0x58] sm:$0xff] }
  0xe0   :  { %889 = vperm.xlu1 %4791, %v5257_v14   ;;  %892 = vperm.xlu2 %4789, %v5252_v13  }
  0xe1   :  { %904 = vperm.xlu0 %4790, %v5298_v21   ;;  %v323_v40 = vpop.permute.xlu1 %322  ;;  %v5558_v53 = vpop.permute.xlu2 %352  ;;  %1142 = vmatpush.bf16.msrb.mxu2 %v4725_v59 }
  0xe2   :  { %v5560_v58 = vpop.permute.xlu0 %328  ;;  %vm409_vm1 = vcmp.eq.s32.totalorder %v323_v40, %v5400_v45  ;;  %v4108_v40 = vsel %vm215_vm0, 1.0, %v7960_v48  ;;  %vm413_vm0 = vcmp.eq.s32.totalorder %v5530_v54, %v5400_v45 }
  0xe3   :  { %v4118_v46 = vsel %vm409_vm1, 1.0, %v7960_v48  ;;  %v298_v0 = vpack.c.bf16 %v4109_v52, %v4108_v40  ;;  %vm411_vm9 = vcmp.eq.s32.totalorder %v5560_v58, %v5400_v45  ;;  %v5126_v40 = vmov 3  }
  0xe4   :  { %v4120_v43 = vsel %vm411_vm9, 1.0, %v7960_v48 }
  0xe8   :  { %898 = vperm.xlu1 %4791, %v5275_v17   ;;  %901 = vperm.xlu2 %4789, %v5270_v16  }
  0xe9   :  { %913 = vperm.xlu0 %4790, %v5316_v24   ;;  %v5580_v63 = vpop.permute.xlu1 %331  ;;  %v362_v61 = vpop.permute.xlu2 %361 }
  0xea   :  { %v5584_v57 = vpop.permute.xlu0 %337  ;;  %vm422_vm5 = vcmp.eq.s32.totalorder %v362_v61, %v5400_v45  ;;  %vm412_vm10 = vcmp.eq.s32.totalorder %v5580_v63, %v5400_v45  ;;  %v4110_v61 = vsel %vm217_vm7, 1.0, %v7960_v48 }
  0xeb   :  { %v4131_v55 = vsel %vm422_vm5, 1.0, %v7960_v48  ;;  %v4121_v47 = vsel %vm412_vm10, 1.0, %v7960_v48  ;;  %vm414_vm15 = vcmp.eq.s32.totalorder %v5584_v57, %v5400_v45  ;;  %vm416_vm5 = vcmp.eq.s32.totalorder %v5547_v38, %v5400_v45 }
  0xed   :  { %4214 = vmatmul.msk.bf16.gmra.mxu3 %vm550_vm2, %v297_v62  ;;  %4208 = vmatmul.msk.bf16.gmra.mxu1 %vm550_vm2, %v291_v35  ;;  %v503_v62 = vpack.c.bf16 %v4119_v56, %v4118_v46  ;;  %v4111_v46 = vsel %vm218_vm8, 1.0, %v7960_v48 }
  0xee   :  { %v299_v63 = vpack.c.bf16 %v4111_v46, %v4110_v61  ;;  %v4728_v61 = vld [vmem:[%s7947_s1 + $0x70] sm:$0xff]  ;;  %v4123_v46 = vsel %vm414_vm15, 1.0, %v7960_v48 }
  0xef   :  { %4171 = vmatmul.msk.bf16.gmra.mxu0 %vm550_vm2, %v502_v42  ;;  %1553 = vmatpush.bf16.msrb.mxu3 %v4728_v61 }
  0xf0   :  { %907 = vperm.xlu1 %4791, %v5293_v20   ;;  %910 = vperm.xlu2 %4789, %v5288_v19  }
  0xf1   :  { %922 = vperm.xlu0 %4790, %v5334_v27   ;;  %v5592_v39 = vpop.permute.xlu1 %340  ;;  %v5594_v49 = vpop.permute.xlu2 %370 }
  0xf2   :  { %v5596_v51 = vpop.permute.xlu0 %346  ;;  %vm425_vm3 = vcmp.eq.s32.totalorder %v5594_v49, %v5400_v45  ;;  %vm415_vm4 = vcmp.eq.s32.totalorder %v5592_v39, %v5400_v45 }
  0xf3   :  { %vm417_vm9 = vcmp.eq.s32.totalorder %v5596_v51, %v5400_v45 }
  0xf8   :  { %916 = vperm.xlu1 %4791, %v5311_v23   ;;  %919 = vperm.xlu2 %4789, %v5306_v22  }
  0xf9   :  { %931 = vperm.xlu0 %4790, %v5352_v30   ;;  %v5620_v31 = vpop.permute.xlu1 %349  ;;  %v5624_v36 = vpop.permute.xlu2 %379 }
  0xfa   :  { %v5626_v41 = vpop.permute.xlu0 %355  ;;  %vm428_vm7 = vcmp.eq.s32.totalorder %v5624_v36, %v5400_v45  ;;  %v4723_v36 = vld [vmem:[%s7947_s1 + $0x48] sm:$0xff]  ;;  %vm418_vm8 = vcmp.eq.s32.totalorder %v5620_v31, %v5400_v45 }
  0xfb   :  { %v4137_v38 = vsel %vm428_vm7, 1.0, %v7960_v48 }
  0xfd   :  { %4215 = vmatmul.msk.bf16.gmra.mxu3 %vm550_vm2, %v298_v0  ;;  %4209 = vmatmul.msk.bf16.gmra.mxu1 %vm550_vm2, %v292_v44  ;;  %v504_v44 = vpack.c.bf16 %v4121_v47, %v4120_v43 }
  0xff   :  { %4172 = vmatmul.msk.bf16.gmra.mxu0 %vm550_vm2, %v503_v62 }
 0x100   :  { %925 = vperm.xlu1 %4791, %v5329_v26   ;;  %928 = vperm.xlu2 %4789, %v5324_v25  }
 0x101   :  { %940 = vperm.xlu0 %4790, %v5368_v33   ;;  %v359_v35 = vpop.permute.xlu1 %358  ;;  %v5638_v42 = vpop.permute.xlu2 %388 }
 0x102   :  { %vm421_vm6 = vcmp.eq.s32.totalorder %v359_v35, %v5400_v45  ;;  %v365_v59 = vpop.permute.xlu0 %364  ;;  %vm431_vm15 = vcmp.eq.s32.totalorder %v5638_v42, %v5400_v45  ;;  %v4722_v42 = vld [vmem:[%s7947_s1 + $0x40] sm:$0xff] }
 0x103   :  { %v4130_v52 = vsel %vm421_vm6, 1.0, %v7960_v48  ;;  %vm423_vm12 = vcmp.eq.s32.totalorder %v365_v59, %v5400_v45  ;;  %v4724_v59 = vld [vmem:[%s7947_s1 + $0x50] sm:$0xff] }
 0x104   :  { %v509_v37 = vpack.c.bf16 %v4131_v55, %v4130_v52  ;;  %v4132_v55 = vsel %vm423_vm12, 1.0, %v7960_v48  ;;  %1143 = vmatpush.bf16.msrb.mxu2 %v4724_v59  ;;  %v4125_v59 = vsel %vm416_vm5, 1.0, %v7960_v48  ;;  %vm420_vm12 = vcmp.eq.s32.totalorder %v5626_v41, %v5400_v45 }
 0x106   :  { %4178 = vmatmul.msk.bf16.vlgmr.msra.gmra.mxu2 %vm550_vm2, %v509_v37 }
 0x108   :  { %934 = vperm.xlu1 %4791, %v5347_v29   ;;  %937 = vperm.xlu2 %4789, %v5342_v28  }
 0x109   :  { %4793 = vset.pattern.permute.xlu0 %v5126_v40  ;;  %v368_v50 = vpop.permute.xlu1 %367  ;;  %v5657_v0 = vpop.permute.xlu2 %397  ;;  %1144 = vmatpush.bf16.msrb.mxu2 %v4723_v36 }
 0x10a   :  { %1263 = vperm.xlu0 %4793, %v5208_v6   ;;  %v374_v58 = vpop.permute.xlu0 %373  ;;  %vm424_vm11 = vcmp.eq.s32.totalorder %v368_v50, %v5400_v45  ;;  %v4113_v50 = vsel %vm220_vm13, 1.0, %v7960_v48  ;;  %vm419_vm13 = vcmp.eq.s32.totalorder %v5558_v53, %v5400_v45 }
 0x10b   :  { %v4133_v56 = vsel %vm424_vm11, 1.0, %v7960_v48  ;;  %v300_v43 = vpack.c.bf16 %v4113_v50, %v4112_v60  ;;  %vm426_vm1 = vcmp.eq.s32.totalorder %v374_v58, %v5400_v45 }
 0x10c   :  { %v510_v37 = vpack.c.bf16 %v4133_v56, %v4132_v55  ;;  %v4135_v54 = vsel %vm426_vm1, 1.0, %v7960_v48  ;;  %v4134_v55 = vsel %vm425_vm3, 1.0, %v7960_v48  ;;  %vm434_vm1 = vcmp.eq.s32.totalorder %v5657_v0, %v5400_v45 }
 0x10d   :  { %4216 = vmatmul.msk.bf16.gmra.mxu3 %vm550_vm2, %v299_v63  ;;  %1145 = vmatpush.bf16.msrb.mxu2 %v4722_v42 }
 0x10f   :  { %4173 = vmatmul.msk.bf16.gmra.mxu0 %vm550_vm2, %v504_v44 }
 0x110   :  { %943 = vperm.xlu1 %4791, %v5363_v32   ;;  %4792 = vset.pattern.permute.xlu2 %v5126_v40 }
 0x111   :  { %v377_v62 = vpop.permute.xlu1 %376  ;;  %1260 = vperm.xlu2 %4792, %v5190_v3  }
 0x112   :  { %1278 = vperm.xlu0 %4793, %v5226_v9   ;;  %v5668_v35 = vpop.permute.xlu0 %382  ;;  %v5671_v52 = vpop.permute.xlu2 %850  ;;  %vm427_vm6 = vcmp.eq.s32.totalorder %v377_v62, %v5400_v45 }
 0x113   :  { %vm429_vm11 = vcmp.eq.s32.totalorder %v5668_v35, %v5400_v45  ;;  %v4128_v35 = vsel %vm419_vm13, 1.0, %v7960_v48  ;;  %vm945_vm7 = vcmp.eq.s32.totalorder %v5671_v52, %v5400_v45 }
 0x116   :  { %4179 = vmatmul.msk.bf16.gmra.mxu2 %vm550_vm2, %v510_v37  ;;  %v511_v37 = vpack.c.bf16 %v4135_v54, %v4134_v55 }
 0x118   :  { %4794 = vset.pattern.permute.xlu1 %v5126_v40  ;;  %v4122_v40 = vsel %vm413_vm0, 1.0, %v7960_v48 }
 0x119   :  { %1266 = vperm.xlu1 %4794, %v5185_v2   ;;  %v5691_v34 = vpop.permute.xlu1 %385  ;;  %1269 = vperm.xlu2 %4792, %v5203_v5   ;;  %v505_v63 = vpack.c.bf16 %v4123_v46, %v4122_v40 }
 0x11a   :  { %1287 = vperm.xlu0 %4793, %v5244_v12   ;;  %v5696_v57 = vpop.permute.xlu0 %391  ;;  %v5698_v47 = vpop.permute.xlu2 %859  ;;  %vm430_vm10 = vcmp.eq.s32.totalorder %v5691_v34, %v5400_v45 }
 0x11b   :  { %vm432_vm14 = vcmp.eq.s32.totalorder %v5696_v57, %v5400_v45 }
 0x11d   :  { %4217 = vmatmul.msk.bf16.gmra.mxu3 %vm550_vm2, %v300_v43  ;;  %v4126_v43 = vsel %vm417_vm9, 1.0, %v7960_v48 }
 0x11f   :  { %4174 = vmatmul.msk.bf16.gmra.mxu0 %vm550_vm2, %v505_v63 }
 0x121   :  { %1272 = vperm.xlu1 %4794, %v5180_v1   ;;  %v5708_v44 = vpop.permute.xlu1 %394  ;;  %1275 = vperm.xlu2 %4792, %v5198_v4   ;;  %v4124_v4 = vsel %vm415_vm4, 1.0, %v7960_v48 }
 0x122   :  { %1296 = vperm.xlu0 %4793, %v5262_v15   ;;  %v5712_v56 = vpop.permute.xlu0 %400  ;;  %v5715_v58 = vpop.permute.xlu2 %865  ;;  %v506_v39 = vpack.c.bf16 %v4125_v59, %v4124_v4  ;;  %vm433_vm0 = vcmp.eq.s32.totalorder %v5708_v44, %v5400_v45  ;;  %v4143_v59 = vsel %vm434_vm1, 1.0, %v7960_v48 }
 0x123   :  { %vm435_vm4 = vcmp.eq.s32.totalorder %v5712_v56, %v5400_v45  ;;  %v4741_v56 = vld [vmem:[%s7947_s1 + $0xd8] sm:$0xff] }
 0x124   :  { %2782 = vmatpush.bf16.msra.mxu2 %v4741_v56 }
 0x126   :  { %4180 = vmatmul.msk.bf16.gmra.mxu2 %vm550_vm2, %v511_v37 }
 0x129   :  { %1281 = vperm.xlu1 %4794, %v5221_v8   ;;  %v5723_v1 = vpop.permute.xlu1 %403  ;;  %1284 = vperm.xlu2 %4792, %v5216_v7   ;;  %v4136_v8 = vsel %vm427_vm6, 1.0, %v7960_v48 }
 0x12a   :  { %1305 = vperm.xlu0 %4793, %v5280_v18   ;;  %v5728_v49 = vpop.permute.xlu2 %874  ;;  %v512_v62 = vpack.c.bf16 %v4137_v38, %v4136_v8  ;;  %vm436_vm3 = vcmp.eq.s32.totalorder %v5723_v1, %v5400_v45 }
 0x12b   :  { %v5731_v61 = vpop.permute.xlu0 %853 }
 0x12f   :  { %4175 = vmatmul.msk.bf16.gmra.mxu0 %vm550_vm2, %v506_v39 }
 0x130   :  { %v5850_v44 = vpop.f32.mrf.mxu3 }
 0x131   :  { %1290 = vperm.xlu1 %4794, %v5239_v11   ;;  %1293 = vperm.xlu2 %4792, %v5234_v10   ;;  %v4727_v10 = vld [vmem:[%s7947_s1 + $0x68] sm:$0xff]  ;;  %v4127_v11 = vsel %vm418_vm8, 1.0, %v7960_v48  ;;  %7969 = vst [vmem:[#allocation11_spill] sm:$0xff] %v5850_v44  ;;  %vm946_vm8 = vcmp.eq.s32.totalorder %v5731_v61, %v5400_v45  ;;  %v5927_v61 = vld [vmem:[%s7946_s0 + $0x40] sm:$0xff]  ;;  %v7962_v44 = vmov 7  }
 0x132   :  { %1314 = vperm.xlu0 %4793, %v5298_v21   ;;  %v5741_v7 = vpop.permute.xlu1 %856  ;;  %v5744_v50 = vpop.permute.xlu2 %883  ;;  %1554 = vmatpush.bf16.msrb.mxu3 %v4727_v10  ;;  %v507_v40 = vpack.c.bf16 %v4127_v11, %v4126_v43  ;;  %v5898_v10 = vld [vmem:[%s7946_s0 + $0x28] sm:$0xff] }
 0x133   :  { %v5746_v60 = vpop.permute.xlu0 %868 }
 0x136   :  { %4181 = vmatmul.msk.bf16.gmra.mxu2 %vm550_vm2, %v512_v62 }
 0x138   :  { %v5863_v0 = vpop.f32.mrf.mxu3 }
 0x139   :  { %1299 = vperm.xlu1 %4794, %v5257_v14   ;;  %1302 = vperm.xlu2 %4792, %v5252_v13   ;;  %v4139_v13 = vsel %vm430_vm10, 1.0, %v7960_v48  ;;  %7971 = vst [vmem:[#allocation13_spill] sm:$0xff] %v5863_v0 }
 0x13a   :  { %1323 = vperm.xlu0 %4793, %v5316_v24   ;;  %v5763_v21 = vpop.permute.xlu1 %862  ;;  %v5765_v46 = vpop.permute.xlu2 %892  ;;  %v4138_v24 = vsel %vm429_vm11, 1.0, %v7960_v48  ;;  %vm948_vm11 = vcmp.eq.s32.totalorder %v5698_v47, %v5400_v45  ;;  %v5993_v47 = vld [vmem:[%s7946_s0 + $0x70] sm:$0xff] }
 0x13b   :  { %v5768_v31 = vpop.permute.xlu0 %877  ;;  %v513_v34 = vpack.c.bf16 %v4139_v13, %v4138_v24 }
 0x13f   :  { %4176 = vmatmul.msk.bf16.gmra.mxu0 %vm550_vm2, %v507_v40 }
 0x140   :  { %v5884_v36 = vpop.f32.mrf.mxu3 }
 0x141   :  { %1308 = vperm.xlu1 %4794, %v5275_v17   ;;  %1311 = vperm.xlu2 %4792, %v5270_v16   ;;  %v4129_v16 = vsel %vm420_vm12, 1.0, %v7960_v48  ;;  %7974 = vst [vmem:[#allocation16_spill] sm:$0xff] %v5884_v36  ;;  %vm947_vm12 = vcmp.eq.s32.totalorder %v5741_v7, %v5400_v45 }
 0x142   :  { %1332 = vperm.xlu0 %4793, %v5334_v27   ;;  %v5779_v14 = vpop.permute.xlu1 %871  ;;  %v5782_v51 = vpop.permute.xlu2 %901  ;;  %v508_v41 = vpack.c.bf16 %v4129_v16, %v4128_v35  ;;  %v5917_v16 = vld [vmem:[%s7946_s0 + $0x38] sm:$0xff] }
 0x143   :  { %v5784_v63 = vpop.permute.xlu0 %886 }
 0x146   :  { %4182 = vmatmul.msk.bf16.gmra.mxu2 %vm550_vm2, %v513_v34  ;;  %v4218_v34 = vsel %vm945_vm7, 1.0, %v7960_v48 }
 0x148   :  { %v5922_v35 = vpop.f32.mrf.mxu3 }
 0x149   :  { %1317 = vperm.xlu1 %4794, %v5293_v20   ;;  %1320 = vperm.xlu2 %4792, %v5288_v19   ;;  %v4141_v19 = vsel %vm432_vm14, 1.0, %v7960_v48  ;;  %7977 = vst [vmem:[#allocation19_spill] sm:$0xff] %v5922_v35  ;;  %v6044_v35 = vld [vmem:[%s7946_s0 + $0x98] sm:$0xff] }
 0x14a   :  { %1341 = vperm.xlu0 %4793, %v5352_v30   ;;  %v5795_v17 = vpop.permute.xlu1 %880  ;;  %v5797_v27 = vpop.permute.xlu2 %910  ;;  %v4140_v30 = vsel %vm431_vm15, 1.0, %v7960_v48  ;;  %vm949_vm15 = vcmp.eq.s32.totalorder %v5763_v21, %v5400_v45 }
 0x14b   :  { %v5800_v54 = vpop.permute.xlu0 %895  ;;  %v514_v57 = vpack.c.bf16 %v4141_v19, %v4140_v30 }
 0x14f   :  { %4177 = vmatmul.msk.bf16.gmra.mxu0 %vm550_vm2, %v508_v41  ;;  %v7954_v41 = vmov 5  }
 0x150   :  { %v5972_v56 = vpop.f32.mrf.mxu3 }
 0x151   :  { %1326 = vperm.xlu1 %4794, %v5311_v23   ;;  %1329 = vperm.xlu2 %4792, %v5306_v22   ;;  %v4726_v22 = vld [vmem:[%s7947_s1 + $0x60] sm:$0xff]  ;;  %v7956_v23 = vmov 4   ;;  %7979 = vst [vmem:[#allocation21_spill] sm:$0xff] %v5972_v56 }
 0x152   :  { %1350 = vperm.xlu0 %4793, %v5368_v33   ;;  %v5811_v20 = vpop.permute.xlu1 %889  ;;  %v5814_v53 = vpop.permute.xlu2 %919  ;;  %1555 = vmatpush.bf16.msrb.mxu3 %v4726_v22 }
 0x153   :  { %v5816_v55 = vpop.permute.xlu0 %904 }
 0x156   :  { %4183 = vmatmul.msk.bf16.gmra.mxu2 %vm550_vm2, %v514_v57  ;;  %v5936_v57 = vld [vmem:[%s7946_s0 + $0x8] sm:$0xff] }
 0x159   :  { %1335 = vperm.xlu1 %4794, %v5329_v26   ;;  %1338 = vperm.xlu2 %4792, %v5324_v25   ;;  %v4142_v26 = vsel %vm433_vm0, 1.0, %v7960_v48  ;;  %vm950_vm0 = vcmp.eq.s32.totalorder %v5715_v58, %v5400_v45  ;;  %v6051_v58 = vld [vmem:[%s7946_s0 + $0xa0] sm:$0xff] }
 0x15a   :  { %4796 = vset.pattern.permute.xlu0 %v7956_v23  ;;  %v5828_v33 = vpop.permute.xlu1 %898  ;;  %v5830_v37 = vpop.permute.xlu2 %928  ;;  %v4223_v21 = vsel %vm950_vm0, 1.0, %v7960_v48 }
 0x15b   :  { %7966 = vst [vmem:[#allocation8_spill] sm:$0xff] %v5830_v37  ;;  %1673 = vperm.xlu0 %4796, %v5208_v6   ;;  %v5833_v4 = vpop.permute.xlu0 %913  ;;  %v515_v6 = vpack.c.bf16 %v4143_v59, %v4142_v26  ;;  %v5948_v26 = vld [vmem:[%s7946_s0 + $0x50] sm:$0xff]  ;;  %v4733_v59 = vld [vmem:[%s7947_s1 + $0x98] sm:$0xff] }
 0x15c   :  { %1962 = vmatpush.bf16.msrb.mxu0 %v4733_v59  ;;  %v7958_v59 = vmov 6  }
 0x161   :  { %1344 = vperm.xlu1 %4794, %v5347_v29   ;;  %1347 = vperm.xlu2 %4792, %v5342_v28  }
 0x162   :  { %v5842_v25 = vpop.permute.xlu1 %907  ;;  %v5845_v39 = vpop.permute.xlu2 %937 }
 0x163   :  { %7967 = vst [vmem:[#allocation9_spill] sm:$0xff] %v5845_v39  ;;  %1688 = vperm.xlu0 %4796, %v5226_v9   ;;  %v5848_v8 = vpop.permute.xlu0 %922  ;;  %v4744_v39 = vld [vmem:[%s7947_s1 + $0xf0] sm:$0xff] }
 0x164   :  { %7968 = vst [vmem:[#allocation10_spill] sm:$0xff] %v5848_v8 }
 0x166   :  { %4184 = vmatmul.msk.bf16.gmra.mxu2 %vm550_vm2, %v515_v6 }
 0x169   :  { %1353 = vperm.xlu1 %4794, %v5363_v32   ;;  %4795 = vset.pattern.permute.xlu2 %v7956_v23  ;;  %v4145_v32 = vsel %vm436_vm3, 1.0, %v7960_v48 }
 0x16a   :  { %v5855_v28 = vpop.permute.xlu1 %916  ;;  %1670 = vperm.xlu2 %4795, %v5190_v3  }
 0x16b   :  { %1697 = vperm.xlu0 %4796, %v5244_v12   ;;  %v5859_v29 = vpop.permute.xlu0 %931  ;;  %v1261_v9 = vpop.permute.xlu2 %1260  ;;  %v4144_v12 = vsel %vm435_vm4, 1.0, %v7960_v48  ;;  %vm952_vm4 = vcmp.eq.s32.totalorder %v5779_v14, %v5400_v45 }
 0x16c   :  { %7970 = vst [vmem:[#allocation12_spill] sm:$0xff] %v5859_v29  ;;  %v516_v1 = vpack.c.bf16 %v4145_v32, %v4144_v12  ;;  %vm1355_vm5 = vcmp.eq.s32.totalorder %v1261_v9, %v5400_v45  ;;  %v5958_v9 = vld [vmem:[%s7946_s0 + $0x58] sm:$0xff]  ;;  %v5039_v29 = vld [vmem:[%s7946_s0 + $0x90] sm:$0xff] }
 0x16d   :  { %v4290_v11 = vsel %vm1355_vm5, 1.0, %v7960_v48  ;;  %vm951_vm5 = vcmp.eq.s32.totalorder %v5746_v60, %v5400_v45  ;;  %v6122_v60 = vld [vmem:[%s7946_s0 + $0xd0] sm:$0xff] }
 0x16e   :  { %7990 = vst [vmem:[#allocation31_spill] sm:$0xff] %v6122_v60 }
 0x171   :  { %4797 = vset.pattern.permute.xlu1 %v7956_v23 }
 0x172   :  { %1676 = vperm.xlu1 %4797, %v5185_v2   ;;  %v5870_v3 = vpop.permute.xlu1 %925  ;;  %1679 = vperm.xlu2 %4795, %v5203_v5   ;;  %v4745_v2 = vld [vmem:[%s7947_s1 + $0xf8] sm:$0xff]  ;;  %v5890_v5 = vld [vmem:[%s7946_s0 + $0x20] sm:$0xff] }
 0x173   :  { %7972 = vst [vmem:[#allocation14_spill] sm:$0xff] %v5870_v3  ;;  %1706 = vperm.xlu0 %4796, %v5262_v15   ;;  %v5875_v38 = vpop.permute.xlu0 %940  ;;  %v1270_v62 = vpop.permute.xlu2 %1269  ;;  %3192 = vmatpush.bf16.msra.mxu3 %v4745_v2 }
 0x174   :  { %7973 = vst [vmem:[#allocation15_spill] sm:$0xff] %v5875_v38  ;;  %vm1358_vm9 = vcmp.eq.s32.totalorder %v1270_v62, %v5400_v45 }
 0x175   :  { %v4293_v6 = vsel %vm1358_vm9, 1.0, %v7960_v48  ;;  %vm953_vm9 = vcmp.eq.s32.totalorder %v5728_v49, %v5400_v45 }
 0x176   :  { %4185 = vmatmul.msk.bf16.gmra.mxu2 %vm550_vm2, %v516_v1  ;;  %v5967_v1 = vld [vmem:[%s7946_s0 + $0x10] sm:$0xff] }
 0x177   :  { %3193 = vmatpush.bf16.msra.mxu3 %v4744_v39  ;;  %v7999_v39 = vmov 4  }
 0x17a   :  { %1682 = vperm.xlu1 %4797, %v5890_v5   ;;  %v5893_v15 = vpop.permute.xlu1 %934  ;;  %1685 = vperm.xlu2 %4795, %v5898_v10  }
 0x17b   :  { %7975 = vst [vmem:[#allocation17_spill] sm:$0xff] %v5893_v15  ;;  %1715 = vperm.xlu0 %4796, %v5280_v18   ;;  %v5903_v43 = vpop.permute.xlu2 %1275  ;;  %v4219_v18 = vsel %vm946_vm8, 1.0, %v7960_v48  ;;  %vm954_vm8 = vcmp.eq.s32.totalorder %v5768_v31, %v5400_v45 }
 0x17c   :  { %v1264_v40 = vpop.permute.xlu0 %1263  ;;  %v1041_v19 = vpack.c.bf16 %v4219_v18, %v4218_v34  ;;  %v5987_v34 = vld [vmem:[%s7946_s0 + $0x68] sm:$0xff]  ;;  %vm1360_vm14 = vcmp.eq.s32.totalorder %v5903_v43, %v5400_v45 }
 0x17d   :  { %vm1356_vm6 = vcmp.eq.s32.totalorder %v1264_v40, %v5400_v45  ;;  %v4221_v40 = vsel %vm948_vm11, 1.0, %v7960_v48  ;;  %v4295_v43 = vsel %vm1360_vm14, 1.0, %v7960_v48 }
 0x17e   :  { %v4291_v13 = vsel %vm1356_vm6, 1.0, %v7960_v48 }
 0x17f   :  { %v1451_v24 = vpack.c.bf16 %v4291_v13, %v4290_v11  ;;  %v4220_v13 = vsel %vm947_vm12, 1.0, %v7960_v48 }
 0x180   :  { %v1042_v18 = vpack.c.bf16 %v4221_v40, %v4220_v13  ;;  %v5030_v40 = vld [vmem:[%s7946_s0 + $0x80] sm:$0xff]  ;;  %v6021_v13 = vld [vmem:[%s7946_s0 + $0x88] sm:$0xff] }
 0x181   :  { %4346 = vmatmul.msk.bf16.vlgmr.msrb.gmra.mxu3 %vm550_vm2, %v1451_v24 }
 0x182   :  { %1691 = vperm.xlu1 %4797, %v5917_v16   ;;  %v5920_v52 = vpop.permute.xlu1 %943  ;;  %1694 = vperm.xlu2 %4795, %v5927_v61  }
 0x183   :  { %7976 = vst [vmem:[#allocation18_spill] sm:$0xff] %v5920_v52  ;;  %4802 = vset.pattern.permute.xlu0 %v7954_v41  ;;  %v5931_v30 = vpop.permute.xlu2 %1284  ;;  %v4740_v52 = vld [vmem:[%s7947_s1 + $0xd0] sm:$0xff] }
 0x184   :  { %2083 = vperm.xlu0 %4802, %v5936_v57   ;;  %v5939_v42 = vpop.permute.xlu0 %1278  ;;  %2783 = vmatpush.bf16.msra.mxu2 %v4740_v52  ;;  %vm1363_vm6 = vcmp.eq.s32.totalorder %v5931_v30, %v5400_v45 }
 0x185   :  { %vm1361_vm3 = vcmp.eq.s32.totalorder %v5939_v42, %v5400_v45 }
 0x186   :  { %4274 = vmatmul.msk.bf16.vlgmr.msrb.gmra.mxu2 %vm550_vm2, %v1041_v19 }
 0x189   :  { %v5943_v22 = vpop.f32.mrf.mxu2 }
 0x18a   :  { %7978 = vst [vmem:[#allocation20_spill] sm:$0xff] %v5943_v22  ;;  %1700 = vperm.xlu1 %4797, %v5948_v26   ;;  %1703 = vperm.xlu2 %4795, %v5958_v9   ;;  %v6107_v22 = vpop.f32.mrf.mxu0 }
 0x18b   :  { %v1267_v32 = vpop.permute.xlu1 %1266  ;;  %v5962_v12 = vpop.permute.xlu2 %1293 }
 0x18c   :  { %vm1357_vm10 = vcmp.eq.s32.totalorder %v1267_v32, %v5400_v45  ;;  %2086 = vperm.xlu0 %4802, %v5967_v1   ;;  %v5970_v62 = vpop.permute.xlu0 %1287  ;;  %v6004_v32 = vld [vmem:[%s7946_s0] sm:$0xff]  ;;  %vm1366_vm11 = vcmp.eq.s32.totalorder %v5962_v12, %v5400_v45 }
 0x18d   :  { %v4292_v2 = vsel %vm1357_vm10, 1.0, %v7960_v48  ;;  %vm1364_vm7 = vcmp.eq.s32.totalorder %v5970_v62, %v5400_v45 }
 0x18e   :  { %v1452_v11 = vpack.c.bf16 %v4293_v6, %v4292_v2  ;;  %v6008_v2 = vpop.f32.mrf.mxu3 }
 0x18f   :  { %7981 = vst [vmem:[#allocation23_spill] sm:$0xff] %v6008_v2 }
 0x191   :  { %4347 = vmatmul.msk.bf16.gmra.mxu3 %vm550_vm2, %v1452_v11  ;;  %v5982_v24 = vpop.f32.mrf.mxu2 }
 0x192   :  { %7980 = vst [vmem:[#allocation22_spill] sm:$0xff] %v5982_v24  ;;  %1709 = vperm.xlu1 %4797, %v5987_v34   ;;  %1712 = vperm.xlu2 %4795, %v5993_v47  }
 0x193   :  { %v1273_v7 = vpop.permute.xlu1 %1272  ;;  %v5996_v19 = vpop.permute.xlu2 %1302 }
 0x194   :  { %4807 = vset.pattern.permute.xlu0 %v7958_v59  ;;  %v5999_v6 = vpop.permute.xlu0 %1296  ;;  %vm1359_vm13 = vcmp.eq.s32.totalorder %v1273_v7, %v5400_v45  ;;  %v4222_v59 = vsel %vm949_vm15, 1.0, %v7960_v48  ;;  %vm956_vm15 = vcmp.eq.s32.totalorder %v5744_v50, %v5400_v45  ;;  %v6242_v50 = vld [vmem:[%s7946_s0 + $0xd8] sm:$0xff] }
 0x195   :  { %2490 = vperm.xlu0 %4807, %v6004_v32   ;;  %v4294_v7 = vsel %vm1359_vm13, 1.0, %v7960_v48  ;;  %v4732_v48 = vld [vmem:[%s7947_s1 + $0x90] sm:$0xff]  ;;  %vm955_vm13 = vcmp.eq.s32.totalorder %v5795_v17, %v5400_v45 }
 0x196   :  { %4275 = vmatmul.msk.bf16.gmra.mxu2 %vm550_vm2, %v1042_v18  ;;  %v6036_v2 = vpop.f32.mrf.mxu3  ;;  %1963 = vmatpush.bf16.msrb.mxu0 %v4732_v48  ;;  %v5036_v48 = vld [vmem:[%s7946_s0 + $0xb8] sm:$0xff] }
 0x197   :  { %7983 = vst [vmem:[#allocation25_spill] sm:$0xff] %v6036_v2 }
 0x199   :  { %v6011_v11 = vpop.f32.mrf.mxu2 }
 0x19a   :  { %7982 = vst [vmem:[#allocation24_spill] sm:$0xff] %v6011_v11  ;;  %1718 = vperm.xlu1 %4797, %v5030_v40   ;;  %1721 = vperm.xlu2 %4795, %v6021_v13   ;;  %v1453_v40 = vpack.c.bf16 %v4295_v43, %v4294_v7  ;;  %v1043_v43 = vpack.c.bf16 %v4223_v21, %v4222_v59  ;;  %v6076_v21 = vld [vmem:[%s7946_s0 + $0xb0] sm:$0xff] }
 0x19b   :  { %v1282_v18 = vpop.permute.xlu1 %1281  ;;  %v6025_v41 = vpop.permute.xlu2 %1311 }
 0x19c   :  { %v6027_v23 = vpop.permute.xlu0 %1305  ;;  %vm1362_vm1 = vcmp.eq.s32.totalorder %v1282_v18, %v5400_v45 }
 0x19d   :  { %2505 = vperm.xlu0 %4807, %v5898_v10  }
 0x19e   :  { %v6082_v36 = vpop.f32.mrf.mxu3 }
 0x19f   :  { %7986 = vst [vmem:[#allocation28_spill] sm:$0xff] %v6082_v36 }
 0x1a1   :  { %4348 = vmatmul.msk.bf16.gmra.mxu3 %vm550_vm2, %v1453_v40  ;;  %v6039_v56 = vpop.f32.mrf.mxu2 }
 0x1a2   :  { %7984 = vst [vmem:[#allocation26_spill] sm:$0xff] %v6039_v56  ;;  %1727 = vperm.xlu1 %4797, %v6044_v35   ;;  %1730 = vperm.xlu2 %4795, %v6051_v58   ;;  %v6063_v56 = vld [vmem:[%s7946_s0 + $0x30] sm:$0xff] }
 0x1a3   :  { %v6054_v7 = vpop.permute.xlu1 %1290  ;;  %v6056_v40 = vpop.permute.xlu2 %1320 }
 0x1a4   :  { %v6058_v2 = vpop.permute.xlu0 %1314  ;;  %vm1365_vm10 = vcmp.eq.s32.totalorder %v6054_v7, %v5400_v45 }
 0x1a5   :  { %2508 = vperm.xlu0 %4807, %v6063_v56  }
 0x1a6   :  { %4276 = vmatmul.msk.bf16.gmra.mxu2 %vm550_vm2, %v1043_v43  ;;  %v4731_v43 = vld [vmem:[%s7947_s1 + $0x88] sm:$0xff]  ;;  %v6131_v38 = vpop.f32.mrf.mxu3 }
 0x1a7   :  { %1964 = vmatpush.bf16.msrb.mxu0 %v4731_v43  ;;  %7993 = vst [vmem:[#allocation34_spill] sm:$0xff] %v6131_v38  ;;  %v7996_v38 = vmov 7  }
 0x1a9   :  { %v6071_v59 = vpop.f32.mrf.mxu2 }
 0x1aa   :  { %7985 = vst [vmem:[#allocation27_spill] sm:$0xff] %v6071_v59  ;;  %1736 = vperm.xlu1 %4797, %v6076_v21   ;;  %1739 = vperm.xlu2 %4795, %v5036_v48   ;;  %v7987_v59 = vmov 0.0   ;;  %v4730_v48 = vld [vmem:[%s7947_s1 + $0x80] sm:$0xff] }
 0x1ab   :  { %v6089_v18 = vpop.permute.xlu1 %1299  ;;  %v4297_v11 = vsel %vm1362_vm1, 1.0, %v7987_v59  ;;  %v6092_v0 = vpop.permute.xlu2 %1329  ;;  %v4296_v42 = vsel %vm1361_vm3, 1.0, %v7987_v59  ;;  %1965 = vmatpush.bf16.msrb.mxu0 %v4730_v48  ;;  %v4225_v43 = vsel %vm952_vm4, 1.0, %v7987_v59  ;;  %v4298_v15 = vsel %vm1363_vm6, 1.0, %v7987_v59 }
 0x1ac   :  { %v6094_v24 = vpop.permute.xlu0 %1323  ;;  %v1454_v36 = vpack.c.bf16 %v4297_v11, %v4296_v42  ;;  %v4224_v11 = vsel %vm951_vm5, 1.0, %v7987_v59  ;;  %v4299_v30 = vsel %vm1364_vm7, 1.0, %v7987_v59  ;;  %v4226_v31 = vsel %vm953_vm9, 1.0, %v7987_v59 }
 0x1ad   :  { %4816 = vset.pattern.permute.xlu0 %v7962_v44  ;;  %v6115_v44 = vld [vmem:[%s7946_s0 + $0xc8] sm:$0xff]  ;;  %v1455_v37 = vpack.c.bf16 %v4299_v30, %v4298_v15  ;;  %v8002_v30 = vmov 5   ;;  %v4301_v7 = vsel %vm1366_vm11, 1.0, %v7987_v59  ;;  %v4228_v8 = vsel %vm955_vm13, 1.0, %v7987_v59 }
 0x1ae   :  { %2921 = vperm.xlu0 %4816, %v5917_v16   ;;  %7989 = vst [vmem:[#allocation30_spill] sm:$0xff] %v6115_v44  ;;  %vm1368_vm0 = vcmp.eq.s32.totalorder %v6089_v18, %v5400_v45  ;;  %vm1367_vm1 = vcmp.eq.s32.totalorder %v5999_v6, %v5400_v45  ;;  %vm958_vm3 = vcmp.eq.s32.totalorder %v5811_v20, %v5400_v45  ;;  %v6272_v6 = vld [vmem:[%s7946_s0 + $0x48] sm:$0xff] }
 0x1af   :  { %vm957_vm4 = vcmp.eq.s32.totalorder %v5784_v63, %v5400_v45  ;;  %v4231_v20 = vsel %vm958_vm3, 1.0, %v7987_v59  ;;  %vm1370_vm7 = vcmp.eq.s32.totalorder %v6027_v23, %v5400_v45  ;;  %vm960_vm9 = vcmp.eq.s32.totalorder %v5800_v54, %v5400_v45 }
 0x1b0   :  { %v4230_v63 = vsel %vm957_vm4, 1.0, %v7987_v59 }
 0x1b1   :  { %4349 = vmatmul.msk.bf16.gmra.mxu3 %vm550_vm2, %v1454_v36  ;;  %v6110_v14 = vpop.f32.mrf.mxu2  ;;  %v1044_v36 = vpack.c.bf16 %v4225_v43, %v4224_v11  ;;  %v7995_v11 = vmov 6  }
 0x1b2   :  { %7988 = vst [vmem:[#allocation29_spill] sm:$0xff] %v6110_v14  ;;  %1745 = vperm.xlu1 %4797, %v6115_v44   ;;  %1748 = vperm.xlu2 %4795, %v6122_v60  }
 0x1b3   :  { %v6125_v42 = vpop.permute.xlu1 %1308  ;;  %v6127_v48 = vpop.permute.xlu2 %1338 }
 0x1b4   :  { %7991 = vst [vmem:[#allocation32_spill] sm:$0xff] %v6127_v48  ;;  %v6129_v14 = vpop.permute.xlu0 %1332  ;;  %v6169_v48 = vpop.f32.mrf.mxu3  ;;  %vm1371_vm13 = vcmp.eq.s32.totalorder %v6125_v42, %v5400_v45 }
 0x1b5   :  { %7992 = vst [vmem:[#allocation33_spill] sm:$0xff] %v6129_v14  ;;  %v4306_v42 = vsel %vm1371_vm13, 1.0, %v7987_v59  ;;  %vm966_vm13 = vcmp.eq.s32.totalorder %v5833_v4, %v5400_v45 }
 0x1b6   :  { %2924 = vperm.xlu0 %4816, %v5927_v61   ;;  %4277 = vmatmul.msk.bf16.gmra.mxu2 %vm550_vm2, %v1044_v36  ;;  %v6148_v36 = vpop.f32.mrf.mxu0  ;;  %8000 = vst [vmem:[#allocation38_spill] sm:$0xff] %v6169_v48  ;;  %v6190_v48 = vld [vmem:[%s7946_s0 + $0xa8] sm:$0xff]  ;;  %v4239_v4 = vsel %vm966_vm13, 1.0, %v7987_v59 }
 0x1b9   :  { %v6145_v43 = vpop.f32.mrf.mxu2 }
 0x1ba   :  { %7994 = vst [vmem:[#allocation35_spill] sm:$0xff] %v6145_v43  ;;  %4798 = vset.pattern.permute.xlu1 %v7995_v11  ;;  %4799 = vset.pattern.permute.xlu2 %v7996_v38 }
 0x1bb   :  { %v6151_v52 = vpop.permute.xlu1 %1317  ;;  %2493 = vperm.xlu1 %4798, %v5936_v57   ;;  %2900 = vperm.xlu2 %4799, %v6004_v32   ;;  %v6157_v62 = vpop.permute.xlu2 %1347 }
 0x1bc   :  { %7997 = vst [vmem:[#allocation36_spill] sm:$0xff] %v6157_v62  ;;  %v6159_v43 = vpop.permute.xlu0 %1341  ;;  %v4227_v62 = vsel %vm954_vm8, 1.0, %v7987_v59  ;;  %vm1369_vm8 = vcmp.eq.s32.totalorder %v5996_v19, %v5400_v45  ;;  %vm1374_vm4 = vcmp.eq.s32.totalorder %v6151_v52, %v5400_v45 }
 0x1bd   :  { %7998 = vst [vmem:[#allocation37_spill] sm:$0xff] %v6159_v43  ;;  %v1045_v15 = vpack.c.bf16 %v4227_v62, %v4226_v31  ;;  %v4300_v31 = vsel %vm1365_vm10, 1.0, %v7987_v59  ;;  %v4304_v23 = vsel %vm1369_vm8, 1.0, %v7987_v59  ;;  %vm959_vm10 = vcmp.eq.s32.totalorder %v5765_v46, %v5400_v45 }
 0x1be   :  { %4821 = vset.pattern.permute.xlu0 %v7999_v39  ;;  %v6183_v49 = vpop.f32.mrf.mxu0  ;;  %v4232_v46 = vsel %vm959_vm10, 1.0, %v7987_v59  ;;  %vm1376_vm10 = vcmp.eq.s32.totalorder %v6094_v24, %v5400_v45 }
 0x1bf   :  { %1724 = vperm.xlu0 %4821, %v5039_v29  }
 0x1c1   :  { %4350 = vmatmul.msk.bf16.gmra.mxu3 %vm550_vm2, %v1455_v37  ;;  %v6173_v43 = vpop.f32.mrf.mxu2 }
 0x1c2   :  { %8001 = vst [vmem:[#allocation39_spill] sm:$0xff] %v6173_v43  ;;  %v1456_v43 = vpack.c.bf16 %v4301_v7, %v4300_v31  ;;  %v4229_v31 = vsel %vm956_vm15, 1.0, %v7987_v59  ;;  %vm961_vm15 = vcmp.eq.s32.totalorder %v5828_v33, %v5400_v45 }
 0x1c3   :  { %v6176_v60 = vpop.permute.xlu1 %1326  ;;  %4800 = vset.pattern.permute.xlu1 %v7996_v38  ;;  %4801 = vset.pattern.permute.xlu2 %v8002_v30  ;;  %v1046_v7 = vpack.c.bf16 %v4229_v31, %v4228_v8  ;;  %v4302_v31 = vsel %vm1367_vm1, 1.0, %v7987_v59 }
 0x1c4   :  { %v6180_v29 = vpop.permute.xlu0 %1350  ;;  %2903 = vperm.xlu1 %4800, %v5936_v57   ;;  %2080 = vperm.xlu2 %4801, %v6004_v32   ;;  %v1671_v37 = vpop.permute.xlu2 %1670 }
 0x1c5   :  { %8003 = vst [vmem:[#allocation40_spill] sm:$0xff] %v6180_v29  ;;  %v6197_v57 = vpop.f32.mrf.mxu3  ;;  %vm1765_vm12 = vcmp.eq.s32.totalorder %v1671_v37, %v5400_v45  ;;  %v5041_v37 = vld [vmem:[%s7946_s0 + $0x18] sm:$0xff]  ;;  %v5042_v29 = vld [vmem:[%s7946_s0 + $0xc0] sm:$0xff] }
 0x1c6   :  { %4278 = vmatmul.msk.bf16.gmra.mxu2 %vm550_vm2, %v1045_v15  ;;  %8005 = vst [vmem:[#allocation42_spill] sm:$0xff] %v6197_v57  ;;  %v4362_v12 = vsel %vm1765_vm12, 1.0, %v7987_v59 }
 0x1c7   :  { %1733 = vperm.xlu0 %4821, %v6190_v48  }
 0x1c9   :  { %v6195_v62 = vpop.f32.mrf.mxu2 }
 0x1ca   :  { %8004 = vst [vmem:[#allocation41_spill] sm:$0xff] %v6195_v62  ;;  %v6215_v62 = vpop.f32.mrf.mxu0 }
 0x1cb   :  { %v6202_v32 = vpop.permute.xlu1 %1335 }
 0x1cc   :  { %4803 = vset.pattern.permute.xlu1 %v7995_v11  ;;  %v1680_v15 = vpop.permute.xlu2 %1679  ;;  %4804 = vset.pattern.permute.xlu2 %v7995_v11 }
 0x1cd   :  { %2496 = vperm.xlu1 %4803, %v5967_v1   ;;  %v1674_v57 = vpop.permute.xlu0 %1673  ;;  %2499 = vperm.xlu2 %4804, %v5041_v37   ;;  %vm1768_vm5 = vcmp.eq.s32.totalorder %v1680_v15, %v5400_v45 }
 0x1ce   :  { %vm1766_vm14 = vcmp.eq.s32.totalorder %v1674_v57, %v5400_v45 }
 0x1cf   :  { %1742 = vperm.xlu0 %4821, %v5042_v29   ;;  %v4363_v17 = vsel %vm1766_vm14, 1.0, %v7987_v59  ;;  %v6232_v29 = vpop.f32.mrf.mxu3  ;;  %vm1372_vm14 = vcmp.eq.s32.totalorder %v6025_v41, %v5400_v45 }
 0x1d0   :  { %v1861_v3 = vpack.c.bf16 %v4363_v17, %v4362_v12  ;;  %8008 = vst [vmem:[#allocation45_spill] sm:$0xff] %v6232_v29  ;;  %v4307_v41 = vsel %vm1372_vm14, 1.0, %v7987_v59  ;;  %vm965_vm14 = vcmp.eq.s32.totalorder %v5797_v27, %v5400_v45 }
 0x1d1   :  { %4351 = vmatmul.msk.bf16.gmra.mxu3 %vm550_vm2, %v1456_v43  ;;  %v6226_v44 = vpop.f32.mrf.mxu2  ;;  %v4303_v43 = vsel %vm1368_vm0, 1.0, %v7987_v59  ;;  %vm962_vm0 = vcmp.eq.s32.totalorder %v5782_v51, %v5400_v45 }
 0x1d2   :  { %8006 = vst [vmem:[#allocation43_spill] sm:$0xff] %v6226_v44  ;;  %4418 = vmatmul.msk.bf16.vlgmr.msrb.gmra.mxu0 %vm550_vm2, %v1861_v3  ;;  %v6246_v8 = vpop.f32.mrf.mxu0  ;;  %v1457_v18 = vpack.c.bf16 %v4303_v43, %v4302_v31  ;;  %v1047_v43 = vpack.c.bf16 %v4231_v20, %v4230_v63  ;;  %v4365_v31 = vsel %vm1768_vm5, 1.0, %v7987_v59  ;;  %v4305_v63 = vsel %vm1370_vm7, 1.0, %v7987_v59  ;;  %v4736_v44 = vld [vmem:[%s7947_s1 + $0xb0] sm:$0xff] }
 0x1d3   :  { %v6230_v57 = vpop.permute.xlu1 %1344  ;;  %v4235_v51 = vsel %vm962_vm0, 1.0, %v7987_v59  ;;  %vm1373_vm5 = vcmp.eq.s32.totalorder %v6058_v2, %v5400_v45  ;;  %vm963_vm7 = vcmp.eq.s32.totalorder %v5816_v55, %v5400_v45 }
 0x1d4   :  { %8007 = vst [vmem:[#allocation44_spill] sm:$0xff] %v6230_v57  ;;  %v6234_v14 = vpop.permute.xlu2 %1685  ;;  %v4308_v2 = vsel %vm1373_vm5, 1.0, %v7987_v59  ;;  %vm967_vm5 = vcmp.eq.s32.totalorder %v5855_v28, %v5400_v45 }
 0x1d5   :  { %4805 = vset.pattern.permute.xlu1 %v7996_v38  ;;  %4806 = vset.pattern.permute.xlu2 %v7996_v38  ;;  %v6306_v20 = vpop.permute.xlu0 %1688  ;;  %vm1770_vm12 = vcmp.eq.s32.totalorder %v6234_v14, %v5400_v45  ;;  %v4743_v14 = vld [vmem:[%s7947_s1 + $0xe8] sm:$0xff] }
 0x1d6   :  { %2906 = vperm.xlu1 %4805, %v5967_v1   ;;  %4279 = vmatmul.msk.bf16.gmra.mxu2 %vm550_vm2, %v1046_v7  ;;  %vm1771_vm1 = vcmp.eq.s32.totalorder %v6306_v20, %v5400_v45 }
 0x1d7   :  { %1751 = vperm.xlu0 %4821, %v6242_v50   ;;  %2909 = vperm.xlu2 %4806, %v5041_v37   ;;  %v6261_v17 = vpop.f32.mrf.mxu3 }
 0x1d8   :  { %8011 = vst [vmem:[#allocation48_spill] sm:$0xff] %v6261_v17  ;;  %3194 = vmatpush.bf16.msra.mxu3 %v4743_v14  ;;  %v1459_v14 = vpack.c.bf16 %v4307_v41, %v4306_v42  ;;  %v4368_v41 = vsel %vm1771_vm1, 1.0, %v7987_v59 }
 0x1d9   :  { %v6250_v3 = vpop.f32.mrf.mxu2 }
 0x1da   :  { %8009 = vst [vmem:[#allocation46_spill] sm:$0xff] %v6250_v3  ;;  %v6282_v7 = vpop.f32.mrf.mxu0 }
 0x1db   :  { %v6254_v1 = vpop.permute.xlu1 %1353 }
 0x1dc   :  { %8010 = vst [vmem:[#allocation47_spill] sm:$0xff] %v6254_v1  ;;  %v6257_v12 = vpop.permute.xlu2 %1694  ;;  %v4234_v1 = vsel %vm961_vm15, 1.0, %v7987_v59 }
 0x1dd   :  { %vm1773_vm8 = vcmp.eq.s32.totalorder %v6257_v12, %v5400_v45 }
 0x1de   :  { %4808 = vset.pattern.permute.xlu1 %v8002_v30  ;;  %v4370_v55 = vsel %vm1773_vm8, 1.0, %v7987_v59 }
 0x1df   :  { %2089 = vperm.xlu1 %4808, %v5041_v37   ;;  %4834 = vset.pattern.permute.xlu0 %v8002_v30  ;;  %v6293_v3 = vpop.f32.mrf.mxu3 }
 0x1e0   :  { %4809 = vset.pattern.permute.xlu2 %v7995_v11  ;;  %2107 = vperm.xlu0 %4834, %v6272_v6   ;;  %8013 = vst [vmem:[#allocation50_spill] sm:$0xff] %v6293_v3  ;;  %v4233_v3 = vsel %vm960_vm9, 1.0, %v7987_v59 }
 0x1e1   :  { %4352 = vmatmul.msk.bf16.gmra.mxu3 %vm550_vm2, %v1457_v18  ;;  %v6278_v37 = vpop.f32.mrf.mxu2  ;;  %2502 = vperm.xlu2 %4809, %v5890_v5   ;;  %v6290_v18 = vpop.f32.mrf.mxu1 }
 0x1e2   :  { %8012 = vst [vmem:[#allocation49_spill] sm:$0xff] %v6278_v37 }
 0x1e4   :  { %v1677_v17 = vpop.permute.xlu1 %1676  ;;  %v6286_v29 = vpop.permute.xlu2 %1703 }
 0x1e5   :  { %vm1767_vm6 = vcmp.eq.s32.totalorder %v1677_v17, %v5400_v45  ;;  %vm1776_vm1 = vcmp.eq.s32.totalorder %v6286_v29, %v5400_v45 }
 0x1e6   :  { %v4364_v15 = vsel %vm1767_vm6, 1.0, %v7987_v59  ;;  %4280 = vmatmul.msk.bf16.gmra.mxu2 %vm550_vm2, %v1047_v43  ;;  %vm964_vm6 = vcmp.eq.s32.totalorder %v5842_v25, %v5400_v45 }
 0x1e7   :  { %v1862_v37 = vpack.c.bf16 %v4365_v31, %v4364_v15  ;;  %4810 = vset.pattern.permute.xlu1 %v7996_v38  ;;  %v6309_v31 = vpop.f32.mrf.mxu0 }
 0x1e8   :  { %2912 = vperm.xlu1 %4810, %v5890_v5   ;;  %2110 = vperm.xlu0 %4834, %v5948_v26  }
 0x1e9   :  { %v6299_v17 = vpop.f32.mrf.mxu2  ;;  %4419 = vmatmul.msk.bf16.gmra.mxu0 %vm550_vm2, %v1862_v37  ;;  %4811 = vset.pattern.permute.xlu2 %v7996_v38  ;;  %v1458_v37 = vpack.c.bf16 %v4305_v63, %v4304_v23  ;;  %v6320_v19 = vpop.f32.mrf.mxu1  ;;  %v1048_v23 = vpack.c.bf16 %v4233_v3, %v4232_v46 }
 0x1ea   :  { %8014 = vst [vmem:[#allocation51_spill] sm:$0xff] %v6299_v17  ;;  %2915 = vperm.xlu2 %4811, %v5898_v10   ;;  %v6328_v63 = vpop.f32.mrf.mxu3  ;;  %v772_v25 = vadd.f32 %v6320_v19, %v6148_v36 }
 0x1eb   :  { %8016 = vst [vmem:[#allocation53_spill] sm:$0xff] %v6328_v63 }
 0x1ec   :  { %v1683_v43 = vpop.permute.xlu1 %1682  ;;  %v6311_v15 = vpop.permute.xlu2 %1712 }
 0x1ed   :  { %vm1769_vm11 = vcmp.eq.s32.totalorder %v1683_v43, %v5400_v45  ;;  %vm1779_vm13 = vcmp.eq.s32.totalorder %v6311_v15, %v5400_v45 }
 0x1ee   :  { %v4366_v43 = vsel %vm1769_vm11, 1.0, %v7987_v59  ;;  %vm1375_vm11 = vcmp.eq.s32.totalorder %v6056_v40, %v5400_v45  ;;  %v4376_v15 = vsel %vm1779_vm13, 1.0, %v7987_v59 }
 0x1ef   :  { %v6351_v3 = vpop.f32.mrf.mxu0  ;;  %v4310_v24 = vsel %vm1375_vm11, 1.0, %v7987_v59 }
 0x1f0   :  { %4812 = vset.pattern.permute.xlu1 %v8002_v30  ;;  %2122 = vperm.xlu0 %4834, %v5993_v47  }
 0x1f1   :  { %4353 = vmatmul.msk.bf16.gmra.mxu3 %vm550_vm2, %v1458_v37  ;;  %2092 = vperm.xlu1 %4812, %v5890_v5   ;;  %v6326_v54 = vpop.f32.mrf.mxu2  ;;  %v4737_v5 = vld [vmem:[%s7947_s1 + $0xb8] sm:$0xff]  ;;  %v6339_v37 = vpop.permute.xlu0 %1697 }
 0x1f2   :  { %8015 = vst [vmem:[#allocation52_spill] sm:$0xff] %v6326_v54  ;;  %4813 = vset.pattern.permute.xlu2 %v8002_v30  ;;  %v4367_v54 = vsel %vm1770_vm12, 1.0, %v7987_v59  ;;  %2372 = vmatpush.bf16.msrb.mxu1 %v4737_v5  ;;  %v6363_v5 = vpop.f32.mrf.mxu1  ;;  %vm1774_vm9 = vcmp.eq.s32.totalorder %v6339_v37, %v5400_v45 }
 0x1f3   :  { %2095 = vperm.xlu2 %4813, %v5898_v10   ;;  %v4739_v10 = vld [vmem:[%s7947_s1 + $0xc8] sm:$0xff]  ;;  %v1863_v46 = vpack.c.bf16 %v4367_v54, %v4366_v43  ;;  %v846_v54 = vpop.f32.mrf.mxu3  ;;  %v4371_v36 = vsel %vm1774_vm9, 1.0, %v7987_v59  ;;  %vm1380_vm9 = vcmp.eq.s32.totalorder %v6202_v32, %v5400_v45 }
 0x1f4   :  { %v1692_v17 = vpop.permute.xlu1 %1691  ;;  %v6341_v63 = vpop.permute.xlu2 %1721  ;;  %2784 = vmatpush.bf16.msra.mxu2 %v4739_v10 }
 0x1f5   :  { %8017 = vst [vmem:[#allocation54_spill] sm:$0xff] %v6341_v63  ;;  %vm1772_vm3 = vcmp.eq.s32.totalorder %v1692_v17, %v5400_v45 }
 0x1f6   :  { %4281 = vmatmul.msk.bf16.gmra.mxu2 %vm550_vm2, %v1048_v23  ;;  %2373 = vmatpush.bf16.msrb.mxu1 %v4736_v44  ;;  %v4735_v44 = vld [vmem:[%s7947_s1 + $0xa8] sm:$0xff] }
 0x1f7   :  { %v6390_v57 = vpop.f32.mrf.mxu0 }
 0x1f8   :  { %4839 = vset.pattern.permute.xlu0 %v7995_v11 }
 0x1f9   :  { %4814 = vset.pattern.permute.xlu1 %v7995_v11  ;;  %v6359_v23 = vpop.f32.mrf.mxu2  ;;  %4420 = vmatmul.msk.bf16.gmra.mxu0 %vm550_vm2, %v1863_v46  ;;  %v6382_v46 = vpop.permute.xlu0 %1706 }
 0x1fa   :  { %8018 = vst [vmem:[#allocation55_spill] sm:$0xff] %v6359_v23  ;;  %2511 = vperm.xlu1 %4814, %v5917_v16   ;;  %2529 = vperm.xlu0 %4839, %v5987_v34   ;;  %v4734_v23 = vld [vmem:[%s7947_s1 + $0xa0] sm:$0xff]  ;;  %v6407_v17 = vpop.f32.mrf.mxu1 }
 0x1fb   :  { %4815 = vset.pattern.permute.xlu2 %v7996_v38  ;;  %2374 = vmatpush.bf16.msrb.mxu1 %v4735_v44  ;;  %v1049_v44 = vpack.c.bf16 %v4235_v51, %v4234_v1  ;;  %v770_v1 = vadd.f32 %v6290_v18, %v6107_v22 }
 0x1fc   :  { %v6370_v43 = vpop.permute.xlu1 %1700  ;;  %2918 = vperm.xlu2 %4815, %v6063_v56   ;;  %v6377_v10 = vpop.permute.xlu2 %1730 }
 0x1fd   :  { %8019 = vst [vmem:[#allocation56_spill] sm:$0xff] %v6377_v10  ;;  %v4369_v10 = vsel %vm1772_vm3, 1.0, %v7987_v59  ;;  %vm1775_vm0 = vcmp.eq.s32.totalorder %v6370_v43, %v5400_v45  ;;  %vm1377_vm3 = vcmp.eq.s32.totalorder %v6176_v60, %v5400_v45 }
 0x1ff   :  { %2375 = vmatpush.bf16.msrb.mxu1 %v4734_v23  ;;  %v6420_v51 = vpop.f32.mrf.mxu0 }
 0x201   :  { %4354 = vmatmul.msk.bf16.gmra.mxu3 %vm550_vm2, %v1459_v14  ;;  %v685_v33 = vpop.f32.mrf.mxu2  ;;  %v6417_v23 = vpop.permute.xlu0 %1715 }
 0x202   :  { %v6396_v42 = vadd.f32 %v846_v54, %v685_v33  ;;  %4817 = vset.pattern.permute.xlu1 %v8002_v30  ;;  %2541 = vperm.xlu0 %4839, %v6021_v13   ;;  %v4753_v33 = vld [vmem:[#allocation2 + $0x38] sm:$0xff] }
 0x203   :  { %2098 = vperm.xlu1 %4817, %v6063_v56   ;;  %v1864_v56 = vpack.c.bf16 %v4369_v10, %v4368_v41  ;;  %3461 = vmatpush.bf16.msra.mxu0 %v4753_v33  ;;  %v6445_v41 = vpop.f32.mrf.mxu1  ;;  %v4236_v33 = vsel %vm963_vm7, 1.0, %v7987_v59  ;;  %vm1777_vm7 = vcmp.eq.s32.totalorder %v6382_v46, %v5400_v45 }
 0x204   :  { %v1557_v20 = vpop.f32.mrf.mxu3  ;;  %v6403_v63 = vpop.permute.xlu1 %1709  ;;  %4818 = vset.pattern.permute.xlu2 %v8002_v30  ;;  %v780_v29 = vadd.f32 %v6445_v41, %v6246_v8  ;;  %v4312_v8 = vsel %vm1377_vm3, 1.0, %v7987_v59 }
 0x205   :  { %v6409_v54 = vpop.permute.xlu2 %1739  ;;  %2101 = vperm.xlu2 %4818, %v5917_v16   ;;  %v4309_v16 = vsel %vm1374_vm4, 1.0, %v7987_v59  ;;  %vm1378_vm4 = vcmp.eq.s32.totalorder %v6092_v0, %v5400_v45  ;;  %vm1778_vm8 = vcmp.eq.s32.totalorder %v6403_v63, %v5400_v45  ;;  %v4374_v63 = vsel %vm1777_vm7, 1.0, %v7987_v59 }
 0x206   :  { %4282 = vmatmul.msk.bf16.gmra.mxu2 %vm550_vm2, %v1049_v44  ;;  %v6442_v44 = vld [vmem:[%s7946_s0 + $0xf0] sm:$0xff] }
 0x207   :  { %v6466_v37 = vpop.f32.mrf.mxu0 }
 0x209   :  { %v1147_v14 = vpop.f32.mrf.mxu2  ;;  %4421 = vmatmul.msk.bf16.gmra.mxu0 %vm550_vm2, %v1864_v56  ;;  %v4237_v56 = vsel %vm964_vm6, 1.0, %v7987_v59  ;;  %vm968_vm6 = vcmp.eq.s32.totalorder %v5814_v53, %v5400_v45  ;;  %v5046_v53 = vld [vmem:[%s7946_s0 + $0x60] sm:$0xff] }
 0x20a   :  { %v1227_v13 = vadd.f32 %v1147_v14, %v770_v1  ;;  %4848 = vset.pattern.permute.xlu0 %v7999_v39  ;;  %v2084_v1 = vpop.permute.xlu0 %2083 }
 0x20b   :  { %4819 = vset.pattern.permute.xlu1 %v7995_v11  ;;  %1760 = vperm.xlu0 %4848, %v6442_v44   ;;  %vm2176_vm12 = vcmp.eq.s32.totalorder %v2084_v1, %v5400_v45  ;;  %v777_v1 = vadd.f32 %v6407_v17, %v6215_v62 }
 0x20c   :  { %v1559_v22 = vpop.f32.mrf.mxu3  ;;  %v6426_v18 = vpop.permute.xlu1 %1718  ;;  %2514 = vperm.xlu1 %4819, %v5927_v61   ;;  %v6429_v52 = vadd.f32 %v1557_v20, %v1227_v13  ;;  %v1460_v20 = vpack.c.bf16 %v4309_v16, %v4308_v2  ;;  %v1050_v16 = vpack.c.bf16 %v4237_v56, %v4236_v33  ;;  %v775_v56 = vadd.f32 %v6363_v5, %v6183_v49 }
 0x20d   :  { %4820 = vset.pattern.permute.xlu2 %v7995_v11  ;;  %v6436_v10 = vpop.permute.xlu2 %1748  ;;  %v4435_v33 = vsel %vm2176_vm12, 1.0, %v7987_v59 }
 0x20e   :  { %2517 = vperm.xlu2 %4820, %v6272_v6  }
 0x211   :  { %4355 = vmatmul.msk.bf16.gmra.mxu3 %vm550_vm2, %v1460_v20  ;;  %v1149_v14 = vpop.f32.mrf.mxu2 }
 0x212   :  { %v1228_v13 = vadd.f32 %v1149_v14, %v772_v25  ;;  %v1865_v25 = vpack.c.bf16 %v4371_v36, %v4370_v55  ;;  %v6503_v55 = vpop.f32.mrf.mxu0 }
 0x213   :  { %4853 = vset.pattern.permute.xlu0 %v7996_v38 }
 0x214   :  { %v1562_v19 = vpop.f32.mrf.mxu3  ;;  %v6460_v2 = vpop.permute.xlu1 %1727  ;;  %4822 = vset.pattern.permute.xlu1 %v7996_v38  ;;  %v6463_v12 = vadd.f32 %v1559_v22, %v1228_v13  ;;  %2957 = vperm.xlu0 %4853, %v6044_v35   ;;  %v4311_v13 = vsel %vm1376_vm10, 1.0, %v7987_v59 }
 0x215   :  { %2927 = vperm.xlu1 %4822, %v6272_v6   ;;  %v6468_v20 = vpop.permute.xlu2 %2900  ;;  %v6477_v22 = vpop.f32.mrf.mxu1  ;;  %v1461_v40 = vpack.c.bf16 %v4311_v13, %v4310_v24  ;;  %v4373_v24 = vsel %vm1776_vm1, 1.0, %v7987_v59 }
 0x216   :  { %4283 = vmatmul.msk.bf16.gmra.mxu2 %vm550_vm2, %v1050_v16  ;;  %4823 = vset.pattern.permute.xlu2 %v8002_v30  ;;  %v782_v0 = vadd.f32 %v6477_v22, %v6282_v7 }
 0x217   :  { %2104 = vperm.xlu2 %4823, %v5927_v61   ;;  %v6484_v61 = vpop.permute.xlu0 %2086 }
 0x218   :  { %vm2177_vm3 = vcmp.eq.s32.totalorder %v6484_v61, %v5400_v45 }
 0x219   :  { %v1152_v6 = vpop.f32.mrf.mxu2  ;;  %4422 = vmatmul.msk.bf16.gmra.mxu0 %vm550_vm2, %v1865_v25  ;;  %v4238_v25 = vsel %vm965_vm14, 1.0, %v7987_v59  ;;  %vm1780_vm14 = vcmp.eq.s32.totalorder %v6417_v23, %v5400_v45 }
 0x21a   :  { %v1229_v14 = vadd.f32 %v1152_v6, %v775_v56  ;;  %v4372_v56 = vsel %vm1775_vm0, 1.0, %v7987_v59 }
 0x21c   :  { %v1564_v49 = vpop.f32.mrf.mxu3  ;;  %v6488_v35 = vpop.permute.xlu1 %1736  ;;  %v6490_v5 = vadd.f32 %v1562_v19, %v1229_v14  ;;  %2960 = vperm.xlu0 %4853, %v6051_v58   ;;  %v1051_v58 = vpack.c.bf16 %v4239_v4, %v4238_v25 }
 0x21d   :  { %4824 = vset.pattern.permute.xlu1 %v7995_v11  ;;  %v6513_v17 = vpop.f32.mrf.mxu1 }
 0x21e   :  { %2520 = vperm.xlu1 %4824, %v5948_v26   ;;  %v2081_v16 = vpop.permute.xlu2 %2080 }
 0x21f   :  { %4825 = vset.pattern.permute.xlu2 %v7995_v11  ;;  %vm2175_vm15 = vcmp.eq.s32.totalorder %v2081_v16, %v5400_v45  ;;  %v6524_v13 = vpop.permute.xlu0 %2490  ;;  %v6540_v16 = vpop.f32.mrf.mxu0 }
 0x220   :  { %2523 = vperm.xlu2 %4825, %v5958_v9   ;;  %v4434_v36 = vsel %vm2175_vm15, 1.0, %v7987_v59 }
 0x221   :  { %4356 = vmatmul.msk.bf16.gmra.mxu3 %vm550_vm2, %v1461_v40  ;;  %v1154_v27 = vpop.f32.mrf.mxu2  ;;  %v2271_v19 = vpack.c.bf16 %v4435_v33, %v4434_v36  ;;  %v1866_v40 = vpack.c.bf16 %v4373_v24, %v4372_v56 }
 0x222   :  { %v1230_v62 = vadd.f32 %v1154_v27, %v777_v1  ;;  %v4752_v1 = vld [vmem:[#allocation2 + $0x30] sm:$0xff]  ;;  %v4313_v27 = vsel %vm1378_vm4, 1.0, %v7987_v59 }
 0x223   :  { %4490 = vmatmul.msk.bf16.vlgmr.msrb.gmra.mxu1 %vm550_vm2, %v2271_v19  ;;  %3462 = vmatpush.bf16.msra.mxu0 %v4752_v1  ;;  %v1462_v19 = vpack.c.bf16 %v4313_v27, %v4312_v8 }
 0x224   :  { %v1567_v6 = vpop.f32.mrf.mxu3  ;;  %v6520_v43 = vpop.permute.xlu1 %1745  ;;  %v6522_v14 = vadd.f32 %v1564_v49, %v1230_v62  ;;  %4860 = vset.pattern.permute.xlu0 %v8002_v30  ;;  %v4240_v62 = vsel %vm967_vm5, 1.0, %v7987_v59  ;;  %vm1781_vm5 = vcmp.eq.s32.totalorder %v6426_v18, %v5400_v45 }
 0x225   :  { %2143 = vperm.xlu0 %4860, %v6190_v48   ;;  %v786_v36 = vpop.f32.mrf.mxu1 }
 0x226   :  { %4826 = vset.pattern.permute.xlu1 %v7996_v38  ;;  %4284 = vmatmul.msk.bf16.gmra.mxu2 %vm550_vm2, %v1051_v58  ;;  %v4375_v58 = vsel %vm1778_vm8, 1.0, %v7987_v59 }
 0x227   :  { %2930 = vperm.xlu1 %4826, %v5948_v26   ;;  %v6538_v33 = vpop.permute.xlu2 %2499  ;;  %v6553_v48 = vpop.permute.xlu0 %2505 }
 0x228   :  { %4827 = vset.pattern.permute.xlu2 %v7996_v38  ;;  %v6575_v22 = vpop.f32.mrf.mxu0 }
 0x229   :  { %v1157_v49 = vpop.f32.mrf.mxu2  ;;  %4423 = vmatmul.msk.bf16.gmra.mxu0 %vm550_vm2, %v1866_v40  ;;  %2933 = vperm.xlu2 %4827, %v5958_v9  }
 0x22a   :  { %v1231_v26 = vadd.f32 %v1157_v49, %v780_v29  ;;  %v785_v49 = vadd.f32 %v6513_v17, %v6309_v31  ;;  %v8020_v31 = vld [vmem:[#allocation33_spill] sm:$0xff]  ;;  %v4315_v17 = vsel %vm1380_vm9, 1.0, %v7987_v59 }
 0x22b   :  { %vm1379_vm10 = vcmp.eq.s32.totalorder %v8020_v31, %v5400_v45 }
 0x22c   :  { %v1569_v41 = vpop.f32.mrf.mxu3  ;;  %v6546_v60 = vadd.f32 %v1567_v6, %v1231_v26  ;;  %v4738_v6 = vld [vmem:[%s7947_s1 + $0xc0] sm:$0xff] }
 0x22d   :  { %v6548_v4 = vpop.permute.xlu1 %2493  ;;  %2146 = vperm.xlu0 %4860, %v6076_v21   ;;  %v1867_v21 = vpack.c.bf16 %v4375_v58, %v4374_v63  ;;  %2785 = vmatpush.bf16.msra.mxu2 %v4738_v6  ;;  %v789_v29 = vpop.f32.mrf.mxu1  ;;  %v8023_v63 = vld [vmem:[#allocation10_spill] sm:$0xff]  ;;  %v787_v58 = vadd.f32 %v786_v36, %v6351_v3  ;;  %v4377_v36 = vsel %vm1780_vm14, 1.0, %v7987_v59  ;;  %vm1784_vm14 = vcmp.eq.s32.totalorder %v6460_v2, %v5400_v45 }
 0x22e   :  { %vm969_vm12 = vcmp.eq.s32.totalorder %v8023_v63, %v5400_v45 }
 0x22f   :  { %4828 = vset.pattern.permute.xlu1 %v8002_v30  ;;  %v6592_v26 = vpop.permute.xlu0 %2508 }
 0x230   :  { %2113 = vperm.xlu1 %4828, %v5958_v9   ;;  %v4241_v9 = vsel %vm968_vm6, 1.0, %v7987_v59 }
 0x231   :  { %4357 = vmatmul.msk.bf16.gmra.mxu3 %vm550_vm2, %v1462_v19  ;;  %v1159_v28 = vpop.f32.mrf.mxu2  ;;  %4829 = vset.pattern.permute.xlu2 %v7995_v11  ;;  %v6573_v7 = vpop.permute.xlu2 %2909  ;;  %v1052_v46 = vpack.c.bf16 %v4241_v9, %v4240_v62  ;;  %v8022_v62 = vld [vmem:[#allocation14_spill] sm:$0xff] }
 0x232   :  { %v1232_v25 = vadd.f32 %v1159_v28, %v782_v0  ;;  %2526 = vperm.xlu2 %4829, %v5046_v53   ;;  %v8021_v0 = vld [vmem:[#allocation30_spill] sm:$0xff]  ;;  %vm970_vm11 = vcmp.eq.s32.totalorder %v8022_v62, %v5400_v45  ;;  %v4314_v28 = vsel %vm1379_vm10, 1.0, %v7987_v59 }
 0x233   :  { %v1463_v9 = vpack.c.bf16 %v4315_v17, %v4314_v28  ;;  %v8024_v17 = vld [vmem:[#allocation31_spill] sm:$0xff] }
 0x234   :  { %v1572_v56 = vpop.f32.mrf.mxu3  ;;  %v6582_v24 = vadd.f32 %v1569_v41, %v1232_v25  ;;  %v4742_v41 = vld [vmem:[%s7947_s1 + $0xe0] sm:$0xff]  ;;  %v6612_v25 = vpop.f32.mrf.mxu0 }
 0x235   :  { %4867 = vset.pattern.permute.xlu0 %v7995_v11  ;;  %3195 = vmatpush.bf16.msra.mxu3 %v4742_v41 }
 0x236   :  { %v6584_v40 = vpop.permute.xlu1 %2903  ;;  %4285 = vmatmul.msk.bf16.gmra.mxu2 %vm550_vm2, %v1052_v46  ;;  %2565 = vperm.xlu0 %4867, %v8021_v0   ;;  %v790_v0 = vadd.f32 %v789_v29, %v6390_v57 }
 0x237   :  { %v6627_v41 = vpop.permute.xlu0 %2921 }
 0x238   :  { %4830 = vset.pattern.permute.xlu1 %v7996_v38 }
 0x239   :  { %2936 = vperm.xlu1 %4830, %v5046_v53   ;;  %v1162_v8 = vpop.f32.mrf.mxu2  ;;  %4424 = vmatmul.msk.bf16.gmra.mxu0 %vm550_vm2, %v1867_v21  ;;  %v791_v21 = vpop.f32.mrf.mxu1 }
 0x23a   :  { %v1233_v1 = vadd.f32 %v1162_v8, %v785_v49  ;;  %4831 = vset.pattern.permute.xlu2 %v7996_v38  ;;  %v4242_v8 = vsel %vm969_vm12, 1.0, %v7987_v59 }
 0x23b   :  { %2939 = vperm.xlu2 %4831, %v5987_v34   ;;  %v6603_v32 = vpop.permute.xlu2 %2502 }
 0x23c   :  { %v1574_v27 = vpop.f32.mrf.mxu3  ;;  %v6606_v19 = vadd.f32 %v1572_v56, %v1233_v1  ;;  %v4243_v56 = vsel %vm970_vm11, 1.0, %v7987_v59  ;;  %v6640_v62 = vpop.f32.mrf.mxu0 }
 0x23d   :  { %v1053_v3 = vpack.c.bf16 %v4243_v56, %v4242_v8  ;;  %v5047_v8 = vld [vmem:[%s7946_s0 + $0x78] sm:$0xff] }
 0x23e   :  { %2568 = vperm.xlu0 %4867, %v8024_v17   ;;  %v792_v17 = vadd.f32 %v791_v21, %v6420_v51  ;;  %v8029_v21 = vld [vmem:[#allocation54_spill] sm:$0xff] }
 0x23f   :  { %v6614_v46 = vpop.permute.xlu1 %2496  ;;  %vm1782_vm7 = vcmp.eq.s32.totalorder %v8029_v21, %v5400_v45 }
 0x241   :  { %4358 = vmatmul.msk.bf16.gmra.mxu3 %vm550_vm2, %v1463_v9  ;;  %4832 = vset.pattern.permute.xlu1 %v8002_v30  ;;  %v1164_v6 = vpop.f32.mrf.mxu2  ;;  %v8025_v9 = vld [vmem:[#allocation37_spill] sm:$0xff]  ;;  %v794_v57 = vpop.f32.mrf.mxu1 }
 0x242   :  { %v1234_v49 = vadd.f32 %v1164_v6, %v787_v58  ;;  %2116 = vperm.xlu1 %4832, %v5046_v53   ;;  %v1868_v53 = vpack.c.bf16 %v4377_v36, %v4376_v15  ;;  %vm1382_vm15 = vcmp.eq.s32.totalorder %v8025_v9, %v5400_v45  ;;  %v8026_v58 = vld [vmem:[#allocation32_spill] sm:$0xff]  ;;  %v4436_v9 = vsel %vm2177_vm3, 1.0, %v7987_v59 }
 0x243   :  { %4833 = vset.pattern.permute.xlu2 %v8002_v30  ;;  %vm1381_vm0 = vcmp.eq.s32.totalorder %v8026_v58, %v5400_v45  ;;  %v4317_v29 = vsel %vm1382_vm15, 1.0, %v7987_v59 }
 0x244   :  { %v1577_v23 = vpop.f32.mrf.mxu3  ;;  %2119 = vperm.xlu2 %4833, %v5987_v34   ;;  %v6633_v1 = vpop.permute.xlu2 %2915  ;;  %v6635_v31 = vadd.f32 %v1574_v27, %v1234_v49  ;;  %v4751_v27 = vld [vmem:[#allocation2 + $0x28] sm:$0xff] }
 0x245   :  { %3463 = vmatpush.bf16.msra.mxu0 %v4751_v27  ;;  %v6655_v49 = vpop.permute.xlu0 %2924 }
 0x246   :  { %4286 = vmatmul.msk.bf16.gmra.mxu2 %vm550_vm2, %v1053_v3  ;;  %4874 = vset.pattern.permute.xlu0 %v7996_v38  ;;  %v4316_v3 = vsel %vm1381_vm0, 1.0, %v7987_v59 }
 0x247   :  { %2981 = vperm.xlu0 %4874, %v6242_v50   ;;  %v1464_v36 = vpack.c.bf16 %v4317_v29, %v4316_v3 }
 0x248   :  { %v6642_v28 = vpop.permute.xlu1 %2906 }
 0x249   :  { %v1167_v63 = vpop.f32.mrf.mxu2  ;;  %4425 = vmatmul.msk.bf16.gmra.mxu0 %vm550_vm2, %v1868_v53 }
 0x24a   :  { %v1235_v34 = vadd.f32 %v1167_v63, %v790_v0  ;;  %4835 = vset.pattern.permute.xlu1 %v7995_v11 }
 0x24b   :  { %2532 = vperm.xlu1 %4835, %v5993_v47   ;;  %v8027_v47 = vld [vmem:[#allocation12_spill] sm:$0xff] }
 0x24c   :  { %v1579_v56 = vpop.f32.mrf.mxu3  ;;  %4836 = vset.pattern.permute.xlu2 %v7995_v11  ;;  %v6653_v6 = vadd.f32 %v1577_v23, %v1235_v34  ;;  %vm972_vm1 = vcmp.eq.s32.totalorder %v8027_v47, %v5400_v45  ;;  %v8028_v23 = vld [vmem:[#allocation8_spill] sm:$0xff]  ;;  %v5048_v47 = vld [vmem:[%s7946_s0 + $0x70] sm:$0xff] }
 0x24d   :  { %2535 = vperm.xlu2 %4836, %v5047_v8   ;;  %v6666_v15 = vpop.permute.xlu2 %2095  ;;  %vm971_vm4 = vcmp.eq.s32.totalorder %v8028_v23, %v5400_v45  ;;  %v4245_v0 = vsel %vm972_vm1, 1.0, %v7987_v59  ;;  %v4379_v23 = vsel %vm1782_vm7, 1.0, %v7987_v59 }
 0x24e   :  { %v4244_v51 = vsel %vm971_vm4, 1.0, %v7987_v59  ;;  %vm2180_vm12 = vcmp.eq.s32.totalorder %v6666_v15, %v5400_v45 }
 0x24f   :  { %v1967_v53 = vpop.f32.mrf.mxu0  ;;  %v1054_v18 = vpack.c.bf16 %v4245_v0, %v4244_v51  ;;  %v1725_v0 = vpop.permute.xlu0 %1724 }
 0x250   :  { %v6677_v61 = vadd.f32 %v1967_v53, %v6429_v52  ;;  %v4378_v52 = vsel %vm1781_vm5, 1.0, %v7987_v59  ;;  %vm1783_vm13 = vcmp.eq.s32.totalorder %v1725_v0, %v5400_v45 }
 0x251   :  { %4359 = vmatmul.msk.bf16.gmra.mxu3 %vm550_vm2, %v1464_v36  ;;  %v2090_v50 = vpop.permute.xlu1 %2089  ;;  %v1169_v63 = vpop.f32.mrf.mxu2  ;;  %v1869_v53 = vpack.c.bf16 %v4379_v23, %v4378_v52 }
 0x252   :  { %vm2178_vm6 = vcmp.eq.s32.totalorder %v2090_v50, %v5400_v45  ;;  %v1236_v34 = vadd.f32 %v1169_v63, %v792_v17  ;;  %v796_v36 = vpop.f32.mrf.mxu1  ;;  %v8030_v63 = vld [vmem:[#allocation44_spill] sm:$0xff] }
 0x253   :  { %v4437_v27 = vsel %vm2178_vm6, 1.0, %v7987_v59  ;;  %4837 = vset.pattern.permute.xlu1 %v7996_v38  ;;  %vm1383_vm8 = vcmp.eq.s32.totalorder %v8030_v63, %v5400_v45 }
 0x254   :  { %v2272_v58 = vpack.c.bf16 %v4437_v27, %v4436_v9  ;;  %v1582_v29 = vpop.f32.mrf.mxu3  ;;  %2942 = vperm.xlu1 %4837, %v5048_v47   ;;  %v6690_v3 = vadd.f32 %v1579_v56, %v1236_v34  ;;  %v6701_v9 = vld [vmem:[%s7946_s0 + $0xe0] sm:$0xff]  ;;  %v795_v56 = vadd.f32 %v794_v57, %v6466_v37  ;;  %v4318_v52 = vsel %vm1383_vm8, 1.0, %v7987_v59 }
 0x255   :  { %4838 = vset.pattern.permute.xlu2 %v7996_v38  ;;  %2984 = vperm.xlu0 %4874, %v6701_v9  }
 0x256   :  { %4287 = vmatmul.msk.bf16.gmra.mxu2 %vm550_vm2, %v1054_v18  ;;  %4491 = vmatmul.msk.bf16.gmra.mxu1 %vm550_vm2, %v2272_v58  ;;  %v6696_v17 = vpop.permute.xlu2 %2918  ;;  %v8031_v18 = vld [vmem:[#allocation36_spill] sm:$0xff] }
 0x257   :  { %2945 = vperm.xlu2 %4838, %v5047_v8   ;;  %v1969_v50 = vpop.f32.mrf.mxu0  ;;  %vm1384_vm9 = vcmp.eq.s32.totalorder %v8031_v18, %v5400_v45  ;;  %v6740_v63 = vpop.permute.xlu0 %1733 }
 0x258   :  { %v6708_v34 = vadd.f32 %v1969_v50, %v6463_v12  ;;  %v8032_v12 = vld [vmem:[#allocation17_spill] sm:$0xff]  ;;  %v4319_v57 = vsel %vm1384_vm9, 1.0, %v7987_v59  ;;  %vm1786_vm5 = vcmp.eq.s32.totalorder %v6740_v63, %v5400_v45  ;;  %v8039_v63 = vld [vmem:[#allocation56_spill] sm:$0xff]  ;;  %vm2996_vm9 = vcmp.eq.s32.totalorder %v6584_v40, %v5400_v45 }
 0x259   :  { %v1172_v51 = vpop.f32.mrf.mxu2  ;;  %4426 = vmatmul.msk.bf16.gmra.mxu0 %vm550_vm2, %v1869_v53  ;;  %vm973_vm10 = vcmp.eq.s32.totalorder %v8032_v12, %v5400_v45  ;;  %v1465_v47 = vpack.c.bf16 %v4319_v57, %v4318_v52  ;;  %v8033_v53 = vld [vmem:[#allocation9_spill] sm:$0xff]  ;;  %v4380_v52 = vsel %vm1783_vm13, 1.0, %v7987_v59  ;;  %vm1785_vm7 = vcmp.eq.s32.totalorder %v8039_v63, %v5400_v45 }
 0x25a   :  { %v1237_v21 = vadd.f32 %v1172_v51, %v795_v56  ;;  %v6711_v27 = vpop.permute.xlu1 %2912  ;;  %vm974_vm11 = vcmp.eq.s32.totalorder %v8033_v53, %v5400_v45  ;;  %v799_v56 = vpop.f32.mrf.mxu1  ;;  %v4246_v50 = vsel %vm973_vm10, 1.0, %v7987_v59  ;;  %vm2995_vm10 = vcmp.eq.s32.totalorder %v6468_v20, %v5400_v45 }
 0x25b   :  { %v4247_v15 = vsel %vm974_vm11, 1.0, %v7987_v59  ;;  %vm2585_vm11 = vcmp.eq.s32.totalorder %v6524_v13, %v5400_v45 }
 0x25c   :  { %v1584_v58 = vpop.f32.mrf.mxu3  ;;  %4840 = vset.pattern.permute.xlu1 %v8002_v30  ;;  %v6717_v37 = vadd.f32 %v1582_v29, %v1237_v21  ;;  %v797_v29 = vadd.f32 %v796_v36, %v6503_v55  ;;  %v4439_v21 = vsel %vm2180_vm12, 1.0, %v7987_v59  ;;  %v1055_v18 = vpack.c.bf16 %v4247_v15, %v4246_v50 }
 0x25d   :  { %2125 = vperm.xlu1 %4840, %v5047_v8   ;;  %4881 = vset.pattern.permute.xlu0 %v8002_v30  ;;  %v6735_v8 = vld [vmem:[%s7946_s0 + $0xe8] sm:$0xff]  ;;  %vm2586_vm12 = vcmp.eq.s32.totalorder %v6548_v4, %v5400_v45  ;;  %v4506_v13 = vsel %vm2585_vm11, 1.0, %v7987_v59  ;;  %vm2589_vm11 = vcmp.eq.s32.totalorder %v6603_v32, %v5400_v45 }
 0x25e   :  { %2167 = vperm.xlu0 %4881, %v6735_v8   ;;  %v4507_v4 = vsel %vm2586_vm12, 1.0, %v7987_v59 }
 0x25f   :  { %4841 = vset.pattern.permute.xlu2 %v7999_v39  ;;  %v6723_v23 = vpop.permute.xlu2 %2101 }
 0x260   :  { %1754 = vperm.xlu2 %4841, %v6701_v9   ;;  %vm2182_vm6 = vcmp.eq.s32.totalorder %v6723_v23, %v5400_v45 }
 0x261   :  { %4360 = vmatmul.msk.bf16.gmra.mxu3 %vm550_vm2, %v1465_v47  ;;  %v1174_v55 = vpop.f32.mrf.mxu2  ;;  %v4381_v47 = vsel %vm1784_vm14, 1.0, %v7987_v59 }
 0x262   :  { %v1238_v36 = vadd.f32 %v1174_v55, %v797_v29  ;;  %v1870_v29 = vpack.c.bf16 %v4381_v47, %v4380_v52  ;;  %v800_v55 = vadd.f32 %v799_v56, %v6540_v16  ;;  %v4750_v16 = vld [vmem:[#allocation2 + $0x20] sm:$0xff] }
 0x263   :  { %v2093_v51 = vpop.permute.xlu1 %2092  ;;  %v8036_v56 = vld [vmem:[#allocation40_spill] sm:$0xff]  ;;  %3464 = vmatpush.bf16.msra.mxu0 %v4750_v16 }
 0x264   :  { %vm2179_vm15 = vcmp.eq.s32.totalorder %v2093_v51, %v5400_v45  ;;  %v1587_v0 = vpop.f32.mrf.mxu3  ;;  %v6749_v12 = vadd.f32 %v1584_v58, %v1238_v36  ;;  %v8035_v36 = vld [vmem:[#allocation47_spill] sm:$0xff]  ;;  %v5051_v51 = vld [vmem:[%s7946_s0 + $0x80] sm:$0xff]  ;;  %vm1385_vm1 = vcmp.eq.s32.totalorder %v8036_v56, %v5400_v45 }
 0x265   :  { %v4438_v57 = vsel %vm2179_vm15, 1.0, %v7987_v59  ;;  %4842 = vset.pattern.permute.xlu1 %v7999_v39  ;;  %vm1386_vm0 = vcmp.eq.s32.totalorder %v8035_v36, %v5400_v45  ;;  %vm1787_vm15 = vcmp.eq.s32.totalorder %v6488_v35, %v5400_v45 }
 0x266   :  { %8034 = vst [vmem:[#allocation33_spill] sm:$0xff] %v6749_v12  ;;  %v2273_v53 = vpack.c.bf16 %v4439_v21, %v4438_v57  ;;  %1757 = vperm.xlu1 %4842, %v6735_v8   ;;  %4288 = vmatmul.msk.bf16.gmra.mxu2 %vm550_vm2, %v1055_v18  ;;  %v1972_v2 = vpop.f32.mrf.mxu0  ;;  %v6773_v18 = vpop.permute.xlu0 %1742  ;;  %v4321_v52 = vsel %vm1386_vm0, 1.0, %v7987_v59  ;;  %vm1788_vm0 = vcmp.eq.s32.totalorder %v6409_v54, %v5400_v45 }
 0x267   :  { %v6757_v50 = vadd.f32 %v1972_v2, %v6490_v5  ;;  %v801_v5 = vpop.f32.mrf.mxu1  ;;  %2170 = vperm.xlu0 %4881, %v6442_v44   ;;  %v8037_v2 = vld [vmem:[#allocation18_spill] sm:$0xff]  ;;  %v4385_v54 = vsel %vm1788_vm0, 1.0, %v7987_v59  ;;  %vm3002_vm0 = vcmp.eq.s32.totalorder %v6627_v41, %v5400_v45 }
 0x268   :  { %4492 = vmatmul.msk.bf16.gmra.mxu1 %vm550_vm2, %v2273_v53  ;;  %4843 = vset.pattern.permute.xlu2 %v7995_v11  ;;  %v6762_v58 = vpop.permute.xlu2 %2517  ;;  %vm976_vm3 = vcmp.eq.s32.totalorder %v8037_v2, %v5400_v45  ;;  %v802_v16 = vadd.f32 %v801_v5, %v6575_v22  ;;  %v5058_v41 = vld [vmem:[%s7946_s0 + $0xb0] sm:$0xff] }
 0x269   :  { %v1177_v15 = vpop.f32.mrf.mxu2  ;;  %4427 = vmatmul.msk.bf16.gmra.mxu0 %vm550_vm2, %v1870_v29  ;;  %2538 = vperm.xlu2 %4843, %v5051_v51   ;;  %v4320_v29 = vsel %vm1385_vm1, 1.0, %v7987_v59  ;;  %vm2997_vm1 = vcmp.eq.s32.totalorder %v6642_v28, %v5400_v45 }
 0x26a   :  { %v1239_v21 = vadd.f32 %v1177_v15, %v800_v55  ;;  %v1466_v55 = vpack.c.bf16 %v4321_v52, %v4320_v29  ;;  %v8038_v15 = vld [vmem:[#allocation15_spill] sm:$0xff]  ;;  %v4383_v29 = vsel %vm1786_vm5, 1.0, %v7987_v59  ;;  %vm2588_vm5 = vcmp.eq.s32.totalorder %v6538_v33, %v5400_v45 }
 0x26b   :  { %vm975_vm4 = vcmp.eq.s32.totalorder %v8038_v15, %v5400_v45 }
 0x26c   :  { %v1589_v57 = vpop.f32.mrf.mxu3  ;;  %v6776_v47 = vpop.permute.xlu1 %2511  ;;  %v6778_v53 = vadd.f32 %v1587_v0, %v1239_v21  ;;  %v4249_v0 = vsel %vm976_vm3, 1.0, %v7987_v59  ;;  %v4248_v5 = vsel %vm975_vm4, 1.0, %v7987_v59  ;;  %vm2998_vm3 = vcmp.eq.s32.totalorder %v6573_v7, %v5400_v45 }
 0x26d   :  { %v1056_v2 = vpack.c.bf16 %v4249_v0, %v4248_v5  ;;  %v4581_v28 = vsel %vm2998_vm3, 1.0, %v7987_v59  ;;  %vm2587_vm4 = vcmp.eq.s32.totalorder %v6614_v46, %v5400_v45  ;;  %vm2591_vm3 = vcmp.eq.s32.totalorder %v6592_v26, %v5400_v45 }
 0x26e   :  { %4844 = vset.pattern.permute.xlu1 %v7996_v38  ;;  %v1974_v44 = vpop.f32.mrf.mxu0  ;;  %v6807_v23 = vpop.permute.xlu0 %1751 }
 0x26f   :  { %v6785_v36 = vadd.f32 %v1974_v44, %v6522_v14  ;;  %2948 = vperm.xlu1 %4844, %v5051_v51   ;;  %v5052_v14 = vld [vmem:[%s7946_s0 + $0x88] sm:$0xff]  ;;  %4887 = vset.pattern.permute.xlu0 %v7996_v38  ;;  %v804_v52 = vpop.f32.mrf.mxu1 }
 0x271   :  { %4361 = vmatmul.msk.bf16.gmra.mxu3 %vm550_vm2, %v1466_v55  ;;  %v1179_v21 = vpop.f32.mrf.mxu2  ;;  %4845 = vset.pattern.permute.xlu2 %v7996_v38  ;;  %v2105_v22 = vpop.permute.xlu2 %2104 }
 0x272   :  { %v1240_v56 = vadd.f32 %v1179_v21, %v802_v16  ;;  %2951 = vperm.xlu2 %4845, %v5052_v14   ;;  %v4441_v16 = vsel %vm2182_vm6, 1.0, %v7987_v59  ;;  %v4382_v21 = vsel %vm1785_vm7, 1.0, %v7987_v59  ;;  %vm2183_vm13 = vcmp.eq.s32.totalorder %v2105_v22, %v5400_v45 }
 0x273   :  { %v1871_v63 = vpack.c.bf16 %v4383_v29, %v4382_v21  ;;  %v4442_v22 = vsel %vm2183_vm13, 1.0, %v7987_v59  ;;  %v2681_v21 = vpack.c.bf16 %v4507_v4, %v4506_v13  ;;  %vm1789_vm6 = vcmp.eq.s32.totalorder %v6773_v18, %v5400_v45 }
 0x274   :  { %v1592_v44 = vpop.f32.mrf.mxu3  ;;  %v6805_v55 = vadd.f32 %v1589_v57, %v1240_v56  ;;  %v805_v57 = vadd.f32 %v804_v52, %v6612_v25  ;;  %vm1790_vm7 = vcmp.eq.s32.totalorder %v6520_v43, %v5400_v45  ;;  %vm1792_vm13 = vcmp.eq.s32.totalorder %v6807_v23, %v5400_v45 }
 0x275   :  { %v2099_v15 = vpop.permute.xlu1 %2098  ;;  %v4387_v18 = vsel %vm1790_vm7, 1.0, %v7987_v59  ;;  %vm3003_vm7 = vcmp.eq.s32.totalorder %v6655_v49, %v5400_v45 }
 0x276   :  { %8040 = vst [vmem:[#allocation30_spill] sm:$0xff] %v6805_v55  ;;  %vm2181_vm8 = vcmp.eq.s32.totalorder %v2099_v15, %v5400_v45  ;;  %4289 = vmatmul.msk.bf16.gmra.mxu2 %vm550_vm2, %v1056_v2  ;;  %v1977_v12 = vpop.f32.mrf.mxu0  ;;  %v2108_v40 = vpop.permute.xlu0 %2107 }
 0x277   :  { %v4440_v0 = vsel %vm2181_vm8, 1.0, %v7987_v59  ;;  %v6815_v5 = vadd.f32 %v1977_v12, %v6546_v60  ;;  %4846 = vset.pattern.permute.xlu1 %v8002_v30  ;;  %v4579_v60 = vsel %vm2996_vm9, 1.0, %v7987_v59  ;;  %v806_v20 = vpop.f32.mrf.mxu1  ;;  %vm2184_vm14 = vcmp.eq.s32.totalorder %v2108_v40, %v5400_v45 }
 0x278   :  { %v2274_v56 = vpack.c.bf16 %v4441_v16, %v4440_v0  ;;  %2128 = vperm.xlu1 %4846, %v5051_v51   ;;  %v4578_v51 = vsel %vm2995_vm10, 1.0, %v7987_v59  ;;  %v807_v15 = vadd.f32 %v806_v20, %v6640_v62  ;;  %v4443_v35 = vsel %vm2184_vm14, 1.0, %v7987_v59  ;;  %v5054_v0 = vld [vmem:[%s7946_s0 + $0x90] sm:$0xff] }
 0x279   :  { %v1182_v55 = vpop.f32.mrf.mxu2  ;;  %4428 = vmatmul.msk.bf16.gmra.mxu0 %vm550_vm2, %v1871_v63  ;;  %v4384_v16 = vsel %vm1787_vm15, 1.0, %v7987_v59  ;;  %vm2999_vm8 = vcmp.eq.s32.totalorder %v6711_v27, %v5400_v45  ;;  %vm3000_vm9 = vcmp.eq.s32.totalorder %v6633_v1, %v5400_v45  ;;  %v5056_v27 = vld [vmem:[%s7946_s0 + $0xa0] sm:$0xff]  ;;  %vm2590_vm10 = vcmp.eq.s32.totalorder %v6553_v48, %v5400_v45  ;;  %v8048_v48 = vld [vmem:[#allocation19_spill] sm:$0xff] }
 0x27a   :  { %v1241_v2 = vadd.f32 %v1182_v55, %v805_v57  ;;  %4493 = vmatmul.msk.bf16.gmra.mxu1 %vm550_vm2, %v2274_v56  ;;  %4847 = vset.pattern.permute.xlu2 %v8002_v30  ;;  %v6824_v29 = vpop.permute.xlu2 %2523  ;;  %v1872_v40 = vpack.c.bf16 %v4385_v54, %v4384_v16  ;;  %v8043_v54 = vld [vmem:[#allocation22_spill] sm:$0xff]  ;;  %v4511_v32 = vsel %vm2590_vm10, 1.0, %v7987_v59  ;;  %vm1791_vm14 = vcmp.eq.s32.totalorder %v6436_v10, %v5400_v45 }
 0x27b   :  { %2131 = vperm.xlu2 %4847, %v5052_v14   ;;  %v3091_v14 = vpack.c.bf16 %v4579_v60, %v4578_v51 }
 0x27c   :  { %v1594_v25 = vpop.f32.mrf.mxu3  ;;  %v6829_v12 = vadd.f32 %v1592_v44, %v1241_v2  ;;  %v6852_v44 = vld [vmem:[%s7946_s0 + $0xf8] sm:$0xff]  ;;  %v2275_v2 = vpack.c.bf16 %v4443_v35, %v4442_v22 }
 0x27e   :  { %v6836_v52 = vpop.permute.xlu1 %2514  ;;  %v6838_v55 = vpop.f32.mrf.mxu0 }
 0x27f   :  { %vm2593_vm10 = vcmp.eq.s32.totalorder %v6836_v52, %v5400_v45  ;;  %v5060_v52 = vld [vmem:[%s7946_s0 + $0xc0] sm:$0xff] }
 0x280   :  { %4849 = vset.pattern.permute.xlu1 %v7999_v39 }
 0x281   :  { %4634 = vmatmul.msk.bf16.vlgmr.msra.gmra.mxu3 %vm550_vm2, %v3091_v14  ;;  %1763 = vperm.xlu1 %4849, %v6852_v44   ;;  %v1184_v39 = vpop.f32.mrf.mxu2  ;;  %v8041_v14 = vld [vmem:[#allocation20_spill] sm:$0xff] }
 0x282   :  { %v1242_v62 = vadd.f32 %v1184_v39, %v807_v15  ;;  %v8042_v15 = vld [vmem:[#allocation11_spill] sm:$0xff] }
 0x283   :  { %4850 = vset.pattern.permute.xlu2 %v7995_v11  ;;  %v6864_v57 = vpop.permute.xlu2 %2933  ;;  %v810_v13 = vadd.f32 %v8042_v15, %v8041_v14  ;;  %v4749_v39 = vld [vmem:[#allocation2 + $0x18] sm:$0xff]  ;;  %v4508_v14 = vsel %vm2587_vm4, 1.0, %v7987_v59  ;;  %vm2592_vm4 = vcmp.eq.s32.totalorder %v6776_v47, %v5400_v45 }
 0x284   :  { %v1597_v63 = vpop.f32.mrf.mxu3  ;;  %2544 = vperm.xlu2 %4850, %v5054_v0   ;;  %v6866_v56 = vadd.f32 %v1594_v25, %v1242_v62  ;;  %v4580_v62 = vsel %vm2997_vm1, 1.0, %v7987_v59  ;;  %3465 = vmatpush.bf16.msra.mxu0 %v4749_v39  ;;  %vm3001_vm1 = vcmp.eq.s32.totalorder %v6696_v17, %v5400_v45  ;;  %v4513_v26 = vsel %vm2592_vm4, 1.0, %v7987_v59 }
 0x286   :  { %v1982_v60 = vpop.f32.mrf.mxu0  ;;  %4562 = vmatmul.msk.bf16.vlgmr.msra.gmra.mxu2 %vm550_vm2, %v2681_v21  ;;  %v3092_v21 = vpack.c.bf16 %v4581_v28, %v4580_v62 }
 0x287   :  { %v6871_v51 = vadd.f32 %v1982_v60, %v6606_v19  ;;  %v6873_v20 = vpop.permute.xlu1 %2927  ;;  %v5055_v19 = vld [vmem:[%s7946_s0 + $0x98] sm:$0xff] }
 0x289   :  { %4851 = vset.pattern.permute.xlu1 %v7995_v11  ;;  %v1187_v25 = vpop.f32.mrf.mxu2  ;;  %4429 = vmatmul.msk.bf16.gmra.mxu0 %vm550_vm2, %v1872_v40 }
 0x28a   :  { %v1243_v4 = vadd.f32 %v1187_v25, %v810_v13  ;;  %2547 = vperm.xlu1 %4851, %v5055_v19   ;;  %4494 = vmatmul.msk.bf16.gmra.mxu1 %vm550_vm2, %v2275_v2  ;;  %v8044_v2 = vld [vmem:[#allocation13_spill] sm:$0xff]  ;;  %v4386_v13 = vsel %vm1789_vm6, 1.0, %v7987_v59 }
 0x28b   :  { %v812_v60 = vadd.f32 %v8044_v2, %v8043_v54  ;;  %v1873_v28 = vpack.c.bf16 %v4387_v18, %v4386_v13  ;;  %v8046_v54 = vld [vmem:[#allocation16_spill] sm:$0xff]  ;;  %v5057_v13 = vld [vmem:[%s7946_s0 + $0xa8] sm:$0xff]  ;;  %v8047_v18 = vld [vmem:[#allocation26_spill] sm:$0xff] }
 0x28c   :  { %v1599_v22 = vpop.f32.mrf.mxu3  ;;  %4852 = vset.pattern.permute.xlu2 %v7996_v38  ;;  %v6890_v7 = vpop.permute.xlu2 %2526  ;;  %v6892_v35 = vadd.f32 %v1597_v63, %v1243_v4  ;;  %v4509_v63 = vsel %vm2588_vm5, 1.0, %v7987_v59 }
 0x28d   :  { %2954 = vperm.xlu2 %4852, %v5054_v0   ;;  %v2682_v33 = vpack.c.bf16 %v4509_v63, %v4508_v14  ;;  %v4583_v14 = vsel %vm3000_vm9, 1.0, %v7987_v59  ;;  %vm2594_vm9 = vcmp.eq.s32.totalorder %v6762_v58, %v5400_v45 }
 0x28e   :  { %v6898_v16 = vpop.f32.mrf.mxu0 }
 0x290   :  { %v6902_v40 = vpop.permute.xlu1 %2520 }
 0x291   :  { %4635 = vmatmul.msk.bf16.gmra.mxu3 %vm550_vm2, %v3092_v21  ;;  %v1189_v46 = vpop.f32.mrf.mxu2  ;;  %v8045_v21 = vld [vmem:[#allocation24_spill] sm:$0xff] }
 0x292   :  { %v1244_v15 = vadd.f32 %v1189_v46, %v812_v60  ;;  %4854 = vset.pattern.permute.xlu1 %v8002_v30  ;;  %v815_v2 = vadd.f32 %v8046_v54, %v8045_v21  ;;  %v2111_v46 = vpop.permute.xlu0 %2110 }
 0x293   :  { %2134 = vperm.xlu1 %4854, %v5054_v0   ;;  %v4761_v0 = vld [vmem:[#allocation4 + $0x38] sm:$0xff]  ;;  %vm2185_vm12 = vcmp.eq.s32.totalorder %v2111_v46, %v5400_v45 }
 0x294   :  { %v1602_v25 = vpop.f32.mrf.mxu3  ;;  %v6913_v4 = vadd.f32 %v1599_v22, %v1244_v15  ;;  %3666 = vmatpush.bf16.msra.mxu1 %v4761_v0  ;;  %v4444_v21 = vsel %vm2185_vm12, 1.0, %v7987_v59  ;;  %vm3006_vm12 = vcmp.eq.s32.totalorder %v6864_v57, %v5400_v45  ;;  %v4747_v57 = vld [vmem:[#allocation2 + $0x8] sm:$0xff] }
 0x295   :  { %4855 = vset.pattern.permute.xlu2 %v8002_v30  ;;  %v6916_v39 = vpop.permute.xlu2 %2939 }
 0x296   :  { %v1987_v62 = vpop.f32.mrf.mxu0  ;;  %4563 = vmatmul.msk.bf16.gmra.mxu2 %vm550_vm2, %v2682_v33  ;;  %2137 = vperm.xlu2 %4855, %v5055_v19   ;;  %vm3008_vm4 = vcmp.eq.s32.totalorder %v6916_v39, %v5400_v45 }
 0x297   :  { %v6921_v43 = vadd.f32 %v1987_v62, %v6653_v6  ;;  %v4582_v6 = vsel %vm2999_vm8, 1.0, %v7987_v59  ;;  %v817_v62 = vadd.f32 %v8048_v48, %v8047_v18  ;;  %vm3004_vm8 = vcmp.eq.s32.totalorder %v6873_v20, %v5400_v45 }
 0x298   :  { %v3093_v33 = vpack.c.bf16 %v4583_v14, %v4582_v6 }
 0x299   :  { %v6929_v22 = vpop.permute.xlu1 %2930  ;;  %v1192_v60 = vpop.f32.mrf.mxu2  ;;  %4430 = vmatmul.msk.bf16.gmra.mxu0 %vm550_vm2, %v1873_v28  ;;  %v4510_v28 = vsel %vm2589_vm11, 1.0, %v7987_v59 }
 0x29a   :  { %v1245_v19 = vadd.f32 %v1192_v60, %v815_v2  ;;  %v4389_v60 = vsel %vm1792_vm13, 1.0, %v7987_v59  ;;  %vm3005_vm11 = vcmp.eq.s32.totalorder %v6929_v22, %v5400_v45  ;;  %v5061_v22 = vld [vmem:[%s7946_s0 + $0xc8] sm:$0xff] }
 0x29b   :  { %4856 = vset.pattern.permute.xlu1 %v7995_v11 }
 0x29c   :  { %v1604_v63 = vpop.f32.mrf.mxu3  ;;  %2550 = vperm.xlu1 %4856, %v5056_v27   ;;  %v6938_v1 = vadd.f32 %v1602_v25, %v1245_v19  ;;  %v2683_v19 = vpack.c.bf16 %v4511_v32, %v4510_v28  ;;  %v8050_v32 = vld [vmem:[#allocation21_spill] sm:$0xff] }
 0x29e   :  { %v6944_v15 = vpop.f32.mrf.mxu0  ;;  %4857 = vset.pattern.permute.xlu2 %v7995_v11  ;;  %v6951_v25 = vpop.permute.xlu2 %2119 }
 0x29f   :  { %2553 = vperm.xlu2 %4857, %v5057_v13   ;;  %vm2188_vm5 = vcmp.eq.s32.totalorder %v6951_v25, %v5400_v45 }
 0x2a1   :  { %4636 = vmatmul.msk.bf16.gmra.mxu3 %vm550_vm2, %v3093_v33  ;;  %v1194_v0 = vpop.f32.mrf.mxu2  ;;  %v4388_v33 = vsel %vm1791_vm14, 1.0, %v7987_v59  ;;  %vm2595_vm14 = vcmp.eq.s32.totalorder %v6902_v40, %v5400_v45 }
 0x2a2   :  { %v1246_v54 = vadd.f32 %v1194_v0, %v817_v62  ;;  %v2114_v2 = vpop.permute.xlu1 %2113  ;;  %v1874_v10 = vpack.c.bf16 %v4389_v60, %v4388_v33  ;;  %v8049_v62 = vld [vmem:[#allocation27_spill] sm:$0xff]  ;;  %v4748_v0 = vld [vmem:[#allocation2 + $0x10] sm:$0xff]  ;;  %v4512_v33 = vsel %vm2591_vm3, 1.0, %v7987_v59 }
 0x2a3   :  { %vm2186_vm15 = vcmp.eq.s32.totalorder %v2114_v2, %v5400_v45  ;;  %v820_v28 = vadd.f32 %v8050_v32, %v8049_v62  ;;  %v4584_v2 = vsel %vm3001_vm1, 1.0, %v7987_v59  ;;  %3466 = vmatpush.bf16.msra.mxu0 %v4748_v0  ;;  %v2684_v32 = vpack.c.bf16 %v4513_v26, %v4512_v33 }
 0x2a4   :  { %v4445_v6 = vsel %vm2186_vm15, 1.0, %v7987_v59  ;;  %v1607_v23 = vpop.f32.mrf.mxu3  ;;  %4858 = vset.pattern.permute.xlu1 %v7996_v38  ;;  %v6967_v14 = vadd.f32 %v1604_v63, %v1246_v54  ;;  %v4585_v54 = vsel %vm3002_vm0, 1.0, %v7987_v59  ;;  %vm2596_vm15 = vcmp.eq.s32.totalorder %v6824_v29, %v5400_v45 }
 0x2a5   :  { %v2276_v46 = vpack.c.bf16 %v4445_v6, %v4444_v21  ;;  %2963 = vperm.xlu1 %4858, %v5057_v13   ;;  %v8051_v6 = vld [vmem:[#allocation29_spill] sm:$0xff]  ;;  %v4517_v40 = vsel %vm2596_vm15, 1.0, %v7987_v59 }
 0x2a6   :  { %v1992_v18 = vpop.f32.mrf.mxu0  ;;  %4564 = vmatmul.msk.bf16.gmra.mxu2 %vm550_vm2, %v2683_v19  ;;  %v3094_v19 = vpack.c.bf16 %v4585_v54, %v4584_v2 }
 0x2a7   :  { %v6972_v48 = vadd.f32 %v1992_v18, %v6717_v37  ;;  %4495 = vmatmul.msk.bf16.gmra.mxu1 %vm550_vm2, %v2276_v46  ;;  %4859 = vset.pattern.permute.xlu2 %v8002_v30  ;;  %v6983_v13 = vpop.permute.xlu2 %2535  ;;  %v8052_v46 = vld [vmem:[#allocation23_spill] sm:$0xff] }
 0x2a8   :  { %2140 = vperm.xlu2 %4859, %v5056_v27   ;;  %v5059_v18 = vld [vmem:[%s7946_s0 + $0xb8] sm:$0xff]  ;;  %3467 = vmatpush.bf16.msra.mxu0 %v4747_v57 }
 0x2a9   :  { %v1197_v63 = vpop.f32.mrf.mxu2  ;;  %4431 = vmatmul.msk.bf16.gmra.mxu0 %vm550_vm2, %v1874_v10 }
 0x2aa   :  { %v1247_v37 = vadd.f32 %v1197_v63, %v820_v28 }
 0x2ab   :  { %v6985_v21 = vpop.permute.xlu1 %2936 }
 0x2ac   :  { %v1609_v27 = vpop.f32.mrf.mxu3  ;;  %v6989_v60 = vadd.f32 %v1607_v23, %v1247_v37  ;;  %v822_v23 = vadd.f32 %v8052_v46, %v8051_v6  ;;  %v4447_v37 = vsel %vm2188_vm5, 1.0, %v7987_v59  ;;  %v4760_v6 = vld [vmem:[#allocation4 + $0x30] sm:$0xff]  ;;  %v8053_v46 = vld [vmem:[#allocation35_spill] sm:$0xff]  ;;  %vm3007_vm3 = vcmp.eq.s32.totalorder %v6985_v21, %v5400_v45 }
 0x2ad   :  { %4861 = vset.pattern.permute.xlu1 %v7995_v11  ;;  %3667 = vmatpush.bf16.msra.mxu1 %v4760_v6  ;;  %v5062_v21 = vld [vmem:[%s7946_s0 + $0xd8] sm:$0xff]  ;;  %v4590_v39 = vsel %vm3007_vm3, 1.0, %v7987_v59 }
 0x2ae   :  { %2556 = vperm.xlu1 %4861, %v5058_v41   ;;  %v6999_v17 = vpop.f32.mrf.mxu0 }
 0x2b0   :  { %4862 = vset.pattern.permute.xlu2 %v7995_v11 }
 0x2b1   :  { %4637 = vmatmul.msk.bf16.gmra.mxu3 %vm550_vm2, %v3094_v19  ;;  %v1199_v47 = vpop.f32.mrf.mxu2  ;;  %2559 = vperm.xlu2 %4862, %v5059_v18   ;;  %v7012_v62 = vpop.permute.xlu2 %2945 }
 0x2b2   :  { %v1248_v10 = vadd.f32 %v1199_v47, %v822_v23  ;;  %v8054_v23 = vld [vmem:[#allocation25_spill] sm:$0xff]  ;;  %v4587_v47 = vsel %vm3004_vm8, 1.0, %v7987_v59 }
 0x2b3   :  { %v825_v33 = vadd.f32 %v8054_v23, %v8053_v46 }
 0x2b4   :  { %v1612_v28 = vpop.f32.mrf.mxu3  ;;  %v2117_v63 = vpop.permute.xlu1 %2116  ;;  %v7015_v0 = vadd.f32 %v1609_v27, %v1248_v10 }
 0x2b5   :  { %vm2187_vm6 = vcmp.eq.s32.totalorder %v2117_v63, %v5400_v45 }
 0x2b6   :  { %v4446_v54 = vsel %vm2187_vm6, 1.0, %v7987_v59  ;;  %4863 = vset.pattern.permute.xlu1 %v7996_v38  ;;  %v1997_v25 = vpop.f32.mrf.mxu0  ;;  %4565 = vmatmul.msk.bf16.gmra.mxu2 %vm550_vm2, %v2684_v32  ;;  %vm2597_vm6 = vcmp.eq.s32.totalorder %v6890_v7, %v5400_v45 }
 0x2b7   :  { %v2277_v2 = vpack.c.bf16 %v4447_v37, %v4446_v54  ;;  %v7022_v19 = vadd.f32 %v1997_v25, %v6778_v53  ;;  %2966 = vperm.xlu1 %4863, %v5058_v41   ;;  %v4586_v41 = vsel %vm3003_vm7, 1.0, %v7987_v59  ;;  %v8055_v37 = vld [vmem:[#allocation39_spill] sm:$0xff]  ;;  %v8056_v54 = vld [vmem:[#allocation28_spill] sm:$0xff] }
 0x2b8   :  { %v3095_v63 = vpack.c.bf16 %v4587_v47, %v4586_v41  ;;  %v827_v25 = vadd.f32 %v8056_v54, %v8055_v37  ;;  %v8058_v47 = vld [vmem:[#allocation41_spill] sm:$0xff] }
 0x2b9   :  { %v1202_v27 = vpop.f32.mrf.mxu2  ;;  %4496 = vmatmul.msk.bf16.gmra.mxu1 %vm550_vm2, %v2277_v2  ;;  %4864 = vset.pattern.permute.xlu2 %v7996_v38  ;;  %v4514_v2 = vsel %vm2593_vm10, 1.0, %v7987_v59  ;;  %vm3010_vm10 = vcmp.eq.s32.totalorder %v7012_v62, %v5400_v45 }
 0x2ba   :  { %v1249_v26 = vadd.f32 %v1202_v27, %v825_v33  ;;  %2969 = vperm.xlu2 %4864, %v5059_v18   ;;  %v7032_v53 = vpop.permute.xlu2 %1754 }
 0x2bb   :  { %vm1793_vm1 = vcmp.eq.s32.totalorder %v7032_v53, %v5400_v45 }
 0x2bc   :  { %v1614_v10 = vpop.f32.mrf.mxu3  ;;  %v7036_v32 = vadd.f32 %v1612_v28, %v1249_v26  ;;  %v4515_v28 = vsel %vm2594_vm9, 1.0, %v7987_v59  ;;  %v4390_v53 = vsel %vm1793_vm1, 1.0, %v7987_v59 }
 0x2bd   :  { %v7038_v49 = vpop.permute.xlu1 %2532  ;;  %v2685_v46 = vpack.c.bf16 %v4515_v28, %v4514_v2  ;;  %v4589_v28 = vsel %vm3006_vm12, 1.0, %v7987_v59 }
 0x2be   :  { %v7044_v20 = vpop.f32.mrf.mxu0  ;;  %vm2599_vm12 = vcmp.eq.s32.totalorder %v7038_v49, %v5400_v45 }
 0x2bf   :  { %4865 = vset.pattern.permute.xlu1 %v8002_v30  ;;  %v4520_v49 = vsel %vm2599_vm12, 1.0, %v7987_v59 }
 0x2c0   :  { %2149 = vperm.xlu1 %4865, %v5059_v18  }
 0x2c1   :  { %4638 = vmatmul.msk.bf16.gmra.mxu3 %vm550_vm2, %v3095_v63  ;;  %v1204_v6 = vpop.f32.mrf.mxu2  ;;  %v8059_v63 = vld [vmem:[#allocation34_spill] sm:$0xff] }
 0x2c2   :  { %v1250_v58 = vadd.f32 %v1204_v6, %v827_v25  ;;  %4866 = vset.pattern.permute.xlu2 %v7995_v11  ;;  %v830_v37 = vadd.f32 %v8059_v63, %v8058_v47  ;;  %v2123_v25 = vpop.permute.xlu0 %2122  ;;  %v8060_v63 = vld [vmem:[#allocation43_spill] sm:$0xff] }
 0x2c3   :  { %2562 = vperm.xlu2 %4866, %v5060_v52   ;;  %v7058_v18 = vpop.permute.xlu2 %2538  ;;  %vm2189_vm13 = vcmp.eq.s32.totalorder %v2123_v25, %v5400_v45 }
 0x2c4   :  { %v1617_v23 = vpop.f32.mrf.mxu3  ;;  %v7056_v33 = vadd.f32 %v1614_v10, %v1250_v58  ;;  %vm2601_vm3 = vcmp.eq.s32.totalorder %v7058_v18, %v5400_v45 }
 0x2c6   :  { %8057 = vst [vmem:[#allocation14_spill] sm:$0xff] %v7056_v33  ;;  %v7060_v27 = vpop.permute.xlu1 %2942  ;;  %v2002_v26 = vpop.f32.mrf.mxu0  ;;  %4566 = vmatmul.msk.bf16.gmra.mxu2 %vm550_vm2, %v2685_v46 }
 0x2c7   :  { %v7064_v41 = vadd.f32 %v2002_v26, %v6829_v12  ;;  %v4588_v12 = vsel %vm3005_vm11, 1.0, %v7987_v59  ;;  %v4448_v26 = vsel %vm2189_vm13, 1.0, %v7987_v59  ;;  %vm3009_vm9 = vcmp.eq.s32.totalorder %v7060_v27, %v5400_v45 }
 0x2c8   :  { %4868 = vset.pattern.permute.xlu1 %v7996_v38  ;;  %v3096_v46 = vpack.c.bf16 %v4589_v28, %v4588_v12  ;;  %vm2600_vm13 = vcmp.eq.s32.totalorder %v6983_v13, %v5400_v45 }
 0x2c9   :  { %2972 = vperm.xlu1 %4868, %v5060_v52   ;;  %v1207_v10 = vpop.f32.mrf.mxu2 }
 0x2ca   :  { %v1251_v54 = vadd.f32 %v1207_v10, %v830_v37  ;;  %v8061_v37 = vld [vmem:[#allocation38_spill] sm:$0xff] }
 0x2cb   :  { %4869 = vset.pattern.permute.xlu2 %v7996_v38  ;;  %v832_v10 = vadd.f32 %v8061_v37, %v8060_v63 }
 0x2cc   :  { %v1619_v2 = vpop.f32.mrf.mxu3  ;;  %2975 = vperm.xlu2 %4869, %v5061_v22   ;;  %v7080_v6 = vadd.f32 %v1617_v23, %v1251_v54  ;;  %v7092_v23 = vpop.permute.xlu2 %2951  ;;  %v4516_v54 = vsel %vm2595_vm14, 1.0, %v7987_v59 }
 0x2cd   :  { %v2686_v57 = vpack.c.bf16 %v4517_v40, %v4516_v54  ;;  %vm3012_vm1 = vcmp.eq.s32.totalorder %v7092_v23, %v5400_v45 }
 0x2ce   :  { %v7086_v58 = vpop.f32.mrf.mxu0 }
 0x2cf   :  { %v2126_v47 = vpop.permute.xlu1 %2125 }
 0x2d0   :  { %vm2190_vm0 = vcmp.eq.s32.totalorder %v2126_v47, %v5400_v45 }
 0x2d1   :  { %v4449_v29 = vsel %vm2190_vm0, 1.0, %v7987_v59  ;;  %4639 = vmatmul.msk.bf16.gmra.mxu3 %vm550_vm2, %v3096_v46  ;;  %4870 = vset.pattern.permute.xlu1 %v8002_v30  ;;  %v1209_v25 = vpop.f32.mrf.mxu2 }
 0x2d2   :  { %v2278_v12 = vpack.c.bf16 %v4449_v29, %v4448_v26  ;;  %v1252_v28 = vadd.f32 %v1209_v25, %v832_v10  ;;  %2152 = vperm.xlu1 %4870, %v5060_v52   ;;  %v4759_v26 = vld [vmem:[#allocation4 + $0x28] sm:$0xff]  ;;  %v8063_v52 = vld [vmem:[#allocation46_spill] sm:$0xff]  ;;  %v2530_v25 = vpop.permute.xlu0 %2529 }
 0x2d3   :  { %v8064_v10 = vld [vmem:[#allocation42_spill] sm:$0xff]  ;;  %3668 = vmatpush.bf16.msra.mxu1 %v4759_v26  ;;  %vm2598_vm7 = vcmp.eq.s32.totalorder %v2530_v25, %v5400_v45 }
 0x2d4   :  { %v1622_v63 = vpop.f32.mrf.mxu3  ;;  %4497 = vmatmul.msk.bf16.gmra.mxu1 %vm550_vm2, %v2278_v12  ;;  %4871 = vset.pattern.permute.xlu2 %v8002_v30  ;;  %v7101_v47 = vadd.f32 %v1619_v2, %v1252_v28  ;;  %v835_v54 = vadd.f32 %v8064_v10, %v8063_v52  ;;  %v4591_v28 = vsel %vm3008_vm4, 1.0, %v7987_v59  ;;  %v5063_v52 = vld [vmem:[%s7946_s0 + $0xd0] sm:$0xff] }
 0x2d5   :  { %2155 = vperm.xlu2 %4871, %v5061_v22   ;;  %v2132_v29 = vpop.permute.xlu2 %2131  ;;  %v3097_v10 = vpack.c.bf16 %v4591_v28, %v4590_v39 }
 0x2d6   :  { %8062 = vst [vmem:[#allocation10_spill] sm:$0xff] %v7101_v47  ;;  %v2007_v37 = vpop.f32.mrf.mxu0  ;;  %4567 = vmatmul.msk.bf16.gmra.mxu2 %vm550_vm2, %v2686_v57  ;;  %vm2192_vm8 = vcmp.eq.s32.totalorder %v2132_v29, %v5400_v45  ;;  %v4592_v29 = vsel %vm3009_vm9, 1.0, %v7987_v59 }
 0x2d7   :  { %v7107_v46 = vadd.f32 %v2007_v37, %v6892_v35 }
 0x2d8   :  { %v1758_v40 = vpop.permute.xlu1 %1757 }
 0x2d9   :  { %vm1794_vm5 = vcmp.eq.s32.totalorder %v1758_v40, %v5400_v45  ;;  %v1212_v2 = vpop.f32.mrf.mxu2 }
 0x2da   :  { %v4391_v35 = vsel %vm1794_vm5, 1.0, %v7987_v59  ;;  %v1253_v22 = vadd.f32 %v1212_v2, %v835_v54  ;;  %4872 = vset.pattern.permute.xlu1 %v7995_v11  ;;  %v8065_v54 = vld [vmem:[#allocation49_spill] sm:$0xff]  ;;  %v4518_v2 = vsel %vm2597_vm6, 1.0, %v7987_v59  ;;  %v7148_v28 = vpop.permute.xlu0 %2541 }
 0x2db   :  { %v1875_v12 = vpack.c.bf16 %v4391_v35, %v4390_v53  ;;  %2571 = vperm.xlu1 %4872, %v5062_v21   ;;  %v4519_v53 = vsel %vm2598_vm7, 1.0, %v7987_v59  ;;  %vm2602_vm4 = vcmp.eq.s32.totalorder %v7148_v28, %v5400_v45 }
 0x2dc   :  { %v1624_v57 = vpop.f32.mrf.mxu3  ;;  %v7124_v37 = vadd.f32 %v1622_v63, %v1253_v22  ;;  %v8066_v63 = vld [vmem:[#allocation45_spill] sm:$0xff] }
 0x2dd   :  { %4432 = vmatmul.msk.bf16.gmra.mxu0 %vm550_vm2, %v1875_v12  ;;  %4873 = vset.pattern.permute.xlu2 %v7996_v38  ;;  %v837_v40 = vadd.f32 %v8066_v63, %v8065_v54  ;;  %v2687_v12 = vpack.c.bf16 %v4519_v53, %v4518_v2  ;;  %v8068_v63 = vld [vmem:[#allocation51_spill] sm:$0xff]  ;;  %v7158_v53 = vpop.f32.mrf.mxu1 }
 0x2de   :  { %v7131_v26 = vpop.f32.mrf.mxu0  ;;  %2978 = vperm.xlu2 %4873, %v5063_v52   ;;  %v7143_v25 = vpop.permute.xlu2 %2544 }
 0x2e1   :  { %4640 = vmatmul.msk.bf16.gmra.mxu3 %vm550_vm2, %v3097_v10  ;;  %v7141_v7 = vpop.permute.xlu1 %2948  ;;  %v1214_v35 = vpop.f32.mrf.mxu2 }
 0x2e2   :  { %v1254_v22 = vadd.f32 %v1214_v35, %v837_v40  ;;  %v8069_v40 = vld [vmem:[#allocation48_spill] sm:$0xff]  ;;  %vm3011_vm0 = vcmp.eq.s32.totalorder %v7141_v7, %v5400_v45  ;;  %v5064_v7 = vld [vmem:[%s7946_s0 + $0xf0] sm:$0xff] }
 0x2e3   :  { %4875 = vset.pattern.permute.xlu1 %v8002_v30  ;;  %v840_v2 = vadd.f32 %v8069_v40, %v8068_v63  ;;  %v1761_v63 = vpop.permute.xlu0 %1760 }
 0x2e4   :  { %v1627_v47 = vpop.f32.mrf.mxu3  ;;  %2158 = vperm.xlu1 %4875, %v5063_v52   ;;  %v7146_v39 = vadd.f32 %v1624_v57, %v1254_v22  ;;  %vm1795_vm14 = vcmp.eq.s32.totalorder %v1761_v63, %v5400_v45 }
 0x2e6   :  { %8067 = vst [vmem:[#allocation31_spill] sm:$0xff] %v7146_v39  ;;  %v2012_v54 = vpop.f32.mrf.mxu0  ;;  %4568 = vmatmul.msk.bf16.gmra.mxu2 %vm550_vm2, %v2687_v12  ;;  %4876 = vset.pattern.permute.xlu2 %v8002_v30 }
 0x2e7   :  { %v7153_v10 = vadd.f32 %v2012_v54, %v6938_v1  ;;  %2161 = vperm.xlu2 %4876, %v5062_v21   ;;  %v4451_v1 = vsel %vm2192_vm8, 1.0, %v7987_v59  ;;  %v4593_v21 = vsel %vm3010_vm10, 1.0, %v7987_v59  ;;  %v7170_v27 = vpop.permute.xlu2 %2954  ;;  %vm2603_vm10 = vcmp.eq.s32.totalorder %v7143_v25, %v5400_v45 }
 0x2e8   :  { %vm3013_vm7 = vcmp.eq.s32.totalorder %v7170_v27, %v5400_v45 }
 0x2e9   :  { %v1217_v57 = vpop.f32.mrf.mxu2 }
 0x2ea   :  { %v1255_v52 = vadd.f32 %v1217_v57, %v840_v2  ;;  %v2129_v35 = vpop.permute.xlu1 %2128  ;;  %v3098_v2 = vpack.c.bf16 %v4593_v21, %v4592_v29  ;;  %v8070_v57 = vld [vmem:[#allocation52_spill] sm:$0xff]  ;;  %v7190_v29 = vpop.f32.mrf.mxu1 }
 0x2eb   :  { %vm2191_vm11 = vcmp.eq.s32.totalorder %v2129_v35, %v5400_v45  ;;  %v4746_v35 = vld [vmem:[#allocation2] sm:$0xff] }
 0x2ec   :  { %v4450_v22 = vsel %vm2191_vm11, 1.0, %v7987_v59  ;;  %v1629_v12 = vpop.f32.mrf.mxu3  ;;  %4877 = vset.pattern.permute.xlu1 %v7995_v11  ;;  %v7172_v54 = vadd.f32 %v1627_v47, %v1255_v52  ;;  %v8071_v47 = vld [vmem:[#allocation50_spill] sm:$0xff]  ;;  %3468 = vmatpush.bf16.msra.mxu0 %v4746_v35 }
 0x2ed   :  { %v2279_v62 = vpack.c.bf16 %v4451_v1, %v4450_v22  ;;  %2574 = vperm.xlu1 %4877, %v6701_v9   ;;  %v842_v52 = vadd.f32 %v8071_v47, %v8070_v57  ;;  %v4521_v1 = vsel %vm2600_vm13, 1.0, %v7987_v59 }
 0x2ee   :  { %v7179_v40 = vpop.f32.mrf.mxu0  ;;  %v2688_v57 = vpack.c.bf16 %v4521_v1, %v4520_v49  ;;  %v8072_v49 = vld [vmem:[#allocation55_spill] sm:$0xff]  ;;  %v8073_v1 = vld [vmem:[#allocation53_spill] sm:$0xff] }
 0x2ef   :  { %4498 = vmatmul.msk.bf16.gmra.mxu1 %vm550_vm2, %v2279_v62  ;;  %4878 = vset.pattern.permute.xlu2 %v7995_v11  ;;  %v4392_v62 = vsel %vm1795_vm14, 1.0, %v7987_v59 }
 0x2f0   :  { %2577 = vperm.xlu2 %4878, %v6735_v8  }
 0x2f1   :  { %4641 = vmatmul.msk.bf16.gmra.mxu3 %vm550_vm2, %v3098_v2  ;;  %v1219_v13 = vpop.f32.mrf.mxu2 }
 0x2f2   :  { %v1256_v21 = vadd.f32 %v1219_v13, %v842_v52  ;;  %v2138_v52 = vpop.permute.xlu2 %2137  ;;  %v845_v13 = vadd.f32 %v8073_v1, %v8072_v49  ;;  %v4523_v1 = vsel %vm2602_vm4, 1.0, %v7987_v59 }
 0x2f3   :  { %v1764_v22 = vpop.permute.xlu1 %1763  ;;  %vm2194_vm5 = vcmp.eq.s32.totalorder %v2138_v52, %v5400_v45 }
 0x2f4   :  { %vm1796_vm15 = vcmp.eq.s32.totalorder %v1764_v22, %v5400_v45  ;;  %v1632_v63 = vpop.f32.mrf.mxu3  ;;  %v7194_v47 = vadd.f32 %v1629_v12, %v1256_v21  ;;  %v4758_v12 = vld [vmem:[#allocation4 + $0x20] sm:$0xff]  ;;  %v2958_v21 = vpop.permute.xlu0 %2957  ;;  %v4594_v22 = vsel %vm3011_vm0, 1.0, %v7987_v59 }
 0x2f5   :  { %v4393_v39 = vsel %vm1796_vm15, 1.0, %v7987_v59  ;;  %4879 = vset.pattern.permute.xlu1 %v7996_v38  ;;  %3669 = vmatpush.bf16.msra.mxu1 %v4758_v12  ;;  %vm3014_vm8 = vcmp.eq.s32.totalorder %v2958_v21, %v5400_v45 }
 0x2f6   :  { %v1876_v33 = vpack.c.bf16 %v4393_v39, %v4392_v62  ;;  %2987 = vperm.xlu1 %4879, %v6735_v8   ;;  %v2017_v2 = vpop.f32.mrf.mxu0  ;;  %4569 = vmatmul.msk.bf16.gmra.mxu2 %vm550_vm2, %v2688_v57  ;;  %v7212_v39 = vpop.f32.mrf.mxu1 }
 0x2f7   :  { %v7201_v35 = vadd.f32 %v2017_v2, %v6989_v60 }
 0x2f8   :  { %4433 = vmatmul.msk.bf16.gmra.mxu0 %vm550_vm2, %v1876_v33  ;;  %4880 = vset.pattern.permute.xlu2 %v8002_v30  ;;  %v4595_v33 = vsel %vm3012_vm1, 1.0, %v7987_v59 }
 0x2f9   :  { %v1222_v8 = vpop.f32.mrf.mxu2  ;;  %2164 = vperm.xlu2 %4880, %v6701_v9   ;;  %v3099_v23 = vpack.c.bf16 %v4595_v33, %v4594_v22 }
 0x2fa   :  { %v1257_v60 = vadd.f32 %v1222_v8, %v845_v13  ;;  %v7228_v49 = vpop.permute.xlu2 %2553 }
 0x2fb   :  { %vm2606_vm15 = vcmp.eq.s32.totalorder %v7228_v49, %v5400_v45 }
 0x2fc   :  { %v1634_v62 = vpop.f32.mrf.mxu3  ;;  %v2548_v57 = vpop.permute.xlu1 %2547  ;;  %v7216_v2 = vadd.f32 %v1632_v63, %v1257_v60  ;;  %v4522_v63 = vsel %vm2601_vm3, 1.0, %v7987_v59 }
 0x2fd   :  { %v7237_v13 = vpop.permute.xlu0 %2960  ;;  %v2689_v60 = vpack.c.bf16 %v4523_v1, %v4522_v63  ;;  %v2457_v63 = vadd.f32 %v7158_v53, %v6677_v61  ;;  %vm2604_vm9 = vcmp.eq.s32.totalorder %v2548_v57, %v5400_v45  ;;  %v2458_v53 = vadd.f32 %v7190_v29, %v6708_v34 }
 0x2fe   :  { %4882 = vset.pattern.permute.xlu1 %v7995_v11  ;;  %v7223_v9 = vpop.f32.mrf.mxu0  ;;  %v7239_v8 = vpop.f32.mrf.mxu1  ;;  %v4525_v57 = vsel %vm2604_vm9, 1.0, %v7987_v59  ;;  %vm3015_vm13 = vcmp.eq.s32.totalorder %v7237_v13, %v5400_v45 }
 0x2ff   :  { %2580 = vperm.xlu1 %4882, %v5064_v7  }
 0x301   :  { %4642 = vmatmul.msk.bf16.gmra.mxu3 %vm550_vm2, %v3099_v23  ;;  %v1224_v18 = vpop.f32.mrf.mxu2  ;;  %4883 = vset.pattern.permute.xlu2 %v7995_v11  ;;  %v4453_v23 = vsel %vm2194_vm5, 1.0, %v7987_v59 }
 0x302   :  { %v1258_v28 = vadd.f32 %v1224_v18, %v6396_v42  ;;  %2583 = vperm.xlu2 %4883, %v6852_v44   ;;  %v2141_v1 = vpop.permute.xlu2 %2140 }
 0x303   :  { %vm2195_vm11 = vcmp.eq.s32.totalorder %v2141_v1, %v5400_v45 }
 0x304   :  { %v3197_v12 = vpop.f32.mrf.mxu3  ;;  %v7241_v22 = vadd.f32 %v1634_v62, %v1258_v28  ;;  %v4597_v28 = vsel %vm3014_vm8, 1.0, %v7987_v59 }
 0x305   :  { %v2135_v33 = vpop.permute.xlu1 %2134  ;;  %v2144_v21 = vpop.permute.xlu0 %2143 }
 0x306   :  { %8074 = vst [vmem:[#allocation37_spill] sm:$0xff] %v7241_v22  ;;  %vm2193_vm6 = vcmp.eq.s32.totalorder %v2135_v33, %v5400_v45  ;;  %v2022_v11 = vpop.f32.mrf.mxu0  ;;  %4570 = vmatmul.msk.bf16.gmra.mxu2 %vm550_vm2, %v2689_v60  ;;  %vm2196_vm12 = vcmp.eq.s32.totalorder %v2144_v21, %v5400_v45 }
 0x307   :  { %v4452_v42 = vsel %vm2193_vm6, 1.0, %v7987_v59  ;;  %v7248_v52 = vadd.f32 %v2022_v11, %v7036_v32  ;;  %4884 = vset.pattern.permute.xlu1 %v7996_v38  ;;  %v7259_v32 = vpop.f32.mrf.mxu1  ;;  %v7273_v11 = vld [vmem:[%s7948_s2] ss:$0 sm:$0xff] }
 0x308   :  { %v2280_v18 = vpack.c.bf16 %v4453_v23, %v4452_v42  ;;  %2990 = vperm.xlu1 %4884, %v5064_v7   ;;  %v4596_v7 = vsel %vm3013_vm7, 1.0, %v7987_v59  ;;  %v4454_v42 = vsel %vm2195_vm11, 1.0, %v7987_v59 }
 0x309   :  { %v2787_v62 = vpop.f32.mrf.mxu2 }
 0x30a   :  { %4499 = vmatmul.msk.bf16.gmra.mxu1 %vm550_vm2, %v2280_v18  ;;  %4885 = vset.pattern.permute.xlu2 %v7996_v38  ;;  %v2867_v27 = vadd.f32 %v2787_v62, %v2457_v63  ;;  %v3100_v38 = vpack.c.bf16 %v4597_v28, %v4596_v7 }
 0x30b   :  { %2993 = vperm.xlu2 %4885, %v6852_v44   ;;  %v7281_v29 = vpop.permute.xlu2 %2559 }
 0x30c   :  { %v3199_v60 = vpop.f32.mrf.mxu3  ;;  %v3277_v23 = vadd.f32 %v3197_v12, %v2867_v27  ;;  %v4524_v12 = vsel %vm2603_vm10, 1.0, %v7987_v59  ;;  %vm2608_vm5 = vcmp.eq.s32.totalorder %v7281_v29, %v5400_v45 }
 0x30d   :  { %v2690_v18 = vpack.c.bf16 %v4525_v57, %v4524_v12 }
 0x30e   :  { %v2551_v33 = vpop.permute.xlu1 %2550  ;;  %v7264_v61 = vpop.f32.mrf.mxu0  ;;  %v3313_v62 = vadd.f32 %v7273_v11, %v3277_v23  ;;  %v2459_v23 = vadd.f32 %v7212_v39, %v6757_v50  ;;  %v2460_v39 = vadd.f32 %v7239_v8, %v6785_v36 }
 0x30f   :  { %v7287_v7 = vpop.f32.mrf.mxu1  ;;  %vm2605_vm0 = vcmp.eq.s32.totalorder %v2551_v33, %v5400_v45 }
 0x310   :  { %4886 = vset.pattern.permute.xlu1 %v8002_v30  ;;  %v4455_v30 = vsel %vm2196_vm12, 1.0, %v7987_v59 }
 0x311   :  { %4643 = vmatmul.msk.bf16.gmra.mxu3 %vm550_vm2, %v3100_v38  ;;  %2173 = vperm.xlu1 %4886, %v6852_v44   ;;  %v2789_v34 = vpop.f32.mrf.mxu2  ;;  %v2281_v44 = vpack.c.bf16 %v4455_v30, %v4454_v42  ;;  %v4757_v38 = vld [vmem:[#allocation4 + $0x18] sm:$0xff] }
 0x312   :  { %v2868_v25 = vadd.f32 %v2789_v34, %v2458_v53  ;;  %v3345_v34 = vmax.f32 %v3313_v62, 0.0  ;;  %3670 = vmatpush.bf16.msra.mxu1 %v4757_v38 }
 0x314   :  { %v3278_v63 = vadd.f32 %v3199_v60, %v2868_v25  ;;  %v3202_v1 = vpop.f32.mrf.mxu3  ;;  %v2970_v30 = vpop.permute.xlu2 %2969 }
 0x315   :  { %vm3018_vm1 = vcmp.eq.s32.totalorder %v2970_v30, %v5400_v45 }
 0x316   :  { %v3314_v28 = vadd.f32 %v7273_v11, %v3278_v63  ;;  %v2027_v27 = vpop.f32.mrf.mxu0  ;;  %4571 = vmatmul.msk.bf16.gmra.mxu2 %vm550_vm2, %v2690_v18  ;;  %v4527_v63 = vsel %vm2606_vm15, 1.0, %v7987_v59 }
 0x317   :  { %v7292_v21 = vadd.f32 %v2027_v27, %v7080_v6  ;;  %v2964_v53 = vpop.permute.xlu1 %2963  ;;  %v4598_v6 = vsel %vm3015_vm13, 1.0, %v7987_v59  ;;  %v7302_v18 = vpop.f32.mrf.mxu1 }
 0x318   :  { %v3346_v22 = vmax.f32 %v3314_v28, 0.0  ;;  %vm3016_vm14 = vcmp.eq.s32.totalorder %v2964_v53, %v5400_v45  ;;  %v4526_v28 = vsel %vm2605_vm0, 1.0, %v7987_v59 }
 0x319   :  { %v2792_v60 = vpop.f32.mrf.mxu2  ;;  %v4599_v25 = vsel %vm3016_vm14, 1.0, %v7987_v59  ;;  %v2691_v53 = vpack.c.bf16 %v4527_v63, %v4526_v28  ;;  %v2052_v28 = vadd.f32 %v6838_v55, %v6582_v24 }
 0x31a   :  { %v3377_v57 = vpack.c.bf16 %v3346_v22, %v3345_v34  ;;  %4500 = vmatmul.msk.bf16.gmra.mxu1 %vm550_vm2, %v2281_v44  ;;  %v2869_v12 = vadd.f32 %v2792_v60, %v2459_v23  ;;  %v3101_v50 = vpack.c.bf16 %v4599_v25, %v4598_v6 }
 0x31c   :  { %v3204_v42 = vpop.f32.mrf.mxu3  ;;  %3469 = vmatmul.bf16.vlgmr.msra.gmra.mxu0 %v3377_v57  ;;  %v3279_v22 = vadd.f32 %v3202_v1, %v2869_v12  ;;  %v2147_v1 = vpop.permute.xlu0 %2146 }
 0x31d   :  { %v7315_v34 = vpop.permute.xlu2 %2562  ;;  %vm2197_vm6 = vcmp.eq.s32.totalorder %v2147_v1, %v5400_v45 }
 0x31e   :  { %v7307_v13 = vpop.f32.mrf.mxu0  ;;  %v3315_v49 = vadd.f32 %v7273_v11, %v3279_v22  ;;  %vm2609_vm10 = vcmp.eq.s32.totalorder %v7315_v34, %v5400_v45 }
 0x31f   :  { %v7322_v23 = vpop.f32.mrf.mxu1 }
 0x320   :  { %v2557_v62 = vpop.permute.xlu1 %2556  ;;  %v3347_v57 = vmax.f32 %v3315_v49, 0.0 }
 0x321   :  { %4644 = vmatmul.msk.bf16.gmra.mxu3 %vm550_vm2, %v3101_v50  ;;  %v2794_v44 = vpop.f32.mrf.mxu2  ;;  %vm2607_vm4 = vcmp.eq.s32.totalorder %v2557_v62, %v5400_v45  ;;  %v4456_v62 = vsel %vm2197_vm6, 1.0, %v7987_v59 }
 0x322   :  { %v2870_v27 = vadd.f32 %v2794_v44, %v2460_v39 }
 0x324   :  { %v3280_v33 = vadd.f32 %v3204_v42, %v2870_v27  ;;  %v3207_v38 = vpop.f32.mrf.mxu3  ;;  %v2461_v42 = vadd.f32 %v7259_v32, %v6815_v5  ;;  %v2462_v32 = vadd.f32 %v7287_v7, %v2052_v28  ;;  %v4528_v27 = vsel %vm2607_vm4, 1.0, %v7987_v59  ;;  %v2566_v24 = vpop.permute.xlu0 %2565 }
 0x325   :  { %vm2610_vm11 = vcmp.eq.s32.totalorder %v2566_v24, %v5400_v45 }
 0x326   :  { %v3316_v60 = vadd.f32 %v7273_v11, %v3280_v33  ;;  %v2032_v36 = vpop.f32.mrf.mxu0  ;;  %4572 = vmatmul.msk.bf16.gmra.mxu2 %vm550_vm2, %v2691_v53  ;;  %v2976_v30 = vpop.permute.xlu2 %2975  ;;  %v4529_v53 = vsel %vm2608_vm5, 1.0, %v7987_v59 }
 0x327   :  { %v7320_v8 = vadd.f32 %v2032_v36, %v7124_v37  ;;  %v4601_v37 = vsel %vm3018_vm1, 1.0, %v7987_v59  ;;  %v2397_v29 = vpop.f32.mrf.mxu1  ;;  %vm3020_vm8 = vcmp.eq.s32.totalorder %v2976_v30, %v5400_v45 }
 0x328   :  { %v3348_v6 = vmax.f32 %v3316_v60, 0.0  ;;  %v2692_v60 = vpack.c.bf16 %v4529_v53, %v4528_v27  ;;  %v2054_v53 = vadd.f32 %v6898_v16, %v6635_v31 }
 0x329   :  { %v2967_v25 = vpop.permute.xlu1 %2966  ;;  %v2797_v12 = vpop.f32.mrf.mxu2 }
 0x32a   :  { %vm3017_vm3 = vcmp.eq.s32.totalorder %v2967_v25, %v5400_v45  ;;  %v3378_v50 = vpack.c.bf16 %v3348_v6, %v3347_v57  ;;  %v2871_v22 = vadd.f32 %v2797_v12, %v2461_v42 }
 0x32b   :  { %v4600_v39 = vsel %vm3017_vm3, 1.0, %v7987_v59 }
 0x32c   :  { %v3209_v63 = vpop.f32.mrf.mxu3  ;;  %3474 = vmatmul.bf16.gmra.mxu0 %v3378_v50  ;;  %v3102_v5 = vpack.c.bf16 %v4601_v37, %v4600_v39  ;;  %v3281_v44 = vadd.f32 %v3207_v38, %v2871_v22  ;;  %v2569_v39 = vpop.permute.xlu0 %2568  ;;  %v4756_v37 = vld [vmem:[#allocation4 + $0x10] sm:$0xff]  ;;  %v2463_v22 = vadd.f32 %v7302_v18, %v6871_v51  ;;  %v2464_v18 = vadd.f32 %v7322_v23, %v2054_v53 }
 0x32d   :  { %3671 = vmatpush.bf16.msra.mxu1 %v4756_v37  ;;  %v2465_v37 = vadd.f32 %v2397_v29, %v6921_v43  ;;  %vm2611_vm0 = vcmp.eq.s32.totalorder %v2569_v39, %v5400_v45 }
 0x32e   :  { %v3317_v36 = vadd.f32 %v7273_v11, %v3281_v44 }
 0x32f   :  { %v2156_v42 = vpop.permute.xlu2 %2155  ;;  %v2399_v27 = vpop.f32.mrf.mxu1 }
 0x330   :  { %v3349_v25 = vmax.f32 %v3317_v36, 0.0  ;;  %vm2200_vm12 = vcmp.eq.s32.totalorder %v2156_v42, %v5400_v45 }
 0x331   :  { %4645 = vmatmul.msk.bf16.gmra.mxu3 %vm550_vm2, %v3102_v5  ;;  %v2799_v49 = vpop.f32.mrf.mxu2  ;;  %v4603_v5 = vsel %vm3020_vm8, 1.0, %v7987_v59  ;;  %v4459_v23 = vsel %vm2200_vm12, 1.0, %v7987_v59 }
 0x332   :  { %v2872_v55 = vadd.f32 %v2799_v49, %v2462_v32  ;;  %v2150_v33 = vpop.permute.xlu1 %2149 }
 0x333   :  { %vm2198_vm7 = vcmp.eq.s32.totalorder %v2150_v33, %v5400_v45 }
 0x334   :  { %v3282_v7 = vadd.f32 %v3209_v63, %v2872_v55  ;;  %v4457_v38 = vsel %vm2198_vm7, 1.0, %v7987_v59  ;;  %v3212_v1 = vpop.f32.mrf.mxu3  ;;  %v4530_v55 = vsel %vm2609_vm10, 1.0, %v7987_v59  ;;  %v2982_v16 = vpop.permute.xlu0 %2981 }
 0x335   :  { %v2282_v57 = vpack.c.bf16 %v4457_v38, %v4456_v62  ;;  %v4531_v62 = vsel %vm2610_vm11, 1.0, %v7987_v59  ;;  %vm3022_vm15 = vcmp.eq.s32.totalorder %v2982_v16, %v5400_v45 }
 0x336   :  { %v3318_v6 = vadd.f32 %v7273_v11, %v3282_v7  ;;  %4573 = vmatmul.msk.bf16.gmra.mxu2 %vm550_vm2, %v2692_v60  ;;  %v2693_v36 = vpack.c.bf16 %v4531_v62, %v4530_v55 }
 0x337   :  { %4501 = vmatmul.msk.bf16.gmra.mxu1 %vm550_vm2, %v2282_v57 }
 0x338   :  { %v3350_v12 = vmax.f32 %v3318_v6, 0.0  ;;  %v2979_v31 = vpop.permute.xlu2 %2978 }
 0x339   :  { %v2802_v50 = vpop.f32.mrf.mxu2  ;;  %vm3021_vm14 = vcmp.eq.s32.totalorder %v2979_v31, %v5400_v45 }
 0x33a   :  { %v3379_v63 = vpack.c.bf16 %v3350_v12, %v3349_v25  ;;  %v2873_v32 = vadd.f32 %v2802_v50, %v2463_v22  ;;  %v4604_v22 = vsel %vm3021_vm14, 1.0, %v7987_v59 }
 0x33b   :  { %v2973_v28 = vpop.permute.xlu1 %2972 }
 0x33c   :  { %vm3019_vm9 = vcmp.eq.s32.totalorder %v2973_v28, %v5400_v45  ;;  %v3214_v44 = vpop.f32.mrf.mxu3  ;;  %3479 = vmatmul.bf16.gmra.mxu0 %v3379_v63  ;;  %v3283_v49 = vadd.f32 %v3212_v1, %v2873_v32  ;;  %v2402_v1 = vpop.f32.mrf.mxu1  ;;  %v4605_v28 = vsel %vm3022_vm15, 1.0, %v7987_v59 }
 0x33d   :  { %v4602_v30 = vsel %vm3019_vm9, 1.0, %v7987_v59 }
 0x33e   :  { %v3103_v51 = vpack.c.bf16 %v4603_v5, %v4602_v30  ;;  %v3319_v34 = vadd.f32 %v7273_v11, %v3283_v49  ;;  %v3104_v30 = vpack.c.bf16 %v4605_v28, %v4604_v22  ;;  %v4532_v49 = vsel %vm2611_vm0, 1.0, %v7987_v59 }
 0x340   :  { %v3351_v12 = vmax.f32 %v3319_v34, 0.0 }
 0x341   :  { %4646 = vmatmul.msk.bf16.gmra.mxu3 %vm550_vm2, %v3103_v51  ;;  %v2804_v33 = vpop.f32.mrf.mxu2  ;;  %v2162_v5 = vpop.permute.xlu2 %2161  ;;  %v2056_v51 = vadd.f32 %v6944_v15, %v6690_v3 }
 0x342   :  { %v2874_v60 = vadd.f32 %v2804_v33, %v2464_v18  ;;  %v7382_v33 = vpop.f32.mrf.mxu0  ;;  %vm2202_vm3 = vcmp.eq.s32.totalorder %v2162_v5, %v5400_v45  ;;  %v2985_v3 = vpop.permute.xlu0 %2984 }
 0x343   :  { %v2466_v43 = vadd.f32 %v2399_v27, %v2056_v51  ;;  %vm3023_vm9 = vcmp.eq.s32.totalorder %v2985_v3, %v5400_v45 }
 0x344   :  { %v3284_v24 = vadd.f32 %v3214_v44, %v2874_v60  ;;  %v3217_v7 = vpop.f32.mrf.mxu3  ;;  %v2153_v38 = vpop.permute.xlu1 %2152 }
 0x345   :  { %vm2199_vm13 = vcmp.eq.s32.totalorder %v2153_v38, %v5400_v45  ;;  %v2404_v18 = vpop.f32.mrf.mxu1 }
 0x346   :  { %v3320_v57 = vadd.f32 %v7273_v11, %v3284_v24  ;;  %v4458_v6 = vsel %vm2199_vm13, 1.0, %v7987_v59  ;;  %4574 = vmatmul.msk.bf16.gmra.mxu2 %vm550_vm2, %v2693_v36  ;;  %v4461_v24 = vsel %vm2202_vm3, 1.0, %v7987_v59 }
 0x347   :  { %v2283_v25 = vpack.c.bf16 %v4459_v23, %v4458_v6  ;;  %v4755_v6 = vld [vmem:[#allocation4 + $0x8] sm:$0xff] }
 0x348   :  { %v3352_v42 = vmax.f32 %v3320_v57, 0.0  ;;  %3672 = vmatpush.bf16.msra.mxu1 %v4755_v6 }
 0x349   :  { %4502 = vmatmul.msk.bf16.gmra.mxu1 %vm550_vm2, %v2283_v25  ;;  %v2807_v50 = vpop.f32.mrf.mxu2 }
 0x34a   :  { %v3380_v63 = vpack.c.bf16 %v3352_v42, %v3351_v12  ;;  %v2875_v32 = vadd.f32 %v2807_v50, %v2465_v37  ;;  %v2578_v27 = vpop.permute.xlu2 %2577  ;;  %v2467_v42 = vadd.f32 %v2402_v1, %v6972_v48  ;;  %v2168_v5 = vpop.permute.xlu0 %2167 }
 0x34b   :  { %vm2614_vm5 = vcmp.eq.s32.totalorder %v2578_v27, %v5400_v45  ;;  %vm2204_vm7 = vcmp.eq.s32.totalorder %v2168_v5, %v5400_v45 }
 0x34c   :  { %v3219_v44 = vpop.f32.mrf.mxu3  ;;  %3484 = vmatmul.bf16.gmra.mxu0 %v3380_v63  ;;  %v3285_v29 = vadd.f32 %v3217_v7, %v2875_v32  ;;  %v8075_v32 = vld [vmem:[#allocation33_spill] sm:$0xff]  ;;  %v4535_v51 = vsel %vm2614_vm5, 1.0, %v7987_v59 }
 0x34d   :  { %v2572_v53 = vpop.permute.xlu1 %2571  ;;  %v2407_v7 = vpop.f32.mrf.mxu1 }
 0x34e   :  { %vm2612_vm1 = vcmp.eq.s32.totalorder %v2572_v53, %v5400_v45  ;;  %v3321_v15 = vadd.f32 %v7273_v11, %v3285_v29 }
 0x34f   :  { %v4533_v55 = vsel %vm2612_vm1, 1.0, %v7987_v59 }
 0x350   :  { %v2694_v39 = vpack.c.bf16 %v4533_v55, %v4532_v49  ;;  %v3353_v38 = vmax.f32 %v3321_v15, 0.0 }
 0x351   :  { %v2809_v62 = vpop.f32.mrf.mxu2  ;;  %4647 = vmatmul.msk.bf16.gmra.mxu3 %vm550_vm2, %v3104_v30 }
 0x352   :  { %v2876_v60 = vadd.f32 %v2809_v62, %v2466_v43 }
 0x353   :  { %v2165_v30 = vpop.permute.xlu2 %2164 }
 0x354   :  { %v3286_v31 = vadd.f32 %v3219_v44, %v2876_v60  ;;  %v3222_v16 = vpop.f32.mrf.mxu3  ;;  %v2058_v44 = vadd.f32 %v6999_v17, %v8075_v32  ;;  %vm2203_vm8 = vcmp.eq.s32.totalorder %v2165_v30, %v5400_v45  ;;  %v4463_v17 = vsel %vm2204_vm7, 1.0, %v7987_v59 }
 0x355   :  { %v4462_v15 = vsel %vm2203_vm8, 1.0, %v7987_v59 }
 0x356   :  { %v3322_v34 = vadd.f32 %v7273_v11, %v3286_v31  ;;  %v2159_v36 = vpop.permute.xlu1 %2158  ;;  %4575 = vmatmul.msk.bf16.gmra.mxu2 %vm550_vm2, %v2694_v39  ;;  %v2468_v48 = vadd.f32 %v2404_v18, %v2058_v44  ;;  %v2285_v31 = vpack.c.bf16 %v4463_v17, %v4462_v15 }
 0x357   :  { %vm2201_vm4 = vcmp.eq.s32.totalorder %v2159_v36, %v5400_v45 }
 0x358   :  { %v3354_v23 = vmax.f32 %v3322_v34, 0.0  ;;  %v4460_v57 = vsel %vm2201_vm4, 1.0, %v7987_v59 }
 0x359   :  { %v2284_v25 = vpack.c.bf16 %v4461_v24, %v4460_v57  ;;  %v2812_v12 = vpop.f32.mrf.mxu2 }
 0x35a   :  { %v2037_v50 = vpop.f32.mrf.mxu0  ;;  %v3381_v37 = vpack.c.bf16 %v3354_v23, %v3353_v38  ;;  %v2877_v63 = vadd.f32 %v2812_v12, %v2467_v42  ;;  %v2469_v38 = vadd.f32 %v2407_v7, %v7022_v19  ;;  %v4606_v23 = vsel %vm3023_vm9, 1.0, %v7987_v59 }
 0x35b   :  { %v7393_v22 = vadd.f32 %v2037_v50, %v7172_v54  ;;  %4503 = vmatmul.msk.bf16.gmra.mxu1 %vm550_vm2, %v2284_v25  ;;  %v2409_v54 = vpop.f32.mrf.mxu1 }
 0x35c   :  { %v3224_v28 = vpop.f32.mrf.mxu3  ;;  %3489 = vmatmul.bf16.gmra.mxu0 %v3381_v37  ;;  %v3287_v1 = vadd.f32 %v3222_v16, %v2877_v63  ;;  %v2584_v25 = vpop.permute.xlu2 %2583  ;;  %v8076_v37 = vld [vmem:[#allocation30_spill] sm:$0xff] }
 0x35d   :  { %v2060_v63 = vadd.f32 %v7044_v20, %v8076_v37  ;;  %vm2616_vm11 = vcmp.eq.s32.totalorder %v2584_v25, %v5400_v45 }
 0x35e   :  { %v3323_v55 = vadd.f32 %v7273_v11, %v3287_v1  ;;  %v4537_v5 = vsel %vm2616_vm11, 1.0, %v7987_v59 }
 0x35f   :  { %v2575_v53 = vpop.permute.xlu1 %2574  ;;  %v2470_v19 = vadd.f32 %v2409_v54, %v2060_v63 }
 0x360   :  { %vm2613_vm6 = vcmp.eq.s32.totalorder %v2575_v53, %v5400_v45  ;;  %v3355_v16 = vmax.f32 %v3323_v55, 0.0 }
 0x361   :  { %v4534_v43 = vsel %vm2613_vm6, 1.0, %v7987_v59  ;;  %v2814_v29 = vpop.f32.mrf.mxu2 }
 0x362   :  { %v2878_v49 = vadd.f32 %v2814_v29, %v2468_v48  ;;  %v2695_v62 = vpack.c.bf16 %v4535_v51, %v4534_v43  ;;  %v7415_v50 = vpop.f32.mrf.mxu0 }
 0x363   :  { %v2412_v36 = vpop.f32.mrf.mxu1 }
 0x364   :  { %v3288_v18 = vadd.f32 %v3224_v28, %v2878_v49  ;;  %v3227_v60 = vpop.f32.mrf.mxu3 }
 0x365   :  { %v2994_v20 = vpop.permute.xlu2 %2993 }
 0x366   :  { %v3324_v39 = vadd.f32 %v7273_v11, %v3288_v18  ;;  %4576 = vmatmul.msk.bf16.gmra.mxu2 %vm550_vm2, %v2695_v62  ;;  %vm3026_vm13 = vcmp.eq.s32.totalorder %v2994_v20, %v5400_v45  ;;  %v4754_v62 = vld [vmem:[#allocation4] sm:$0xff] }
 0x367   :  { %3673 = vmatpush.bf16.msra.mxu1 %v4754_v62 }
 0x368   :  { %v3356_v27 = vmax.f32 %v3324_v39, 0.0  ;;  %v2988_v34 = vpop.permute.xlu1 %2987  ;;  %v4609_v39 = vsel %vm3026_vm13, 1.0, %v7987_v59 }
 0x369   :  { %vm3024_vm10 = vcmp.eq.s32.totalorder %v2988_v34, %v5400_v45  ;;  %v2817_v24 = vpop.f32.mrf.mxu2 }
 0x36a   :  { %v4607_v57 = vsel %vm3024_vm10, 1.0, %v7987_v59  ;;  %v3382_v6 = vpack.c.bf16 %v3356_v27, %v3355_v16  ;;  %v2879_v3 = vadd.f32 %v2817_v24, %v2469_v38  ;;  %v2062_v38 = vadd.f32 %v7086_v58, %v6866_v56 }
 0x36b   :  { %v3105_v12 = vpack.c.bf16 %v4607_v57, %v4606_v23  ;;  %4504 = vmatmul.msk.bf16.gmra.mxu1 %vm550_vm2, %v2285_v31  ;;  %v2414_v30 = vpop.f32.mrf.mxu1  ;;  %v2171_v23 = vpop.permute.xlu0 %2170 }
 0x36c   :  { %v3229_v42 = vpop.f32.mrf.mxu3  ;;  %3494 = vmatmul.bf16.gmra.mxu0 %v3382_v6  ;;  %v3289_v7 = vadd.f32 %v3227_v60, %v2879_v3  ;;  %v2471_v60 = vadd.f32 %v2412_v36, %v7064_v41  ;;  %v2472_v41 = vadd.f32 %v2414_v30, %v2062_v38  ;;  %vm2205_vm15 = vcmp.eq.s32.totalorder %v2171_v23, %v5400_v45 }
 0x36d   :  { %4648 = vmatmul.msk.bf16.gmra.mxu3 %vm550_vm2, %v3105_v12  ;;  %v4464_v37 = vsel %vm2205_vm15, 1.0, %v7987_v59 }
 0x36e   :  { %v3325_v48 = vadd.f32 %v7273_v11, %v3289_v7 }
 0x370   :  { %v3357_v17 = vmax.f32 %v3325_v48, 0.0 }
 0x371   :  { %v2581_v28 = vpop.permute.xlu1 %2580  ;;  %v2819_v32 = vpop.f32.mrf.mxu2 }
 0x372   :  { %vm2615_vm12 = vcmp.eq.s32.totalorder %v2581_v28, %v5400_v45  ;;  %v2880_v44 = vadd.f32 %v2819_v32, %v2470_v19 }
 0x373   :  { %v4536_v53 = vsel %vm2615_vm12, 1.0, %v7987_v59  ;;  %v2417_v16 = vpop.f32.mrf.mxu1 }
 0x374   :  { %v2696_v1 = vpack.c.bf16 %v4537_v5, %v4536_v53  ;;  %v3290_v51 = vadd.f32 %v3229_v42, %v2880_v44  ;;  %v3232_v43 = vpop.f32.mrf.mxu3  ;;  %v2473_v32 = vadd.f32 %v2417_v16, %v7107_v46 }
 0x375   :  { %v2042_v29 = vpop.f32.mrf.mxu0 }
 0x376   :  { %v3326_v54 = vadd.f32 %v7273_v11, %v3290_v51  ;;  %v7427_v49 = vadd.f32 %v2042_v29, %v7216_v2  ;;  %4577 = vmatmul.msk.bf16.gmra.mxu2 %vm550_vm2, %v2696_v1 }
 0x378   :  { %v3358_v55 = vmax.f32 %v3326_v54, 0.0 }
 0x379   :  { %v2822_v18 = vpop.f32.mrf.mxu2 }
 0x37a   :  { %v2991_v15 = vpop.permute.xlu1 %2990  ;;  %v3383_v31 = vpack.c.bf16 %v3358_v55, %v3357_v17  ;;  %v2881_v2 = vadd.f32 %v2822_v18, %v2471_v60 }
 0x37b   :  { %vm3025_vm14 = vcmp.eq.s32.totalorder %v2991_v15, %v5400_v45  ;;  %v2419_v58 = vpop.f32.mrf.mxu1 }
 0x37c   :  { %v4608_v27 = vsel %vm3025_vm14, 1.0, %v7987_v59  ;;  %v3234_v34 = vpop.f32.mrf.mxu3  ;;  %3499 = vmatmul.bf16.gmra.mxu0 %v3383_v31  ;;  %v3291_v36 = vadd.f32 %v3232_v43, %v2881_v2  ;;  %v7456_v31 = vld [vmem:[%s7950_s4] ss:$0 sm:$0xff]  ;;  %v2066_v2 = vadd.f32 %v7179_v40, %v6967_v14 }
 0x37d   :  { %v3106_v24 = vpack.c.bf16 %v4609_v39, %v4608_v27  ;;  %v7448_v51 = vpop.f32.mrf.mxu0 }
 0x37e   :  { %v3327_v12 = vadd.f32 %v7273_v11, %v3291_v36 }
 0x37f   :  { %4649 = vmatmul.msk.bf16.gmra.mxu3 %vm550_vm2, %v3106_v24 }
 0x380   :  { %v3359_v7 = vmax.f32 %v3327_v12, 0.0 }
 0x381   :  { %v2824_v57 = vpop.f32.mrf.mxu2 }
 0x382   :  { %v2882_v6 = vadd.f32 %v2824_v57, %v2472_v41 }
 0x383   :  { %v2174_v25 = vpop.permute.xlu1 %2173 }
 0x384   :  { %v3292_v3 = vadd.f32 %v3234_v34, %v2882_v6  ;;  %vm2206_vm0 = vcmp.eq.s32.totalorder %v2174_v25, %v5400_v45  ;;  %v3237_v42 = vpop.f32.mrf.mxu3  ;;  %v2064_v45 = vadd.f32 %v7131_v26, %v6913_v4 }
 0x385   :  { %v4465_v56 = vsel %vm2206_vm0, 1.0, %v7987_v59 }
 0x386   :  { %v3328_v63 = vadd.f32 %v7273_v11, %v3292_v3  ;;  %v2286_v19 = vpack.c.bf16 %v4465_v56, %v4464_v37  ;;  %v2474_v59 = vadd.f32 %v2419_v58, %v2064_v45 }
 0x387   :  { %v2422_v48 = vpop.f32.mrf.mxu1 }
 0x388   :  { %v3360_v28 = vmax.f32 %v3328_v63, 0.0  ;;  %4505 = vmatmul.msk.bf16.gmra.mxu1 %vm550_vm2, %v2286_v19  ;;  %v2475_v4 = vadd.f32 %v2422_v48, %v7153_v10  ;;  %vm4043_vm2 = vcmask 64512  }
 0x389   :  { %v2827_v5 = vpop.f32.mrf.mxu2 }
 0x38a   :  { %v3384_v44 = vpack.c.bf16 %v3360_v28, %v3359_v7  ;;  %v2883_v30 = vadd.f32 %v2827_v5, %v2473_v32  ;;  %v2068_v32 = vadd.f32 %v7223_v9, %v7015_v0 }
 0x38c   :  { %v3239_v53 = vpop.f32.mrf.mxu3  ;;  %3504 = vmatmul.bf16.gmra.mxu0 %v3384_v44  ;;  %v3293_v1 = vadd.f32 %v3237_v42, %v2883_v30 }
 0x38e   :  { %v3329_v29 = vadd.f32 %v7273_v11, %v3293_v1 }
 0x38f   :  { %v2424_v62 = vpop.f32.mrf.mxu1 }
 0x390   :  { %v3361_v55 = vmax.f32 %v3329_v29, 0.0  ;;  %v2476_v27 = vadd.f32 %v2424_v62, %v2066_v2 }
 0x391   :  { %v2829_v43 = vpop.f32.mrf.mxu2 }
 0x392   :  { %v2884_v20 = vadd.f32 %v2829_v43, %v2474_v59 }
 0x394   :  { %v3294_v54 = vadd.f32 %v3239_v53, %v2884_v20  ;;  %v3242_v17 = vpop.f32.mrf.mxu3 }
 0x396   :  { %v3330_v46 = vadd.f32 %v7273_v11, %v3294_v54 }
 0x397   :  { %v2427_v41 = vpop.f32.mrf.mxu1 }
 0x398   :  { %v3362_v18 = vmax.f32 %v3330_v46, 0.0  ;;  %v2477_v63 = vadd.f32 %v2427_v41, %v7201_v35 }
 0x399   :  { %v2832_v60 = vpop.f32.mrf.mxu2  ;;  %v3470_v15 = vpop.f32.mrf.mxu0 }
 0x39a   :  { %v3385_v26 = vpack.c.bf16 %v3362_v18, %v3361_v55  ;;  %v2885_v39 = vadd.f32 %v2832_v60, %v2475_v4  ;;  %v3471_v24 = vadd.f32 %v7456_v31, %v3470_v15 }
 0x39c   :  { %v3244_v16 = vpop.f32.mrf.mxu3  ;;  %3509 = vmatmul.bf16.gmra.mxu0 %v3385_v26  ;;  %v3295_v34 = vadd.f32 %v3242_v17, %v2885_v39  ;;  %v3550_v6 = vmax.f32 %v3471_v24, 0.0 }
 0x39e   :  { %v3331_v57 = vadd.f32 %v7273_v11, %v3295_v34 }
 0x39f   :  { %v2429_v7 = vpop.f32.mrf.mxu1 }
 0x3a0   :  { %v3363_v14 = vmax.f32 %v3331_v57, 0.0  ;;  %v2478_v44 = vadd.f32 %v2429_v7, %v2068_v32 }
 0x3a1   :  { %v2834_v38 = vpop.f32.mrf.mxu2  ;;  %v3472_v23 = vpop.f32.mrf.mxu0 }
 0x3a2   :  { %v2886_v10 = vadd.f32 %v2834_v38, %v2476_v27  ;;  %v3473_v36 = vadd.f32 %v7456_v31, %v3472_v23 }
 0x3a4   :  { %v3296_v25 = vadd.f32 %v3244_v16, %v2886_v10  ;;  %v3551_v12 = vmax.f32 %v3473_v36, 0.0  ;;  %v3247_v3 = vpop.f32.mrf.mxu3  ;;  %v8077_v16 = vld [vmem:[#allocation14_spill] sm:$0xff] }
 0x3a5   :  { %v2070_v2 = vadd.f32 %v7264_v61, %v8077_v16 }
 0x3a6   :  { %v3332_v42 = vadd.f32 %v7273_v11, %v3296_v25  ;;  %v3582_v37 = vpack.c.bf16 %v3551_v12, %v3550_v6 }
 0x3a8   :  { %v3364_v40 = vmax.f32 %v3332_v42, 0.0  ;;  %3674 = vmatmul.bf16.vlgmr.msra.gmra.mxu1 %v3582_v37 }
 0x3a9   :  { %v2837_v56 = vpop.f32.mrf.mxu2  ;;  %v3475_v58 = vpop.f32.mrf.mxu0 }
 0x3aa   :  { %v3386_v19 = vpack.c.bf16 %v3364_v40, %v3363_v14  ;;  %v2887_v28 = vadd.f32 %v2837_v56, %v2477_v63  ;;  %v3476_v53 = vadd.f32 %v7456_v31, %v3475_v58 }
 0x3ac   :  { %v3249_v5 = vpop.f32.mrf.mxu3  ;;  %3514 = vmatmul.bf16.gmra.mxu0 %v3386_v19  ;;  %v3297_v30 = vadd.f32 %v3247_v3, %v2887_v28  ;;  %v3552_v35 = vmax.f32 %v3476_v53, 0.0  ;;  %v8078_v19 = vld [vmem:[#allocation10_spill] sm:$0xff] }
 0x3ad   :  { %v2072_v7 = vadd.f32 %v7307_v13, %v8078_v19 }
 0x3ae   :  { %v3333_v43 = vadd.f32 %v7273_v11, %v3297_v30 }
 0x3b0   :  { %v3365_v0 = vmax.f32 %v3333_v43, 0.0 }
 0x3b1   :  { %v2839_v45 = vpop.f32.mrf.mxu2  ;;  %v3477_v48 = vpop.f32.mrf.mxu0 }
 0x3b2   :  { %v2888_v59 = vadd.f32 %v2839_v45, %v2478_v44  ;;  %v3478_v1 = vadd.f32 %v7456_v31, %v3477_v48 }
 0x3b4   :  { %v3298_v20 = vadd.f32 %v3249_v5, %v2888_v59  ;;  %v3553_v29 = vmax.f32 %v3478_v1, 0.0  ;;  %v3252_v54 = vpop.f32.mrf.mxu3  ;;  %v2432_v17 = vpop.f32.mrf.mxu1 }
 0x3b5   :  { %v2479_v60 = vadd.f32 %v2432_v17, %v7248_v52 }
 0x3b6   :  { %v3334_v46 = vadd.f32 %v7273_v11, %v3298_v20  ;;  %v3583_v55 = vpack.c.bf16 %v3553_v29, %v3552_v35 }
 0x3b8   :  { %v3366_v9 = vmax.f32 %v3334_v46, 0.0  ;;  %3679 = vmatmul.bf16.gmra.mxu1 %v3583_v55 }
 0x3b9   :  { %v2842_v62 = vpop.f32.mrf.mxu2  ;;  %v3480_v18 = vpop.f32.mrf.mxu0 }
 0x3ba   :  { %v3387_v15 = vpack.c.bf16 %v3366_v9, %v3365_v0  ;;  %v2889_v4 = vadd.f32 %v2842_v62, %v2479_v60  ;;  %v3481_v34 = vadd.f32 %v7456_v31, %v3480_v18  ;;  %v8079_v60 = vld [vmem:[#allocation31_spill] sm:$0xff] }
 0x3bc   :  { %v3254_v26 = vpop.f32.mrf.mxu3  ;;  %3519 = vmatmul.bf16.gmra.mxu0 %v3387_v15  ;;  %v2434_v39 = vpop.f32.mrf.mxu1  ;;  %v3299_v27 = vadd.f32 %v3252_v54, %v2889_v4  ;;  %v3554_v52 = vmax.f32 %v3481_v34, 0.0  ;;  %v2074_v15 = vadd.f32 %v7382_v33, %v8079_v60 }
 0x3bd   :  { %v2480_v24 = vadd.f32 %v2434_v39, %v2070_v2 }
 0x3be   :  { %v3335_v36 = vadd.f32 %v7273_v11, %v3299_v27 }
 0x3c0   :  { %v3367_v61 = vmax.f32 %v3335_v36, 0.0 }
 0x3c1   :  { %v2844_v38 = vpop.f32.mrf.mxu2  ;;  %v3482_v23 = vpop.f32.mrf.mxu0 }
 0x3c2   :  { %v2890_v41 = vadd.f32 %v2844_v38, %v2480_v24  ;;  %v3483_v10 = vadd.f32 %v7456_v31, %v3482_v23 }
 0x3c4   :  { %v3300_v57 = vadd.f32 %v3254_v26, %v2890_v41  ;;  %v3555_v6 = vmax.f32 %v3483_v10, 0.0  ;;  %v3257_v12 = vpop.f32.mrf.mxu3 }
 0x3c6   :  { %v3336_v25 = vadd.f32 %v7273_v11, %v3300_v57  ;;  %v2437_v3 = vpop.f32.mrf.mxu1  ;;  %v3584_v42 = vpack.c.bf16 %v3555_v6, %v3554_v52 }
 0x3c7   :  { %v2481_v14 = vadd.f32 %v2437_v3, %v7292_v21 }
 0x3c8   :  { %v3368_v37 = vmax.f32 %v3336_v25, 0.0  ;;  %3684 = vmatmul.bf16.gmra.mxu1 %v3584_v42 }
 0x3c9   :  { %v2847_v40 = vpop.f32.mrf.mxu2  ;;  %v3485_v56 = vpop.f32.mrf.mxu0 }
 0x3ca   :  { %v3388_v58 = vpack.c.bf16 %v3368_v37, %v3367_v61  ;;  %v2891_v63 = vadd.f32 %v2847_v40, %v2481_v14  ;;  %v3486_v44 = vadd.f32 %v7456_v31, %v3485_v56  ;;  %v2076_v40 = vadd.f32 %v7415_v50, %v7194_v47 }
 0x3cc   :  { %3524 = vmatmul.bf16.gmra.mxu0 %v3388_v58  ;;  %v3301_v32 = vadd.f32 %v3257_v12, %v2891_v63  ;;  %v3259_v30 = vpop.f32.mrf.mxu3  ;;  %v3556_v1 = vmax.f32 %v3486_v44, 0.0 }
 0x3ce   :  { %v2439_v28 = vpop.f32.mrf.mxu1  ;;  %v3337_v59 = vadd.f32 %v7273_v11, %v3301_v32 }
 0x3cf   :  { %v2482_v5 = vadd.f32 %v2439_v28, %v2072_v7 }
 0x3d0   :  { %v3369_v13 = vmax.f32 %v3337_v59, 0.0 }
 0x3d1   :  { %v2849_v53 = vpop.f32.mrf.mxu2  ;;  %v3487_v45 = vpop.f32.mrf.mxu0 }
 0x3d2   :  { %v2892_v48 = vadd.f32 %v2849_v53, %v2482_v5  ;;  %v3488_v21 = vadd.f32 %v7456_v31, %v3487_v45 }
 0x3d4   :  { %v3302_v43 = vadd.f32 %v3259_v30, %v2892_v48  ;;  %v3557_v35 = vmax.f32 %v3488_v21, 0.0  ;;  %v3262_v9 = vpop.f32.mrf.mxu3 }
 0x3d6   :  { %v3338_v20 = vadd.f32 %v7273_v11, %v3302_v43  ;;  %v3585_v29 = vpack.c.bf16 %v3557_v35, %v3556_v1 }
 0x3d8   :  { %v3370_v54 = vmax.f32 %v3338_v20, 0.0  ;;  %v2442_v17 = vpop.f32.mrf.mxu1  ;;  %3689 = vmatmul.bf16.gmra.mxu1 %v3585_v29 }
 0x3d9   :  { %v2483_v46 = vadd.f32 %v2442_v17, %v7320_v8  ;;  %v2852_v55 = vpop.f32.mrf.mxu2  ;;  %v3490_v0 = vpop.f32.mrf.mxu0 }
 0x3da   :  { %v3389_v62 = vpack.c.bf16 %v3370_v54, %v3369_v13  ;;  %v3491_v4 = vadd.f32 %v7456_v31, %v3490_v0 }
 0x3db   :  { %v2893_v18 = vadd.f32 %v2852_v55, %v2483_v46 }
 0x3dc   :  { %3529 = vmatmul.bf16.gmra.mxu0 %v3389_v62  ;;  %v3558_v8 = vmax.f32 %v3491_v4, 0.0  ;;  %v3264_v38 = vpop.f32.mrf.mxu3 }
 0x3dd   :  { %v3303_v39 = vadd.f32 %v3262_v9, %v2893_v18  ;;  %v8080_v9 = vld [vmem:[#allocation37_spill] sm:$0xff] }
 0x3de   :  { %v2078_v62 = vadd.f32 %v7448_v51, %v8080_v9 }
 0x3df   :  { %v3339_v41 = vadd.f32 %v7273_v11, %v3303_v39 }
 0x3e0   :  { %v2444_v26 = vpop.f32.mrf.mxu1 }
 0x3e1   :  { %v2484_v16 = vadd.f32 %v2444_v26, %v2074_v15  ;;  %v2854_v2 = vpop.f32.mrf.mxu2  ;;  %v3492_v27 = vpop.f32.mrf.mxu0  ;;  %v3371_v57 = vmax.f32 %v3339_v41, 0.0 }
 0x3e2   :  { %v3493_v34 = vadd.f32 %v7456_v31, %v3492_v27 }
 0x3e3   :  { %v2894_v24 = vadd.f32 %v2854_v2, %v2484_v16 }
 0x3e4   :  { %v3559_v23 = vmax.f32 %v3493_v34, 0.0 }
 0x3e5   :  { %v3304_v10 = vadd.f32 %v3264_v38, %v2894_v24 }
 0x3e6   :  { %v3586_v36 = vpack.c.bf16 %v3559_v23, %v3558_v8 }
 0x3e7   :  { %v3340_v52 = vadd.f32 %v7273_v11, %v3304_v10 }
 0x3e8   :  { %v2447_v33 = vpop.f32.mrf.mxu1  ;;  %3694 = vmatmul.bf16.gmra.mxu1 %v3586_v36 }
 0x3e9   :  { %v3372_v6 = vmax.f32 %v3340_v52, 0.0  ;;  %v3495_v25 = vpop.f32.mrf.mxu0  ;;  %v2857_v12 = vpop.f32.mrf.mxu2  ;;  %v2485_v42 = vadd.f32 %v2447_v33, %v7393_v22 }
 0x3ea   :  { %v3496_v61 = vadd.f32 %v7456_v31, %v3495_v25  ;;  %v7514_v25 = vld [vmem:[%s7952_s6] ss:$0 sm:$0xff] }
 0x3eb   :  { %v3390_v3 = vpack.c.bf16 %v3372_v6, %v3371_v57  ;;  %v2895_v63 = vadd.f32 %v2857_v12, %v2485_v42 }
 0x3ec   :  { %v3560_v7 = vmax.f32 %v3496_v61, 0.0 }
 0x3ed   :  { %3534 = vmatmul.bf16.gmra.mxu0 %v3390_v3 }
 0x3f0   :  { %v2449_v37 = vpop.f32.mrf.mxu1  ;;  %v3267_v14 = vpop.f32.mrf.mxu3 }
 0x3f1   :  { %v3497_v56 = vpop.f32.mrf.mxu0  ;;  %v2486_v19 = vadd.f32 %v2449_v37, %v2076_v40  ;;  %v2859_v28 = vpop.f32.mrf.mxu2  ;;  %v3305_v32 = vadd.f32 %v3267_v14, %v2895_v63 }
 0x3f2   :  { %v3498_v58 = vadd.f32 %v7456_v31, %v3497_v56 }
 0x3f3   :  { %v2896_v30 = vadd.f32 %v2859_v28, %v2486_v19  ;;  %v3341_v22 = vadd.f32 %v7273_v11, %v3305_v32 }
 0x3f4   :  { %v3561_v5 = vmax.f32 %v3498_v58, 0.0 }
 0x3f5   :  { %v3373_v47 = vmax.f32 %v3341_v22, 0.0 }
 0x3f6   :  { %v3587_v44 = vpack.c.bf16 %v3561_v5, %v3560_v7 }
 0x3f8   :  { %v3269_v53 = vpop.f32.mrf.mxu3  ;;  %3699 = vmatmul.bf16.gmra.mxu1 %v3587_v44 }
 0x3f9   :  { %v3306_v45 = vadd.f32 %v3269_v53, %v2896_v30  ;;  %v3500_v48 = vpop.f32.mrf.mxu0  ;;  %v2862_v13 = vpop.f32.mrf.mxu2 }
 0x3fa   :  { %v3501_v1 = vadd.f32 %v7456_v31, %v3500_v48 }
 0x3fb   :  { %v3342_v21 = vadd.f32 %v7273_v11, %v3306_v45 }
 0x3fc   :  { %v3562_v20 = vmax.f32 %v3501_v1, 0.0 }
 0x3fd   :  { %v3374_v50 = vmax.f32 %v3342_v21, 0.0 }
 0x3ff   :  { %v3391_v59 = vpack.c.bf16 %v3374_v50, %v3373_v47 }
 0x401   :  { %v3502_v43 = vpop.f32.mrf.mxu0  ;;  %3539 = vmatmul.bf16.gmra.mxu0 %v3391_v59  ;;  %v2864_v4 = vpop.f32.mrf.mxu2 }
 0x402   :  { %v3503_v35 = vadd.f32 %v7456_v31, %v3502_v43  ;;  %v3272_v55 = vpop.f32.mrf.mxu3 }
 0x404   :  { %v3563_v29 = vmax.f32 %v3503_v35, 0.0 }
 0x405   :  { %v2452_v54 = vpop.f32.mrf.mxu1 }
 0x406   :  { %v3588_v17 = vpack.c.bf16 %v3563_v29, %v3562_v20  ;;  %v2487_v46 = vadd.f32 %v2452_v54, %v7427_v49  ;;  %v5065_v49 = vld [vmem:[%s7948_s2] ss:$0 sm:$0xff] }
 0x408   :  { %3704 = vmatmul.bf16.gmra.mxu1 %v3588_v17  ;;  %v2897_v11 = vadd.f32 %v2862_v13, %v2487_v46 }
 0x409   :  { %v3505_v0 = vpop.f32.mrf.mxu0 }
 0x40a   :  { %v3307_v60 = vadd.f32 %v3272_v55, %v2897_v11  ;;  %v3506_v26 = vadd.f32 %v7456_v31, %v3505_v0  ;;  %v3274_v16 = vpop.f32.mrf.mxu3 }
 0x40c   :  { %v3343_v24 = vadd.f32 %v5065_v49, %v3307_v60  ;;  %v3564_v8 = vmax.f32 %v3506_v26, 0.0 }
 0x40d   :  { %v2454_v18 = vpop.f32.mrf.mxu1 }
 0x40e   :  { %v2488_v15 = vadd.f32 %v2454_v18, %v2078_v62  ;;  %v3375_v41 = vmax.f32 %v3343_v24, 0.0 }
 0x410   :  { %v2898_v39 = vadd.f32 %v2864_v4, %v2488_v15 }
 0x411   :  { %v3507_v2 = vpop.f32.mrf.mxu0 }
 0x412   :  { %v3308_v27 = vadd.f32 %v3274_v16, %v2898_v39  ;;  %v3508_v34 = vadd.f32 %v7456_v31, %v3507_v2 }
 0x414   :  { %v3565_v38 = vmax.f32 %v3508_v34, 0.0  ;;  %v3344_v51 = vadd.f32 %v5065_v49, %v3308_v27 }
 0x416   :  { %v3589_v23 = vpack.c.bf16 %v3565_v38, %v3564_v8  ;;  %v3376_v10 = vmax.f32 %v3344_v51, 0.0 }
 0x418   :  { %3709 = vmatmul.bf16.gmra.mxu1 %v3589_v23  ;;  %v3392_v36 = vpack.c.bf16 %v3376_v10, %v3375_v41 }
 0x419   :  { %v3510_v52 = vpop.f32.mrf.mxu0 }
 0x41a   :  { %3544 = vmatmul.bf16.gmra.mxu0 %v3392_v36  ;;  %v3511_v33 = vadd.f32 %v7456_v31, %v3510_v52 }
 0x41c   :  { %v3566_v12 = vmax.f32 %v3511_v33, 0.0 }
 0x421   :  { %v3512_v57 = vpop.f32.mrf.mxu0 }
 0x422   :  { %v3513_v6 = vadd.f32 %v7456_v31, %v3512_v57 }
 0x424   :  { %v3567_v3 = vmax.f32 %v3513_v6, 0.0 }
 0x425   :  { %v3675_v42 = vpop.f32.mrf.mxu1 }
 0x426   :  { %v3590_v61 = vpack.c.bf16 %v3567_v3, %v3566_v12  ;;  %v7517_v37 = vadd.f32 %v7514_v25, %v3675_v42 }
 0x428   :  { %3714 = vmatmul.bf16.gmra.mxu1 %v3590_v61  ;;  %3755 = vmax.xlane.f32.xlu2 %v7517_v37 }
 0x429   :  { %v3515_v14 = vpop.f32.mrf.mxu0 }
 0x42a   :  { %v3516_v58 = vadd.f32 %v7456_v31, %v3515_v14 }
 0x42c   :  { %v3568_v7 = vmax.f32 %v3516_v58, 0.0 }
 0x42d   :  { %v3677_v40 = vpop.f32.mrf.mxu1 }
 0x42e   :  { %v7521_v56 = vadd.f32 %v7514_v25, %v3677_v40 }
 0x430   :  { %3757 = vmax.xlane.f32.xlu0 %v7521_v56 }
 0x431   :  { %v3517_v63 = vpop.f32.mrf.mxu0 }
 0x432   :  { %v3518_v19 = vadd.f32 %v7456_v31, %v3517_v63 }
 0x434   :  { %v3569_v28 = vmax.f32 %v3518_v19, 0.0 }
 0x435   :  { %v3680_v5 = vpop.f32.mrf.mxu1 }
 0x436   :  { %v3591_v32 = vpack.c.bf16 %v3569_v28, %v3568_v7  ;;  %v7527_v44 = vadd.f32 %v7514_v25, %v3680_v5 }
 0x438   :  { %3719 = vmatmul.bf16.gmra.mxu1 %v3591_v32  ;;  %3759 = vmax.xlane.f32.xlu1 %v7527_v44 }
 0x439   :  { %v3520_v30 = vpop.f32.mrf.mxu0 }
 0x43a   :  { %v3521_v45 = vadd.f32 %v7456_v31, %v3520_v30 }
 0x43c   :  { %v3570_v47 = vmax.f32 %v3521_v45, 0.0 }
 0x43d   :  { %v3682_v53 = vpop.f32.mrf.mxu1 }
 0x43e   :  { %v7531_v22 = vadd.f32 %v7514_v25, %v3682_v53 }
 0x440   :  { %3761 = vmax.xlane.f32.xlu2 %v7531_v22 }
 0x441   :  { %v3522_v48 = vpop.f32.mrf.mxu0 }
 0x442   :  { %v3523_v21 = vadd.f32 %v7456_v31, %v3522_v48 }
 0x444   :  { %v3571_v50 = vmax.f32 %v3523_v21, 0.0 }
 0x445   :  { %v3685_v59 = vpop.f32.mrf.mxu1 }
 0x446   :  { %v3592_v1 = vpack.c.bf16 %v3571_v50, %v3570_v47  ;;  %v7537_v43 = vadd.f32 %v7514_v25, %v3685_v59 }
 0x448   :  { %3724 = vmatmul.bf16.gmra.mxu1 %v3592_v1  ;;  %3763 = vmax.xlane.f32.xlu2 %v7537_v43 }
 0x449   :  { %v3525_v35 = vpop.f32.mrf.mxu0 }
 0x44a   :  { %v3526_v13 = vadd.f32 %v7456_v31, %v3525_v35 }
 0x44c   :  { %v3572_v46 = vmax.f32 %v3526_v13, 0.0 }
 0x44d   :  { %v3687_v20 = vpop.f32.mrf.mxu1 }
 0x44e   :  { %v7541_v29 = vadd.f32 %v7514_v25, %v3687_v20 }
 0x450   :  { %3765 = vmax.xlane.f32.xlu0 %v7541_v29 }
 0x451   :  { %v3527_v54 = vpop.f32.mrf.mxu0 }
 0x452   :  { %v3528_v17 = vadd.f32 %v7456_v31, %v3527_v54 }
 0x454   :  { %v3573_v55 = vmax.f32 %v3528_v17, 0.0 }
 0x455   :  { %v3690_v0 = vpop.f32.mrf.mxu1 }
 0x456   :  { %v3593_v11 = vpack.c.bf16 %v3573_v55, %v3572_v46  ;;  %v7547_v9 = vadd.f32 %v7514_v25, %v3690_v0 }
 0x458   :  { %3729 = vmatmul.bf16.gmra.mxu1 %v3593_v11  ;;  %3767 = vmax.xlane.f32.xlu1 %v7547_v9 }
 0x459   :  { %v3530_v62 = vpop.f32.mrf.mxu0 }
 0x45a   :  { %v3531_v15 = vadd.f32 %v7456_v31, %v3530_v62 }
 0x45c   :  { %v3574_v39 = vmax.f32 %v3531_v15, 0.0 }
 0x45d   :  { %v3692_v18 = vpop.f32.mrf.mxu1 }
 0x45e   :  { %v7551_v60 = vadd.f32 %v7514_v25, %v3692_v18 }
 0x460   :  { %3769 = vmax.xlane.f32.xlu2 %v7551_v60 }
 0x461   :  { %v3532_v4 = vpop.f32.mrf.mxu0 }
 0x462   :  { %v3533_v26 = vadd.f32 %v7456_v31, %v3532_v4 }
 0x464   :  { %v3575_v16 = vmax.f32 %v3533_v26, 0.0 }
 0x465   :  { %v3695_v2 = vpop.f32.mrf.mxu1 }
 0x466   :  { %v3594_v27 = vpack.c.bf16 %v3575_v16, %v3574_v39  ;;  %v7557_v34 = vadd.f32 %v7514_v25, %v3695_v2 }
 0x468   :  { %3734 = vmatmul.bf16.gmra.mxu1 %v3594_v27  ;;  %3771 = vmax.xlane.f32.xlu0 %v7557_v34 }
 0x46a   :  { %v3535_v49 = vpop.f32.mrf.mxu0 }
 0x46b   :  { %v3536_v38 = vadd.f32 %v7456_v31, %v3535_v49 }
 0x46d   :  { %v3697_v24 = vpop.f32.mrf.mxu1  ;;  %v3576_v41 = vmax.f32 %v3536_v38, 0.0 }
 0x46e   :  { %v7561_v8 = vadd.f32 %v7514_v25, %v3697_v24 }
 0x470   :  { %3773 = vmax.xlane.f32.xlu1 %v7561_v8 }
 0x472   :  { %v3537_v51 = vpop.f32.mrf.mxu0 }
 0x473   :  { %v3538_v23 = vadd.f32 %v7456_v31, %v3537_v51 }
 0x475   :  { %v3577_v10 = vmax.f32 %v3538_v23, 0.0  ;;  %v3700_v36 = vpop.f32.mrf.mxu1 }
 0x476   :  { %v7567_v52 = vadd.f32 %v7514_v25, %v3700_v36 }
 0x477   :  { %v3595_v33 = vpack.c.bf16 %v3577_v10, %v3576_v41 }
 0x478   :  { %3775 = vmax.xlane.f32.xlu2 %v7567_v52 }
 0x479   :  { %3739 = vmatmul.bf16.gmra.mxu1 %v3595_v33 }
 0x47d   :  { %v3702_v57 = vpop.f32.mrf.mxu1 }
 0x47e   :  { %v7571_v6 = vadd.f32 %v7514_v25, %v3702_v57  ;;  %v3540_v12 = vpop.f32.mrf.mxu0 }
 0x47f   :  { %v3541_v3 = vadd.f32 %v7456_v31, %v3540_v12 }
 0x480   :  { %3777 = vmax.xlane.f32.xlu0 %v7571_v6 }
 0x481   :  { %v3578_v58 = vmax.f32 %v3541_v3, 0.0 }
 0x485   :  { %v3705_v42 = vpop.f32.mrf.mxu1 }
 0x486   :  { %v7576_v61 = vadd.f32 %v7514_v25, %v3705_v42  ;;  %v3542_v14 = vpop.f32.mrf.mxu0 }
 0x487   :  { %v3543_v40 = vadd.f32 %v7456_v31, %v3542_v14 }
 0x488   :  { %3779 = vmax.xlane.f32.xlu1 %v7576_v61 }
 0x489   :  { %v3579_v63 = vmax.f32 %v3543_v40, 0.0 }
 0x48b   :  { %v3596_v19 = vpack.c.bf16 %v3579_v63, %v3578_v58 }
 0x48d   :  { %v3707_v7 = vpop.f32.mrf.mxu1  ;;  %3744 = vmatmul.bf16.gmra.mxu1 %v3596_v19 }
 0x48e   :  { %v7581_v28 = vadd.f32 %v7514_v25, %v3707_v7 }
 0x490   :  { %3781 = vmax.xlane.f32.xlu2 %v7581_v28 }
 0x495   :  { %v3710_v5 = vpop.f32.mrf.mxu1 }
 0x496   :  { %v7585_v32 = vadd.f32 %v7514_v25, %v3710_v5 }
 0x497   :  { %v3545_v30 = vpop.f32.mrf.mxu0 }
 0x498   :  { %3783 = vmax.xlane.f32.xlu0 %v7585_v32  ;;  %v3546_v21 = vadd.f32 %v7456_v31, %v3545_v30 }
 0x49a   :  { %v3580_v35 = vmax.f32 %v3546_v21, 0.0 }
 0x49b   :  { %v3756_v53 = vpop.xlane.xlu2 %3755 }
 0x49c   :  { %v3819_v45 = vsub.f32 %v7517_v37, %v3756_v53 }
 0x49d   :  { %v3712_v48 = vpop.f32.mrf.mxu1 }
 0x49e   :  { %v3851_v47 = vmul.f32 1.442695, %v3819_v45  ;;  %v7591_v50 = vadd.f32 %v7514_v25, %v3712_v48 }
 0x49f   :  { %v3547_v59 = vpop.f32.mrf.mxu0 }
 0x4a0   :  { %4891 = vpow2.f32 %v3851_v47  ;;  %v3548_v1 = vadd.f32 %v7456_v31, %v3547_v59  ;;  %3785 = vmax.xlane.f32.xlu1 %v7591_v50 }
 0x4a2   :  { %v3581_v20 = vmax.f32 %v3548_v1, 0.0 }
 0x4a3   :  { %v3758_v13 = vpop.xlane.xlu0 %3757 }
 0x4a4   :  { %v3597_v54 = vpack.c.bf16 %v3581_v20, %v3580_v35  ;;  %v3820_v17 = vsub.f32 %v7521_v56, %v3758_v13 }
 0x4a5   :  { %v3715_v37 = vpop.f32.mrf.mxu1 }
 0x4a6   :  { %v7596_v46 = vpop.eup %4891  ;;  %v3853_v55 = vmul.f32 1.442695, %v3820_v17  ;;  %v7599_v0 = vadd.f32 %v7514_v25, %v3715_v37  ;;  %3749 = vmatmul.bf16.gmra.mxu1 %v3597_v54 }
 0x4a7   :  { %3915 = vadd.xlane.f32.xlu0 %v7596_v46 }
 0x4a8   :  { %4893 = vpow2.f32 %v3853_v55  ;;  %3787 = vmax.xlane.f32.xlu2 %v7599_v0 }
 0x4ab   :  { %v3760_v31 = vpop.xlane.xlu1 %3759 }
 0x4ac   :  { %v3821_v11 = vsub.f32 %v7527_v44, %v3760_v31 }
 0x4ad   :  { %v3717_v62 = vpop.f32.mrf.mxu1 }
 0x4ae   :  { %v7604_v18 = vpop.eup %4893  ;;  %v3855_v56 = vmul.f32 1.442695, %v3821_v11  ;;  %v7607_v15 = vadd.f32 %v7514_v25, %v3717_v62 }
 0x4af   :  { %3917 = vadd.xlane.f32.xlu1 %v7604_v18 }
 0x4b0   :  { %4895 = vpow2.f32 %v3855_v56  ;;  %3789 = vmax.xlane.f32.xlu0 %v7607_v15 }
 0x4b3   :  { %v3762_v4 = vpop.xlane.xlu2 %3761 }
 0x4b4   :  { %v3822_v26 = vsub.f32 %v7531_v22, %v3762_v4 }
 0x4b5   :  { %v3720_v39 = vpop.f32.mrf.mxu1 }
 0x4b6   :  { %v7612_v16 = vpop.eup %4895  ;;  %v3857_v2 = vmul.f32 1.442695, %v3822_v26  ;;  %v7615_v44 = vadd.f32 %v7514_v25, %v3720_v39 }
 0x4b7   :  { %3919 = vadd.xlane.f32.xlu2 %v7612_v16 }
 0x4b8   :  { %4897 = vpow2.f32 %v3857_v2  ;;  %3791 = vmax.xlane.f32.xlu1 %v7615_v44 }
 0x4bb   :  { %v3764_v27 = vpop.xlane.xlu2 %3763 }
 0x4bc   :  { %v3823_v49 = vsub.f32 %v7537_v43, %v3764_v27 }
 0x4bd   :  { %v3722_v24 = vpop.f32.mrf.mxu1 }
 0x4be   :  { %v7620_v38 = vpop.eup %4897  ;;  %v3859_v51 = vmul.f32 1.442695, %v3823_v49  ;;  %v7623_v22 = vadd.f32 %v7514_v25, %v3722_v24 }
 0x4bf   :  { %3921 = vadd.xlane.f32.xlu0 %v7620_v38 }
 0x4c0   :  { %4899 = vpow2.f32 %v3859_v51  ;;  %3793 = vmax.xlane.f32.xlu2 %v7623_v22 }
 0x4c3   :  { %v3766_v23 = vpop.xlane.xlu0 %3765 }
 0x4c4   :  { %v3824_v41 = vsub.f32 %v7541_v29, %v3766_v23 }
 0x4c5   :  { %v3725_v10 = vpop.f32.mrf.mxu1 }
 0x4c6   :  { %v7628_v36 = vpop.eup %4899  ;;  %v3861_v33 = vmul.f32 1.442695, %v3824_v41  ;;  %v7631_v43 = vadd.f32 %v7514_v25, %v3725_v10 }
 0x4c7   :  { %3923 = vadd.xlane.f32.xlu1 %v7628_v36 }
 0x4c8   :  { %4901 = vpow2.f32 %v3861_v33  ;;  %3795 = vmax.xlane.f32.xlu0 %v7631_v43 }
 0x4cb   :  { %v3768_v57 = vpop.xlane.xlu1 %3767 }
 0x4cc   :  { %v3825_v12 = vsub.f32 %v7547_v9, %v3768_v57 }
 0x4cd   :  { %v3727_v3 = vpop.f32.mrf.mxu1 }
 0x4ce   :  { %v7636_v42 = vpop.eup %4901  ;;  %v3863_v14 = vmul.f32 1.442695, %v3825_v12  ;;  %v7639_v29 = vadd.f32 %v7514_v25, %v3727_v3 }
 0x4cf   :  { %3925 = vadd.xlane.f32.xlu2 %v7636_v42 }
 0x4d0   :  { %4903 = vpow2.f32 %v3863_v14  ;;  %3797 = vmax.xlane.f32.xlu1 %v7639_v29 }
 0x4d3   :  { %v3770_v40 = vpop.xlane.xlu2 %3769 }
 0x4d4   :  { %v3826_v58 = vsub.f32 %v7551_v60, %v3770_v40 }
 0x4d5   :  { %v3730_v63 = vpop.f32.mrf.mxu1 }
 0x4d6   :  { %v7644_v19 = vpop.eup %4903  ;;  %v3865_v7 = vmul.f32 1.442695, %v3826_v58  ;;  %v7647_v9 = vadd.f32 %v7514_v25, %v3730_v63 }
 0x4d7   :  { %3927 = vadd.xlane.f32.xlu0 %v7644_v19 }
 0x4d8   :  { %4905 = vpow2.f32 %v3865_v7  ;;  %3799 = vmax.xlane.f32.xlu2 %v7647_v9 }
 0x4db   :  { %v3772_v5 = vpop.xlane.xlu0 %3771 }
 0x4dc   :  { %v3827_v30 = vsub.f32 %v7557_v34, %v3772_v5 }
 0x4dd   :  { %v3732_v53 = vpop.f32.mrf.mxu1 }
 0x4de   :  { %v7652_v45 = vpop.eup %4905  ;;  %v3867_v48 = vmul.f32 1.442695, %v3827_v30  ;;  %v7655_v60 = vadd.f32 %v7514_v25, %v3732_v53 }
 0x4df   :  { %3929 = vadd.xlane.f32.xlu1 %v7652_v45 }
 0x4e0   :  { %4907 = vpow2.f32 %v3867_v48  ;;  %3801 = vmax.xlane.f32.xlu0 %v7655_v60 }
 0x4e3   :  { %v3774_v21 = vpop.xlane.xlu1 %3773 }
 0x4e4   :  { %v3828_v47 = vsub.f32 %v7561_v8, %v3774_v21 }
 0x4e5   :  { %v3735_v59 = vpop.f32.mrf.mxu1 }
 0x4e6   :  { %v7660_v1 = vpop.eup %4907  ;;  %v3869_v35 = vmul.f32 1.442695, %v3828_v47  ;;  %v7663_v34 = vadd.f32 %v7514_v25, %v3735_v59 }
 0x4e7   :  { %3931 = vadd.xlane.f32.xlu2 %v7660_v1 }
 0x4e8   :  { %4909 = vpow2.f32 %v3869_v35  ;;  %3803 = vmax.xlane.f32.xlu1 %v7663_v34 }
 0x4eb   :  { %v3776_v20 = vpop.xlane.xlu2 %3775 }
 0x4ec   :  { %v3829_v13 = vsub.f32 %v7567_v52, %v3776_v20 }
 0x4ed   :  { %v3737_v54 = vpop.f32.mrf.mxu1 }
 0x4ee   :  { %v7668_v17 = vpop.eup %4909  ;;  %v3871_v37 = vmul.f32 1.442695, %v3829_v13  ;;  %v7671_v8 = vadd.f32 %v7514_v25, %v3737_v54 }
 0x4ef   :  { %3933 = vadd.xlane.f32.xlu0 %v7668_v17 }
 0x4f0   :  { %4911 = vpow2.f32 %v3871_v37  ;;  %3805 = vmax.xlane.f32.xlu2 %v7671_v8 }
 0x4f3   :  { %v3778_v56 = vpop.xlane.xlu0 %3777 }
 0x4f6   :  { %v7675_v55 = vpop.eup %4911  ;;  %v3740_v31 = vpop.f32.mrf.mxu1 }
 0x4f7   :  { %v7678_v11 = vadd.f32 %v7514_v25, %v3740_v31  ;;  %3935 = vadd.xlane.f32.xlu1 %v7675_v55 }
 0x4f9   :  { %3807 = vmax.xlane.f32.xlu0 %v7678_v11 }
 0x4fb   :  { %v3780_v26 = vpop.xlane.xlu1 %3779 }
 0x4fc   :  { %v3831_v2 = vsub.f32 %v7576_v61, %v3780_v26 }
 0x4fe   :  { %v3742_v52 = vpop.f32.mrf.mxu1  ;;  %v3875_v27 = vmul.f32 1.442695, %v3831_v2 }
 0x4ff   :  { %v7683_v62 = vadd.f32 %v7514_v25, %v3742_v52 }
 0x500   :  { %4913 = vpow2.f32 %v3875_v27 }
 0x501   :  { %3809 = vmax.xlane.f32.xlu1 %v7683_v62 }
 0x503   :  { %v3782_v10 = vpop.xlane.xlu2 %3781 }
 0x504   :  { %v3832_v61 = vsub.f32 %v7581_v28, %v3782_v10  ;;  %v3830_v28 = vsub.f32 %v7571_v6, %v3778_v56 }
 0x506   :  { %v7696_v12 = vpop.eup %4913  ;;  %v3877_v63 = vmul.f32 1.442695, %v3832_v61  ;;  %v3873_v53 = vmul.f32 1.442695, %v3830_v28 }
 0x50a   :  { %v3745_v4 = vpop.f32.mrf.mxu1 }
 0x50b   :  { %v7687_v39 = vadd.f32 %v7514_v25, %v3745_v4  ;;  %v3784_v49 = vpop.xlane.xlu0 %3783 }
 0x50c   :  { %v3833_v54 = vsub.f32 %v7585_v32, %v3784_v49 }
 0x50d   :  { %3811 = vmax.xlane.f32.xlu2 %v7687_v39 }
 0x512   :  { %v3747_v24 = vpop.f32.mrf.mxu1 }
 0x513   :  { %v7692_v51 = vadd.f32 %v7514_v25, %v3747_v24  ;;  %v3786_v23 = vpop.xlane.xlu1 %3785 }
 0x514   :  { %v3834_v41 = vsub.f32 %v7591_v50, %v3786_v23 }
 0x515   :  { %3813 = vmax.xlane.f32.xlu0 %v7692_v51 }
 0x516   :  { %v3881_v33 = vmul.f32 1.442695, %v3834_v41 }
 0x51a   :  { %v3916_v57 = vpop.xlane.xlu0 %3915 }
 0x51b   :  { %4915 = vrcp.f32 %v3916_v57  ;;  %v3788_v40 = vpop.xlane.xlu2 %3787 }
 0x51c   :  { %4917 = vpow2.f32 %v3881_v33 }
 0x51d   :  { %3939 = vadd.xlane.f32.xlu0 %v7696_v12 }
 0x521   :  { %v4916_v3 = vpop.eup %4915 }
 0x522   :  { %v4011_v14 = vmul.f32 %v4916_v3, %v7596_v46  ;;  %v3918_v58 = vpop.xlane.xlu1 %3917  ;;  %v7701_v7 = vpop.eup %4917  ;;  %v3835_v46 = vsub.f32 %v7599_v0, %v3788_v40 }
 0x523   :  { %4919 = vrcp.f32 %v3918_v58  ;;  %v3750_v50 = vpop.f32.mrf.mxu1  ;;  %v3790_v21 = vpop.xlane.xlu0 %3789 }
 0x524   :  { %4044 = vst.msk [vmem:[%s7953_s7] sm:$0xff] %vm4043_vm2, %v4011_v14  ;;  %v7708_v5 = vadd.f32 %v7514_v25, %v3750_v50  ;;  %4921 = vpow2.f32 %v3877_v63  ;;  %v3883_v59 = vmul.f32 1.442695, %v3835_v46 }
 0x525   :  { %3945 = vadd.xlane.f32.xlu0 %v7701_v7 }
 0x526   :  { %3815 = vmax.xlane.f32.xlu1 %v7708_v5 }
 0x529   :  { %v4920_v30 = vpop.eup %4919 }
 0x52a   :  { %v4012_v48 = vmul.f32 %v4920_v30, %v7604_v18  ;;  %v3920_v47 = vpop.xlane.xlu2 %3919  ;;  %v7723_v0 = vpop.eup %4921 }
 0x52b   :  { %4923 = vrcp.f32 %v3920_v47  ;;  %v3792_v35 = vpop.xlane.xlu1 %3791  ;;  %v3752_v20 = vpop.f32.mrf.mxu1 }
 0x52c   :  { %4045 = vst.msk [vmem:[%s7953_s7 + $0x8] sm:$0xff] %vm4043_vm2, %v4012_v48  ;;  %v3837_v6 = vsub.f32 %v7615_v44, %v3792_v35  ;;  %v7721_v13 = vadd.f32 %v7514_v25, %v3752_v20  ;;  %4925 = vpow2.f32 %v3873_v53  ;;  %v3879_v44 = vmul.f32 1.442695, %v3833_v54 }
 0x52d   :  { %4927 = vpow2.f32 %v3883_v59 }
 0x52e   :  { %v3887_v18 = vmul.f32 1.442695, %v3837_v6  ;;  %3817 = vmax.xlane.f32.xlu2 %v7721_v13  ;;  %3941 = vadd.xlane.f32.xlu1 %v7723_v0 }
 0x530   :  { %4929 = vpow2.f32 %v3887_v18 }
 0x531   :  { %v4924_v37 = vpop.eup %4923 }
 0x532   :  { %v4013_v31 = vmul.f32 %v4924_v37, %v7612_v16  ;;  %v3922_v52 = vpop.xlane.xlu0 %3921  ;;  %v7729_v56 = vpop.eup %4925  ;;  %v3836_v16 = vsub.f32 %v7607_v15, %v3790_v21 }
 0x533   :  { %4931 = vrcp.f32 %v3922_v52  ;;  %v3794_v25 = vpop.xlane.xlu2 %3793  ;;  %v7736_v26 = vpop.eup %4927 }
 0x534   :  { %4046 = vst.msk [vmem:[%s7953_s7 + $0x10] sm:$0xff] %vm4043_vm2, %v4013_v31  ;;  %v3838_v4 = vsub.f32 %v7623_v22, %v3794_v25  ;;  %4933 = vpow2.f32 %v3879_v44  ;;  %v3885_v22 = vmul.f32 1.442695, %v3836_v16 }
 0x536   :  { %v7738_v32 = vpop.eup %4929  ;;  %v3889_v2 = vmul.f32 1.442695, %v3838_v4  ;;  %3937 = vadd.xlane.f32.xlu2 %v7729_v56  ;;  %3947 = vadd.xlane.f32.xlu1 %v7736_v26 }
 0x537   :  { %3951 = vadd.xlane.f32.xlu0 %v7738_v32 }
 0x538   :  { %4935 = vpow2.f32 %v3889_v2 }
 0x539   :  { %v4932_v27 = vpop.eup %4931 }
 0x53a   :  { %v4014_v49 = vmul.f32 %v4932_v27, %v7620_v38  ;;  %v3924_v24 = vpop.xlane.xlu1 %3923  ;;  %v7749_v41 = vpop.eup %4933 }
 0x53b   :  { %4937 = vrcp.f32 %v3924_v24  ;;  %v3796_v23 = vpop.xlane.xlu0 %3795 }
 0x53c   :  { %4047 = vst.msk [vmem:[%s7953_s7 + $0x18] sm:$0xff] %vm4043_vm2, %v4014_v49  ;;  %4939 = vpow2.f32 %v3885_v22  ;;  %v3839_v15 = vsub.f32 %v7631_v43, %v3796_v23 }
 0x53e   :  { %v7751_v10 = vpop.eup %4935  ;;  %3943 = vadd.xlane.f32.xlu2 %v7749_v41  ;;  %v3891_v61 = vmul.f32 1.442695, %v3839_v15 }
 0x53f   :  { %3953 = vadd.xlane.f32.xlu1 %v7751_v10 }
 0x541   :  { %v4938_v38 = vpop.eup %4937 }
 0x542   :  { %v4015_v33 = vmul.f32 %v4938_v38, %v7628_v36  ;;  %v3926_v57 = vpop.xlane.xlu2 %3925  ;;  %v7762_v40 = vpop.eup %4939 }
 0x543   :  { %4941 = vrcp.f32 %v3926_v57  ;;  %v3798_v3 = vpop.xlane.xlu1 %3797 }
 0x544   :  { %4048 = vst.msk [vmem:[%s7953_s7 + $0x20] sm:$0xff] %vm4043_vm2, %v4015_v33  ;;  %v3840_v14 = vsub.f32 %v7639_v29, %v3798_v3  ;;  %4943 = vpow2.f32 %v3891_v61 }
 0x546   :  { %v3893_v58 = vmul.f32 1.442695, %v3840_v14  ;;  %3949 = vadd.xlane.f32.xlu2 %v7762_v40 }
 0x548   :  { %4945 = vpow2.f32 %v3893_v58 }
 0x549   :  { %v4942_v43 = vpop.eup %4941 }
 0x54a   :  { %v4016_v36 = vmul.f32 %v4942_v43, %v7636_v42  ;;  %v3928_v63 = vpop.xlane.xlu0 %3927  ;;  %v7771_v28 = vpop.eup %4943 }
 0x54b   :  { %4947 = vrcp.f32 %v3928_v63  ;;  %v3800_v50 = vpop.xlane.xlu2 %3799 }
 0x54c   :  { %4049 = vst.msk [vmem:[%s7953_s7 + $0x28] sm:$0xff] %vm4043_vm2, %v4016_v36  ;;  %v3841_v29 = vsub.f32 %v7647_v9, %v3800_v50 }
 0x54e   :  { %v7773_v46 = vpop.eup %4945  ;;  %v3895_v30 = vmul.f32 1.442695, %v3841_v29  ;;  %3955 = vadd.xlane.f32.xlu2 %v7771_v28 }
 0x54f   :  { %3957 = vadd.xlane.f32.xlu0 %v7773_v46 }
 0x550   :  { %4949 = vpow2.f32 %v3895_v30 }
 0x551   :  { %v4948_v42 = vpop.eup %4947 }
 0x552   :  { %v4017_v53 = vmul.f32 %v4948_v42, %v7644_v19  ;;  %v3930_v48 = vpop.xlane.xlu1 %3929 }
 0x553   :  { %4951 = vrcp.f32 %v3930_v48  ;;  %v3802_v21 = vpop.xlane.xlu0 %3801 }
 0x554   :  { %4050 = vst.msk [vmem:[%s7953_s7 + $0x30] sm:$0xff] %vm4043_vm2, %v4017_v53  ;;  %v3842_v9 = vsub.f32 %v7655_v60, %v3802_v21 }
 0x556   :  { %v7783_v47 = vpop.eup %4949  ;;  %v3897_v59 = vmul.f32 1.442695, %v3842_v9 }
 0x557   :  { %3959 = vadd.xlane.f32.xlu1 %v7783_v47 }
 0x558   :  { %4953 = vpow2.f32 %v3897_v59 }
 0x559   :  { %v4952_v35 = vpop.eup %4951 }
 0x55a   :  { %v4018_v20 = vmul.f32 %v4952_v35, %v7652_v45  ;;  %v3932_v19 = vpop.xlane.xlu2 %3931 }
 0x55b   :  { %4955 = vrcp.f32 %v3932_v19  ;;  %v3804_v6 = vpop.xlane.xlu1 %3803 }
 0x55c   :  { %4051 = vst.msk [vmem:[%s7953_s7 + $0x38] sm:$0xff] %vm4043_vm2, %v4018_v20  ;;  %v3843_v18 = vsub.f32 %v7663_v34, %v3804_v6 }
 0x55e   :  { %v7792_v60 = vpop.eup %4953  ;;  %v3899_v54 = vmul.f32 1.442695, %v3843_v18 }
 0x55f   :  { %3961 = vadd.xlane.f32.xlu2 %v7792_v60 }
 0x560   :  { %4957 = vpow2.f32 %v3899_v54 }
 0x561   :  { %v4956_v37 = vpop.eup %4955 }
 0x562   :  { %v4019_v31 = vmul.f32 %v4956_v37, %v7660_v1  ;;  %v3934_v45 = vpop.xlane.xlu0 %3933 }
 0x563   :  { %4959 = vrcp.f32 %v3934_v45  ;;  %v3806_v52 = vpop.xlane.xlu2 %3805 }
 0x564   :  { %4052 = vst.msk [vmem:[%s7953_s7 + $0x40] sm:$0xff] %vm4043_vm2, %v4019_v31  ;;  %v3844_v44 = vsub.f32 %v7671_v8, %v3806_v52 }
 0x566   :  { %v7801_v34 = vpop.eup %4957  ;;  %v3901_v25 = vmul.f32 1.442695, %v3844_v44 }
 0x567   :  { %3963 = vadd.xlane.f32.xlu0 %v7801_v34 }
 0x568   :  { %4961 = vpow2.f32 %v3901_v25 }
 0x569   :  { %v4960_v4 = vpop.eup %4959 }
 0x56a   :  { %v4020_v2 = vmul.f32 %v4960_v4, %v7668_v17  ;;  %v3936_v1 = vpop.xlane.xlu1 %3935 }
 0x56b   :  { %4963 = vrcp.f32 %v3936_v1 }
 0x56c   :  { %4053 = vst.msk [vmem:[%s7953_s7 + $0x48] sm:$0xff] %vm4043_vm2, %v4020_v2  ;;  %v3808_v16 = vpop.xlane.xlu0 %3807 }
 0x56d   :  { %v3845_v27 = vsub.f32 %v7678_v11, %v3808_v16 }
 0x56e   :  { %v7810_v8 = vpop.eup %4961 }
 0x56f   :  { %v3903_v49 = vmul.f32 1.442695, %v3845_v27  ;;  %3965 = vadd.xlane.f32.xlu1 %v7810_v8 }
 0x571   :  { %v4964_v24 = vpop.eup %4963  ;;  %4965 = vpow2.f32 %v3903_v49 }
 0x572   :  { %v4021_v22 = vmul.f32 %v4964_v24, %v7675_v55 }
 0x574   :  { %4054 = vst.msk [vmem:[%s7953_s7 + $0x50] sm:$0xff] %vm4043_vm2, %v4021_v22  ;;  %v3810_v17 = vpop.xlane.xlu1 %3809 }
 0x575   :  { %v3846_v23 = vsub.f32 %v7683_v62, %v3810_v17 }
 0x577   :  { %v7819_v15 = vpop.eup %4965  ;;  %v3905_v11 = vmul.f32 1.442695, %v3846_v23 }
 0x578   :  { %3967 = vadd.xlane.f32.xlu2 %v7819_v15 }
 0x579   :  { %4967 = vpow2.f32 %v3905_v11 }
 0x57f   :  { %v7822_v38 = vpop.eup %4967 }
 0x580   :  { %3969 = vadd.xlane.f32.xlu0 %v7822_v38  ;;  %v3812_v33 = vpop.xlane.xlu2 %3811 }
 0x581   :  { %v3847_v55 = vsub.f32 %v7687_v39, %v3812_v33 }
 0x583   :  { %v3907_v57 = vmul.f32 1.442695, %v3847_v55 }
 0x585   :  { %4969 = vpow2.f32 %v3907_v57 }
 0x588   :  { %v3814_v61 = vpop.xlane.xlu0 %3813 }
 0x589   :  { %v3848_v3 = vsub.f32 %v7692_v51, %v3814_v61 }
 0x58b   :  { %v7827_v14 = vpop.eup %4969  ;;  %v3909_v62 = vmul.f32 1.442695, %v3848_v3 }
 0x58c   :  { %3971 = vadd.xlane.f32.xlu1 %v7827_v14 }
 0x58d   :  { %4971 = vpow2.f32 %v3909_v62 }
 0x590   :  { %v3940_v58 = vpop.xlane.xlu0 %3939 }
 0x591   :  { %4973 = vrcp.f32 %v3940_v58 }
 0x593   :  { %v7830_v43 = vpop.eup %4971 }
 0x594   :  { %3973 = vadd.xlane.f32.xlu2 %v7830_v43 }
 0x597   :  { %v4974_v36 = vpop.eup %4973 }
 0x598   :  { %v4023_v39 = vmul.f32 %v4974_v36, %v7696_v12  ;;  %v3946_v63 = vpop.xlane.xlu0 %3945 }
 0x599   :  { %4975 = vrcp.f32 %v3946_v63  ;;  %v3816_v50 = vpop.xlane.xlu1 %3815 }
 0x59a   :  { %4056 = vst.msk [vmem:[%s7953_s7 + $0x60] sm:$0xff] %vm4043_vm2, %v4023_v39  ;;  %v3849_v51 = vsub.f32 %v7708_v5, %v3816_v50 }
 0x59c   :  { %v3911_v29 = vmul.f32 1.442695, %v3849_v51 }
 0x59e   :  { %4977 = vpow2.f32 %v3911_v29 }
 0x59f   :  { %v4976_v30 = vpop.eup %4975 }
 0x5a0   :  { %v4026_v42 = vmul.f32 %v4976_v30, %v7701_v7 }
 0x5a1   :  { %v3818_v53 = vpop.xlane.xlu2 %3817  ;;  %v3942_v48 = vpop.xlane.xlu1 %3941 }
 0x5a2   :  { %4059 = vst.msk [vmem:[%s7953_s7 + $0x78] sm:$0xff] %vm4043_vm2, %v4026_v42  ;;  %v3850_v12 = vsub.f32 %v7721_v13, %v3818_v53  ;;  %4979 = vrcp.f32 %v3942_v48 }
 0x5a4   :  { %v7845_v21 = vpop.eup %4977  ;;  %v3913_v9 = vmul.f32 1.442695, %v3850_v12 }
 0x5a5   :  { %3975 = vadd.xlane.f32.xlu0 %v7845_v21 }
 0x5a6   :  { %4981 = vpow2.f32 %v3913_v9 }
 0x5a8   :  { %v4980_v5 = vpop.eup %4979 }
 0x5a9   :  { %v4024_v59 = vmul.f32 %v4980_v5, %v7723_v0  ;;  %v3938_v7 = vpop.xlane.xlu2 %3937  ;;  %v3948_v35 = vpop.xlane.xlu1 %3947 }
 0x5aa   :  { %4983 = vrcp.f32 %v3938_v7  ;;  %v3952_v20 = vpop.xlane.xlu0 %3951 }
 0x5ab   :  { %4057 = vst.msk [vmem:[%s7953_s7 + $0x68] sm:$0xff] %vm4043_vm2, %v4024_v59  ;;  %4985 = vrcp.f32 %v3948_v35 }
 0x5ac   :  { %v7853_v13 = vpop.eup %4981  ;;  %4987 = vrcp.f32 %v3952_v20 }
 0x5ad   :  { %3977 = vadd.xlane.f32.xlu1 %v7853_v13 }
 0x5b0   :  { %v4984_v19 = vpop.eup %4983 }
 0x5b1   :  { %v4986_v6 = vpop.eup %4985  ;;  %v4022_v18 = vmul.f32 %v4984_v19, %v7729_v56  ;;  %v3944_v0 = vpop.xlane.xlu2 %3943 }
 0x5b2   :  { %v4988_v54 = vpop.eup %4987  ;;  %v4027_v37 = vmul.f32 %v4986_v6, %v7736_v26  ;;  %4989 = vrcp.f32 %v3944_v0  ;;  %v3954_v31 = vpop.xlane.xlu1 %3953 }
 0x5b3   :  { %4055 = vst.msk [vmem:[%s7953_s7 + $0x58] sm:$0xff] %vm4043_vm2, %v4022_v18  ;;  %v4029_v45 = vmul.f32 %v4988_v54, %v7738_v32  ;;  %4991 = vrcp.f32 %v3954_v31 }
 0x5b4   :  { %4060 = vst.msk [vmem:[%s7953_s7 + $0x80] sm:$0xff] %vm4043_vm2, %v4027_v37 }
 0x5b5   :  { %4062 = vst.msk [vmem:[%s7953_s7 + $0x90] sm:$0xff] %vm4043_vm2, %v4029_v45 }
 0x5b8   :  { %v4990_v56 = vpop.eup %4989 }
 0x5b9   :  { %v4992_v26 = vpop.eup %4991  ;;  %v4025_v52 = vmul.f32 %v4990_v56, %v7749_v41  ;;  %v3950_v44 = vpop.xlane.xlu2 %3949 }
 0x5ba   :  { %v4030_v25 = vmul.f32 %v4992_v26, %v7751_v10  ;;  %4993 = vrcp.f32 %v3950_v44 }
 0x5bb   :  { %4058 = vst.msk [vmem:[%s7953_s7 + $0x70] sm:$0xff] %vm4043_vm2, %v4025_v52 }
 0x5bc   :  { %4063 = vst.msk [vmem:[%s7953_s7 + $0x98] sm:$0xff] %vm4043_vm2, %v4030_v25 }
 0x5c0   :  { %v4994_v32 = vpop.eup %4993 }
 0x5c1   :  { %v4028_v4 = vmul.f32 %v4994_v32, %v7762_v40  ;;  %v3956_v2 = vpop.xlane.xlu2 %3955 }
 0x5c2   :  { %4995 = vrcp.f32 %v3956_v2  ;;  %v3958_v41 = vpop.xlane.xlu0 %3957 }
 0x5c3   :  { %4061 = vst.msk [vmem:[%s7953_s7 + $0x88] sm:$0xff] %vm4043_vm2, %v4028_v4  ;;  %4997 = vrcp.f32 %v3958_v41 }
 0x5c8   :  { %v4996_v10 = vpop.eup %4995 }
 0x5c9   :  { %v4998_v1 = vpop.eup %4997  ;;  %v4031_v16 = vmul.f32 %v4996_v10, %v7771_v28 }
 0x5ca   :  { %v4032_v27 = vmul.f32 %v4998_v1, %v7773_v46  ;;  %v3960_v49 = vpop.xlane.xlu1 %3959 }
 0x5cb   :  { %4064 = vst.msk [vmem:[%s7953_s7 + $0xa0] sm:$0xff] %vm4043_vm2, %v4031_v16  ;;  %4999 = vrcp.f32 %v3960_v49 }
 0x5cc   :  { %4065 = vst.msk [vmem:[%s7953_s7 + $0xa8] sm:$0xff] %vm4043_vm2, %v4032_v27 }
 0x5d1   :  { %v5000_v40 = vpop.eup %4999 }
 0x5d2   :  { %v4033_v24 = vmul.f32 %v5000_v40, %v7783_v47  ;;  %v3962_v22 = vpop.xlane.xlu2 %3961 }
 0x5d3   :  { %5001 = vrcp.f32 %v3962_v22 }
 0x5d4   :  { %4066 = vst.msk [vmem:[%s7953_s7 + $0xb0] sm:$0xff] %vm4043_vm2, %v4033_v24 }
 0x5d9   :  { %v5002_v28 = vpop.eup %5001 }
 0x5da   :  { %v4034_v46 = vmul.f32 %v5002_v28, %v7792_v60  ;;  %v3964_v17 = vpop.xlane.xlu0 %3963 }
 0x5db   :  { %5003 = vrcp.f32 %v3964_v17 }
 0x5dc   :  { %4067 = vst.msk [vmem:[%s7953_s7 + $0xb8] sm:$0xff] %vm4043_vm2, %v4034_v46 }
 0x5e1   :  { %v5004_v23 = vpop.eup %5003 }
 0x5e2   :  { %v4035_v47 = vmul.f32 %v5004_v23, %v7801_v34  ;;  %v3966_v11 = vpop.xlane.xlu1 %3965 }
 0x5e3   :  { %5005 = vrcp.f32 %v3966_v11 }
 0x5e4   :  { %4068 = vst.msk [vmem:[%s7953_s7 + $0xc0] sm:$0xff] %vm4043_vm2, %v4035_v47 }
 0x5e9   :  { %v5006_v33 = vpop.eup %5005 }
 0x5ea   :  { %v4036_v60 = vmul.f32 %v5006_v33, %v7810_v8 }
 0x5eb   :  { %v3968_v55 = vpop.xlane.xlu2 %3967 }
 0x5ec   :  { %4069 = vst.msk [vmem:[%s7953_s7 + $0xc8] sm:$0xff] %vm4043_vm2, %v4036_v60  ;;  %5007 = vrcp.f32 %v3968_v55 }
 0x5f2   :  { %v5008_v57 = vpop.eup %5007 }
 0x5f3   :  { %v4037_v34 = vmul.f32 %v5008_v57, %v7819_v15  ;;  %v3970_v61 = vpop.xlane.xlu0 %3969 }
 0x5f4   :  { %5009 = vrcp.f32 %v3970_v61 }
 0x5f5   :  { %4070 = vst.msk [vmem:[%s7953_s7 + $0xd0] sm:$0xff] %vm4043_vm2, %v4037_v34 }
 0x5fa   :  { %v5010_v3 = vpop.eup %5009 }
 0x5fb   :  { %v4038_v8 = vmul.f32 %v5010_v3, %v7822_v38 }
 0x5fd   :  { %4071 = vst.msk [vmem:[%s7953_s7 + $0xd8] sm:$0xff] %vm4043_vm2, %v4038_v8 }
 0x5ff   :  { %v3972_v62 = vpop.xlane.xlu1 %3971 }
 0x600   :  { %5011 = vrcp.f32 %v3972_v62 }
 0x606   :  { %v5012_v58 = vpop.eup %5011 }
 0x607   :  { %v4039_v15 = vmul.f32 %v5012_v58, %v7827_v14  ;;  %v3974_v36 = vpop.xlane.xlu2 %3973 }
 0x608   :  { %5013 = vrcp.f32 %v3974_v36 }
 0x609   :  { %4072 = vst.msk [vmem:[%s7953_s7 + $0xe0] sm:$0xff] %vm4043_vm2, %v4039_v15 }
 0x60e   :  { %v5014_v39 = vpop.eup %5013 }
 0x60f   :  { %v4040_v38 = vmul.f32 %v5014_v39, %v7830_v43 }
 0x611   :  { %4073 = vst.msk [vmem:[%s7953_s7 + $0xe8] sm:$0xff] %vm4043_vm2, %v4040_v38 }
 0x618   :  { %v3976_v63 = vpop.xlane.xlu0 %3975 }
 0x619   :  { %5015 = vrcp.f32 %v3976_v63 }
 0x61f   :  { %v5016_v50 = vpop.eup %5015 }
 0x620   :  { %v4041_v14 = vmul.f32 %v5016_v50, %v7845_v21  ;;  %v3978_v51 = vpop.xlane.xlu1 %3977 }
 0x621   :  { %5017 = vrcp.f32 %v3978_v51 }
 0x622   :  { %4074 = vst.msk [vmem:[%s7953_s7 + $0xf0] sm:$0xff] %vm4043_vm2, %v4041_v14 }
 0x627   :  { %v5018_v29 = vpop.eup %5017 }
 0x628   :  { %v4042_v43 = vmul.f32 %v5018_v29, %v7853_v13 }
 0x62a   :  { %4075 = vst.msk [vmem:[%s7953_s7 + $0xf8] sm:$0xff] %vm4043_vm2, %v4042_v43 }
 0x62b   :  { %4080 = vsyncpa [#allocation3], 1 }
 0x62c   :  { %4081 = vsyncpa [#allocation5], 1 }

</bundles_post_ra>
